<compile_context>
chip_gen: v7x
topology: tpu7x:2x2x1
jax: 0.10.0
libtpu: 0.0.40
codegen_flags: <defaults>
</compile_context>

<pallas_src>
import jax
import jax.numpy as jnp
from jax.experimental import pallas as pl
from jax.experimental.pallas import tpu as pltpu

H, W = 25, 25
KH, KW = 5, 5
PAD = 2
CIN, COUT = 48, 64

HP, WP = H + 2 * PAD, W + 2 * PAD            # 29, 29 (padded spatial dims)
N_OUT = 768                                   # >= H*WP = 725, lane-dense (6 * 128)
L_IN = 896                                    # >= (KH-1)*WP + (KW-1) + N_OUT = 888 (7 * 128)
K_CHUNK = KW * CIN                            # 240 (per-kh contraction chunk)


def relu_conv2d_kernel(x_ref, w_ref, o_ref, col_ref):
    # x_ref  : (CIN, L_IN)        bf16, zero-padded image, spatial dims flattened row-major
    # w_ref  : (KH, COUT, K_CHUNK) bf16, weights reordered as [kh][cout][(kw, cin)]
    # o_ref  : (COUT, N_OUT)      f32, flattened-spatial output (lane-dense)
    # col_ref: (2, K_CHUNK, N_OUT) bf16 scratch, double-buffered per-kh im2col slab
    for kh in range(KH):
        slot = kh & 1
        # Build the K-chunk slab for this kh: 5 lane-shifted windows, ReLU fused in.
        for kw in range(KW):
            d = kh * WP + kw
            col_ref[slot, kw * CIN:(kw + 1) * CIN, :] = jnp.maximum(
                x_ref[:, d:d + N_OUT], 0.0).astype(jnp.bfloat16)
        # bf16 x bf16 -> f32 GEMM on the MXU: (COUT, 240) @ (240, 768) -> (COUT, 768).
        contrib = jnp.dot(w_ref[kh], col_ref[slot],
                          preferred_element_type=jnp.float32)
        if kh == 0:
            o_ref[...] = contrib
        else:
            o_ref[...] = o_ref[...] + contrib


def prepare_weights(w_oihw):
    """One-time weight reorder + bf16 cast: (COUT, CIN, KH, KW) -> (KH, COUT, KW*CIN)."""
    w = jnp.transpose(w_oihw, (2, 0, 3, 1)).reshape(KH, COUT, K_CHUNK)
    return w.astype(jnp.bfloat16)


@jax.jit
def relu_conv2d(x_nchw, w_prep):
    """x_nchw: [1, CIN, H, W] f32; w_prep: prepare_weights(...) -> [1, COUT, H, W] f32."""
    # Glue (kernel is CHW-native; only pad / reshape / cast, fused under jit).
    x = x_nchw[0]                                                   # (CIN, H, W)
    xp = jnp.pad(x, ((0, 0), (PAD, PAD), (PAD, PAD)))               # (CIN, HP, WP)
    x_flat = xp.reshape(CIN, HP * WP)                               # (CIN, 841)
    x_flat = jnp.pad(x_flat, ((0, 0), (0, L_IN - HP * WP)))         # (CIN, L_IN)
    x_flat = x_flat.astype(jnp.bfloat16)

    out_flat = pl.pallas_call(
        relu_conv2d_kernel,
        out_shape=jax.ShapeDtypeStruct((COUT, N_OUT), jnp.float32),
        in_specs=[
            pl.BlockSpec(memory_space=pltpu.MemorySpace.VMEM),
            pl.BlockSpec(memory_space=pltpu.MemorySpace.VMEM),
        ],
        out_specs=pl.BlockSpec(memory_space=pltpu.MemorySpace.VMEM),
        scratch_shapes=[
            pltpu.VMEM((2, K_CHUNK, N_OUT), jnp.bfloat16),
        ],
    )(x_flat, w_prep)

    # Valid outputs sit at flat positions y*WP + x (x < W); drop padded columns.
    out = out_flat[:, :H * WP].reshape(COUT, H, WP)[:, :, :W]       # (COUT, H, W)
    return out[None]                                                # (1, COUT, H, W)


if __name__ == "__main__":
    key = jax.random.PRNGKey(0)
    kx, kw = jax.random.split(key)

    # Input matching the module's forward: [1, 48, 25, 25]
    x = jax.random.normal(kx, (1, CIN, H, W), dtype=jnp.float32)
    # Deterministic synthetic weights for Conv2d(48, 64, 5, 5), bias=False
    w = jax.random.normal(kw, (COUT, CIN, KH, KW), dtype=jnp.float32) * 0.05

    w_prep = prepare_weights(w)                 # done once, outside the per-call path
    out = relu_conv2d(x, w_prep)
    out = jax.block_until_ready(out)
    assert out.shape == (1, COUT, H, W), out.shape

    # Reference with matching bf16 input rounding (the kernel feeds the MXU bf16 operands
    # and accumulates in f32); products of bf16 values are exact in f32, so this matches
    # the kernel up to accumulation-order error.
    x_bf = jnp.maximum(x, 0.0).astype(jnp.bfloat16).astype(jnp.float32)
    w_bf = w.astype(jnp.bfloat16).astype(jnp.float32)
    ref = jax.lax.conv_general_dilated(
        x_bf, w_bf,
        window_strides=(1, 1), padding=((PAD, PAD), (PAD, PAD)),
        dimension_numbers=("NCHW", "OIHW", "NCHW"),
        precision=jax.lax.Precision.HIGHEST,
    )
    err = float(jnp.max(jnp.abs(out - ref)))
    assert jnp.allclose(out, ref, atol=1e-2, rtol=1e-2), err

    print("KERNEL_OK")
</pallas_src>

<mosaic_0001>
module attributes {stable_mosaic.version = 11 : i64} {
  func.func @relu_conv2d_kernel(%arg0: memref<48x896xbf16, #tpu.memory_space<vmem>>, %arg1: memref<5x64x240xbf16, #tpu.memory_space<vmem>>, %arg2: memref<64x768xf32, #tpu.memory_space<vmem>>, %arg3: memref<2x240x768xbf16, #tpu.memory_space<vmem>>) attributes {dimension_semantics = [], scalar_prefetch = 0 : i64, scratch_operands = 1 : i64, tpu.core_type = #tpu.core_type<tc>} {
    %c0 = arith.constant 0 : index
    %c0_0 = arith.constant 0 : index
    %0 = vector.load %arg0[%c0, %c0_0] : memref<48x896xbf16, #tpu.memory_space<vmem>>, vector<48x768xbf16>
    %cst = arith.constant 0.000000e+00 : bf16
    %1 = vector.broadcast %cst : bf16 to vector<48x768xbf16>
    %2 = arith.maximumf %0, %1 : vector<48x768xbf16>
    %c0_1 = arith.constant 0 : index
    %c0_2 = arith.constant 0 : index
    %c0_3 = arith.constant 0 : index
    %3 = vector.load %arg3[%c0_1, %c0_2, %c0_3] : memref<2x240x768xbf16, #tpu.memory_space<vmem>>, vector<1x48x768xbf16>
    %4 = vector.shape_cast %3 : vector<1x48x768xbf16> to vector<48x768xbf16>
    %5 = vector.shape_cast %2 : vector<48x768xbf16> to vector<1x48x768xbf16>
    tpu.vector_store %arg3[%c0_1, %c0_2, %c0_3], %5 {strides = array<i32>} : memref<2x240x768xbf16, #tpu.memory_space<vmem>>, vector<1x48x768xbf16>,
    %c0_4 = arith.constant 0 : index
    %c1 = arith.constant 1 : index
    %6 = vector.load %arg0[%c0_4, %c1] : memref<48x896xbf16, #tpu.memory_space<vmem>>, vector<48x768xbf16>
    %cst_5 = arith.constant 0.000000e+00 : bf16
    %7 = vector.broadcast %cst_5 : bf16 to vector<48x768xbf16>
    %8 = arith.maximumf %6, %7 : vector<48x768xbf16>
    %c0_6 = arith.constant 0 : index
    %c48 = arith.constant 48 : index
    %c0_7 = arith.constant 0 : index
    %9 = vector.load %arg3[%c0_6, %c48, %c0_7] : memref<2x240x768xbf16, #tpu.memory_space<vmem>>, vector<1x48x768xbf16>
    %10 = vector.shape_cast %9 : vector<1x48x768xbf16> to vector<48x768xbf16>
    %11 = vector.shape_cast %8 : vector<48x768xbf16> to vector<1x48x768xbf16>
    tpu.vector_store %arg3[%c0_6, %c48, %c0_7], %11 {strides = array<i32>} : memref<2x240x768xbf16, #tpu.memory_space<vmem>>, vector<1x48x768xbf16>,
    %c0_8 = arith.constant 0 : index
    %c2 = arith.constant 2 : index
    %12 = vector.load %arg0[%c0_8, %c2] : memref<48x896xbf16, #tpu.memory_space<vmem>>, vector<48x768xbf16>
    %cst_9 = arith.constant 0.000000e+00 : bf16
    %13 = vector.broadcast %cst_9 : bf16 to vector<48x768xbf16>
    %14 = arith.maximumf %12, %13 : vector<48x768xbf16>
    %c0_10 = arith.constant 0 : index
    %c96 = arith.constant 96 : index
    %c0_11 = arith.constant 0 : index
    %15 = vector.load %arg3[%c0_10, %c96, %c0_11] : memref<2x240x768xbf16, #tpu.memory_space<vmem>>, vector<1x48x768xbf16>
    %16 = vector.shape_cast %15 : vector<1x48x768xbf16> to vector<48x768xbf16>
    %17 = vector.shape_cast %14 : vector<48x768xbf16> to vector<1x48x768xbf16>
    tpu.vector_store %arg3[%c0_10, %c96, %c0_11], %17 {strides = array<i32>} : memref<2x240x768xbf16, #tpu.memory_space<vmem>>, vector<1x48x768xbf16>,
    %c0_12 = arith.constant 0 : index
    %c3 = arith.constant 3 : index
    %18 = vector.load %arg0[%c0_12, %c3] : memref<48x896xbf16, #tpu.memory_space<vmem>>, vector<48x768xbf16>
    %cst_13 = arith.constant 0.000000e+00 : bf16
    %19 = vector.broadcast %cst_13 : bf16 to vector<48x768xbf16>
    %20 = arith.maximumf %18, %19 : vector<48x768xbf16>
    %c0_14 = arith.constant 0 : index
    %c144 = arith.constant 144 : index
    %c0_15 = arith.constant 0 : index
    %21 = vector.load %arg3[%c0_14, %c144, %c0_15] : memref<2x240x768xbf16, #tpu.memory_space<vmem>>, vector<1x48x768xbf16>
    %22 = vector.shape_cast %21 : vector<1x48x768xbf16> to vector<48x768xbf16>
    %23 = vector.shape_cast %20 : vector<48x768xbf16> to vector<1x48x768xbf16>
    tpu.vector_store %arg3[%c0_14, %c144, %c0_15], %23 {strides = array<i32>} : memref<2x240x768xbf16, #tpu.memory_space<vmem>>, vector<1x48x768xbf16>,
    %c0_16 = arith.constant 0 : index
    %c4 = arith.constant 4 : index
    %24 = vector.load %arg0[%c0_16, %c4] : memref<48x896xbf16, #tpu.memory_space<vmem>>, vector<48x768xbf16>
    %cst_17 = arith.constant 0.000000e+00 : bf16
    %25 = vector.broadcast %cst_17 : bf16 to vector<48x768xbf16>
    %26 = arith.maximumf %24, %25 : vector<48x768xbf16>
    %c0_18 = arith.constant 0 : index
    %c192 = arith.constant 192 : index
    %c0_19 = arith.constant 0 : index
    %27 = vector.load %arg3[%c0_18, %c192, %c0_19] : memref<2x240x768xbf16, #tpu.memory_space<vmem>>, vector<1x48x768xbf16>
    %28 = vector.shape_cast %27 : vector<1x48x768xbf16> to vector<48x768xbf16>
    %29 = vector.shape_cast %26 : vector<48x768xbf16> to vector<1x48x768xbf16>
    tpu.vector_store %arg3[%c0_18, %c192, %c0_19], %29 {strides = array<i32>} : memref<2x240x768xbf16, #tpu.memory_space<vmem>>, vector<1x48x768xbf16>,
    %c0_20 = arith.constant 0 : index
    %c0_21 = arith.constant 0 : index
    %c0_22 = arith.constant 0 : index
    %30 = vector.load %arg1[%c0_20, %c0_21, %c0_22] : memref<5x64x240xbf16, #tpu.memory_space<vmem>>, vector<1x64x240xbf16>
    %31 = vector.shape_cast %30 : vector<1x64x240xbf16> to vector<64x240xbf16>
    %c0_23 = arith.constant 0 : index
    %c0_24 = arith.constant 0 : index
    %c0_25 = arith.constant 0 : index
    %32 = vector.load %arg3[%c0_23, %c0_24, %c0_25] : memref<2x240x768xbf16, #tpu.memory_space<vmem>>, vector<1x240x768xbf16>
    %33 = vector.shape_cast %32 : vector<1x240x768xbf16> to vector<240x768xbf16>
    %cst_26 = arith.constant dense<0.000000e+00> : vector<64x768xf32>
    %34 = tpu.matmul %31, %33, %cst_26 {dimension_numbers = #tpu.dot_dimension_numbers<[1], [0], [0], [1], [0, 0, 1, 1], [], []>} : vector<64x240xbf16>, vector<240x768xbf16>, vector<64x768xf32> -> vector<64x768xf32>
    %c0_27 = arith.constant 0 : index
    %c0_28 = arith.constant 0 : index
    %35 = vector.load %arg2[%c0_27, %c0_28] : memref<64x768xf32, #tpu.memory_space<vmem>>, vector<64x768xf32>
    tpu.vector_store %arg2[%c0_27, %c0_28], %34 {strides = array<i32>} : memref<64x768xf32, #tpu.memory_space<vmem>>, vector<64x768xf32>,
    %c0_29 = arith.constant 0 : index
    %c29 = arith.constant 29 : index
    %36 = vector.load %arg0[%c0_29, %c29] : memref<48x896xbf16, #tpu.memory_space<vmem>>, vector<48x768xbf16>
    %cst_30 = arith.constant 0.000000e+00 : bf16
    %37 = vector.broadcast %cst_30 : bf16 to vector<48x768xbf16>
    %38 = arith.maximumf %36, %37 : vector<48x768xbf16>
    %c1_31 = arith.constant 1 : index
    %c0_32 = arith.constant 0 : index
    %c0_33 = arith.constant 0 : index
    %39 = vector.load %arg3[%c1_31, %c0_32, %c0_33] : memref<2x240x768xbf16, #tpu.memory_space<vmem>>, vector<1x48x768xbf16>
    %40 = vector.shape_cast %39 : vector<1x48x768xbf16> to vector<48x768xbf16>
    %41 = vector.shape_cast %38 : vector<48x768xbf16> to vector<1x48x768xbf16>
    tpu.vector_store %arg3[%c1_31, %c0_32, %c0_33], %41 {strides = array<i32>} : memref<2x240x768xbf16, #tpu.memory_space<vmem>>, vector<1x48x768xbf16>,
    %c0_34 = arith.constant 0 : index
    %c30 = arith.constant 30 : index
    %42 = vector.load %arg0[%c0_34, %c30] : memref<48x896xbf16, #tpu.memory_space<vmem>>, vector<48x768xbf16>
    %cst_35 = arith.constant 0.000000e+00 : bf16
    %43 = vector.broadcast %cst_35 : bf16 to vector<48x768xbf16>
    %44 = arith.maximumf %42, %43 : vector<48x768xbf16>
    %c1_36 = arith.constant 1 : index
    %c48_37 = arith.constant 48 : index
    %c0_38 = arith.constant 0 : index
    %45 = vector.load %arg3[%c1_36, %c48_37, %c0_38] : memref<2x240x768xbf16, #tpu.memory_space<vmem>>, vector<1x48x768xbf16>
    %46 = vector.shape_cast %45 : vector<1x48x768xbf16> to vector<48x768xbf16>
    %47 = vector.shape_cast %44 : vector<48x768xbf16> to vector<1x48x768xbf16>
    tpu.vector_store %arg3[%c1_36, %c48_37, %c0_38], %47 {strides = array<i32>} : memref<2x240x768xbf16, #tpu.memory_space<vmem>>, vector<1x48x768xbf16>,
    %c0_39 = arith.constant 0 : index
    %c31 = arith.constant 31 : index
    %48 = vector.load %arg0[%c0_39, %c31] : memref<48x896xbf16, #tpu.memory_space<vmem>>, vector<48x768xbf16>
    %cst_40 = arith.constant 0.000000e+00 : bf16
    %49 = vector.broadcast %cst_40 : bf16 to vector<48x768xbf16>
    %50 = arith.maximumf %48, %49 : vector<48x768xbf16>
    %c1_41 = arith.constant 1 : index
    %c96_42 = arith.constant 96 : index
    %c0_43 = arith.constant 0 : index
    %51 = vector.load %arg3[%c1_41, %c96_42, %c0_43] : memref<2x240x768xbf16, #tpu.memory_space<vmem>>, vector<1x48x768xbf16>
    %52 = vector.shape_cast %51 : vector<1x48x768xbf16> to vector<48x768xbf16>
    %53 = vector.shape_cast %50 : vector<48x768xbf16> to vector<1x48x768xbf16>
    tpu.vector_store %arg3[%c1_41, %c96_42, %c0_43], %53 {strides = array<i32>} : memref<2x240x768xbf16, #tpu.memory_space<vmem>>, vector<1x48x768xbf16>,
    %c0_44 = arith.constant 0 : index
    %c32 = arith.constant 32 : index
    %54 = vector.load %arg0[%c0_44, %c32] : memref<48x896xbf16, #tpu.memory_space<vmem>>, vector<48x768xbf16>
    %cst_45 = arith.constant 0.000000e+00 : bf16
    %55 = vector.broadcast %cst_45 : bf16 to vector<48x768xbf16>
    %56 = arith.maximumf %54, %55 : vector<48x768xbf16>
    %c1_46 = arith.constant 1 : index
    %c144_47 = arith.constant 144 : index
    %c0_48 = arith.constant 0 : index
    %57 = vector.load %arg3[%c1_46, %c144_47, %c0_48] : memref<2x240x768xbf16, #tpu.memory_space<vmem>>, vector<1x48x768xbf16>
    %58 = vector.shape_cast %57 : vector<1x48x768xbf16> to vector<48x768xbf16>
    %59 = vector.shape_cast %56 : vector<48x768xbf16> to vector<1x48x768xbf16>
    tpu.vector_store %arg3[%c1_46, %c144_47, %c0_48], %59 {strides = array<i32>} : memref<2x240x768xbf16, #tpu.memory_space<vmem>>, vector<1x48x768xbf16>,
    %c0_49 = arith.constant 0 : index
    %c33 = arith.constant 33 : index
    %60 = vector.load %arg0[%c0_49, %c33] : memref<48x896xbf16, #tpu.memory_space<vmem>>, vector<48x768xbf16>
    %cst_50 = arith.constant 0.000000e+00 : bf16
    %61 = vector.broadcast %cst_50 : bf16 to vector<48x768xbf16>
    %62 = arith.maximumf %60, %61 : vector<48x768xbf16>
    %c1_51 = arith.constant 1 : index
    %c192_52 = arith.constant 192 : index
    %c0_53 = arith.constant 0 : index
    %63 = vector.load %arg3[%c1_51, %c192_52, %c0_53] : memref<2x240x768xbf16, #tpu.memory_space<vmem>>, vector<1x48x768xbf16>
    %64 = vector.shape_cast %63 : vector<1x48x768xbf16> to vector<48x768xbf16>
    %65 = vector.shape_cast %62 : vector<48x768xbf16> to vector<1x48x768xbf16>
    tpu.vector_store %arg3[%c1_51, %c192_52, %c0_53], %65 {strides = array<i32>} : memref<2x240x768xbf16, #tpu.memory_space<vmem>>, vector<1x48x768xbf16>,
    %c1_54 = arith.constant 1 : index
    %c0_55 = arith.constant 0 : index
    %c0_56 = arith.constant 0 : index
    %66 = vector.load %arg1[%c1_54, %c0_55, %c0_56] : memref<5x64x240xbf16, #tpu.memory_space<vmem>>, vector<1x64x240xbf16>
    %67 = vector.shape_cast %66 : vector<1x64x240xbf16> to vector<64x240xbf16>
    %c1_57 = arith.constant 1 : index
    %c0_58 = arith.constant 0 : index
    %c0_59 = arith.constant 0 : index
    %68 = vector.load %arg3[%c1_57, %c0_58, %c0_59] : memref<2x240x768xbf16, #tpu.memory_space<vmem>>, vector<1x240x768xbf16>
    %69 = vector.shape_cast %68 : vector<1x240x768xbf16> to vector<240x768xbf16>
    %cst_60 = arith.constant dense<0.000000e+00> : vector<64x768xf32>
    %70 = tpu.matmul %67, %69, %cst_60 {dimension_numbers = #tpu.dot_dimension_numbers<[1], [0], [0], [1], [0, 0, 1, 1], [], []>} : vector<64x240xbf16>, vector<240x768xbf16>, vector<64x768xf32> -> vector<64x768xf32>
    %c0_61 = arith.constant 0 : index
    %c0_62 = arith.constant 0 : index
    %71 = vector.load %arg2[%c0_61, %c0_62] : memref<64x768xf32, #tpu.memory_space<vmem>>, vector<64x768xf32>
    %72 = arith.addf %71, %70 : vector<64x768xf32>
    %c0_63 = arith.constant 0 : index
    %c0_64 = arith.constant 0 : index
    %73 = vector.load %arg2[%c0_63, %c0_64] : memref<64x768xf32, #tpu.memory_space<vmem>>, vector<64x768xf32>
    tpu.vector_store %arg2[%c0_63, %c0_64], %72 {strides = array<i32>} : memref<64x768xf32, #tpu.memory_space<vmem>>, vector<64x768xf32>,
    %c0_65 = arith.constant 0 : index
    %c58 = arith.constant 58 : index
    %74 = vector.load %arg0[%c0_65, %c58] : memref<48x896xbf16, #tpu.memory_space<vmem>>, vector<48x768xbf16>
    %cst_66 = arith.constant 0.000000e+00 : bf16
    %75 = vector.broadcast %cst_66 : bf16 to vector<48x768xbf16>
    %76 = arith.maximumf %74, %75 : vector<48x768xbf16>
    %c0_67 = arith.constant 0 : index
    %c0_68 = arith.constant 0 : index
    %c0_69 = arith.constant 0 : index
    %77 = vector.load %arg3[%c0_67, %c0_68, %c0_69] : memref<2x240x768xbf16, #tpu.memory_space<vmem>>, vector<1x48x768xbf16>
    %78 = vector.shape_cast %77 : vector<1x48x768xbf16> to vector<48x768xbf16>
    %79 = vector.shape_cast %76 : vector<48x768xbf16> to vector<1x48x768xbf16>
    tpu.vector_store %arg3[%c0_67, %c0_68, %c0_69], %79 {strides = array<i32>} : memref<2x240x768xbf16, #tpu.memory_space<vmem>>, vector<1x48x768xbf16>,
    %c0_70 = arith.constant 0 : index
    %c59 = arith.constant 59 : index
    %80 = vector.load %arg0[%c0_70, %c59] : memref<48x896xbf16, #tpu.memory_space<vmem>>, vector<48x768xbf16>
    %cst_71 = arith.constant 0.000000e+00 : bf16
    %81 = vector.broadcast %cst_71 : bf16 to vector<48x768xbf16>
    %82 = arith.maximumf %80, %81 : vector<48x768xbf16>
    %c0_72 = arith.constant 0 : index
    %c48_73 = arith.constant 48 : index
    %c0_74 = arith.constant 0 : index
    %83 = vector.load %arg3[%c0_72, %c48_73, %c0_74] : memref<2x240x768xbf16, #tpu.memory_space<vmem>>, vector<1x48x768xbf16>
    %84 = vector.shape_cast %83 : vector<1x48x768xbf16> to vector<48x768xbf16>
    %85 = vector.shape_cast %82 : vector<48x768xbf16> to vector<1x48x768xbf16>
    tpu.vector_store %arg3[%c0_72, %c48_73, %c0_74], %85 {strides = array<i32>} : memref<2x240x768xbf16, #tpu.memory_space<vmem>>, vector<1x48x768xbf16>,
    %c0_75 = arith.constant 0 : index
    %c60 = arith.constant 60 : index
    %86 = vector.load %arg0[%c0_75, %c60] : memref<48x896xbf16, #tpu.memory_space<vmem>>, vector<48x768xbf16>
    %cst_76 = arith.constant 0.000000e+00 : bf16
    %87 = vector.broadcast %cst_76 : bf16 to vector<48x768xbf16>
    %88 = arith.maximumf %86, %87 : vector<48x768xbf16>
    %c0_77 = arith.constant 0 : index
    %c96_78 = arith.constant 96 : index
    %c0_79 = arith.constant 0 : index
    %89 = vector.load %arg3[%c0_77, %c96_78, %c0_79] : memref<2x240x768xbf16, #tpu.memory_space<vmem>>, vector<1x48x768xbf16>
    %90 = vector.shape_cast %89 : vector<1x48x768xbf16> to vector<48x768xbf16>
    %91 = vector.shape_cast %88 : vector<48x768xbf16> to vector<1x48x768xbf16>
    tpu.vector_store %arg3[%c0_77, %c96_78, %c0_79], %91 {strides = array<i32>} : memref<2x240x768xbf16, #tpu.memory_space<vmem>>, vector<1x48x768xbf16>,
    %c0_80 = arith.constant 0 : index
    %c61 = arith.constant 61 : index
    %92 = vector.load %arg0[%c0_80, %c61] : memref<48x896xbf16, #tpu.memory_space<vmem>>, vector<48x768xbf16>
    %cst_81 = arith.constant 0.000000e+00 : bf16
    %93 = vector.broadcast %cst_81 : bf16 to vector<48x768xbf16>
    %94 = arith.maximumf %92, %93 : vector<48x768xbf16>
    %c0_82 = arith.constant 0 : index
    %c144_83 = arith.constant 144 : index
    %c0_84 = arith.constant 0 : index
    %95 = vector.load %arg3[%c0_82, %c144_83, %c0_84] : memref<2x240x768xbf16, #tpu.memory_space<vmem>>, vector<1x48x768xbf16>
    %96 = vector.shape_cast %95 : vector<1x48x768xbf16> to vector<48x768xbf16>
    %97 = vector.shape_cast %94 : vector<48x768xbf16> to vector<1x48x768xbf16>
    tpu.vector_store %arg3[%c0_82, %c144_83, %c0_84], %97 {strides = array<i32>} : memref<2x240x768xbf16, #tpu.memory_space<vmem>>, vector<1x48x768xbf16>,
    %c0_85 = arith.constant 0 : index
    %c62 = arith.constant 62 : index
    %98 = vector.load %arg0[%c0_85, %c62] : memref<48x896xbf16, #tpu.memory_space<vmem>>, vector<48x768xbf16>
    %cst_86 = arith.constant 0.000000e+00 : bf16
    %99 = vector.broadcast %cst_86 : bf16 to vector<48x768xbf16>
    %100 = arith.maximumf %98, %99 : vector<48x768xbf16>
    %c0_87 = arith.constant 0 : index
    %c192_88 = arith.constant 192 : index
    %c0_89 = arith.constant 0 : index
    %101 = vector.load %arg3[%c0_87, %c192_88, %c0_89] : memref<2x240x768xbf16, #tpu.memory_space<vmem>>, vector<1x48x768xbf16>
    %102 = vector.shape_cast %101 : vector<1x48x768xbf16> to vector<48x768xbf16>
    %103 = vector.shape_cast %100 : vector<48x768xbf16> to vector<1x48x768xbf16>
    tpu.vector_store %arg3[%c0_87, %c192_88, %c0_89], %103 {strides = array<i32>} : memref<2x240x768xbf16, #tpu.memory_space<vmem>>, vector<1x48x768xbf16>,
    %c2_90 = arith.constant 2 : index
    %c0_91 = arith.constant 0 : index
    %c0_92 = arith.constant 0 : index
    %104 = vector.load %arg1[%c2_90, %c0_91, %c0_92] : memref<5x64x240xbf16, #tpu.memory_space<vmem>>, vector<1x64x240xbf16>
    %105 = vector.shape_cast %104 : vector<1x64x240xbf16> to vector<64x240xbf16>
    %c0_93 = arith.constant 0 : index
    %c0_94 = arith.constant 0 : index
    %c0_95 = arith.constant 0 : index
    %106 = vector.load %arg3[%c0_93, %c0_94, %c0_95] : memref<2x240x768xbf16, #tpu.memory_space<vmem>>, vector<1x240x768xbf16>
    %107 = vector.shape_cast %106 : vector<1x240x768xbf16> to vector<240x768xbf16>
    %cst_96 = arith.constant dense<0.000000e+00> : vector<64x768xf32>
    %108 = tpu.matmul %105, %107, %cst_96 {dimension_numbers = #tpu.dot_dimension_numbers<[1], [0], [0], [1], [0, 0, 1, 1], [], []>} : vector<64x240xbf16>, vector<240x768xbf16>, vector<64x768xf32> -> vector<64x768xf32>
    %c0_97 = arith.constant 0 : index
    %c0_98 = arith.constant 0 : index
    %109 = vector.load %arg2[%c0_97, %c0_98] : memref<64x768xf32, #tpu.memory_space<vmem>>, vector<64x768xf32>
    %110 = arith.addf %109, %108 : vector<64x768xf32>
    %c0_99 = arith.constant 0 : index
    %c0_100 = arith.constant 0 : index
    %111 = vector.load %arg2[%c0_99, %c0_100] : memref<64x768xf32, #tpu.memory_space<vmem>>, vector<64x768xf32>
    tpu.vector_store %arg2[%c0_99, %c0_100], %110 {strides = array<i32>} : memref<64x768xf32, #tpu.memory_space<vmem>>, vector<64x768xf32>,
    %c0_101 = arith.constant 0 : index
    %c87 = arith.constant 87 : index
    %112 = vector.load %arg0[%c0_101, %c87] : memref<48x896xbf16, #tpu.memory_space<vmem>>, vector<48x768xbf16>
    %cst_102 = arith.constant 0.000000e+00 : bf16
    %113 = vector.broadcast %cst_102 : bf16 to vector<48x768xbf16>
    %114 = arith.maximumf %112, %113 : vector<48x768xbf16>
    %c1_103 = arith.constant 1 : index
    %c0_104 = arith.constant 0 : index
    %c0_105 = arith.constant 0 : index
    %115 = vector.load %arg3[%c1_103, %c0_104, %c0_105] : memref<2x240x768xbf16, #tpu.memory_space<vmem>>, vector<1x48x768xbf16>
    %116 = vector.shape_cast %115 : vector<1x48x768xbf16> to vector<48x768xbf16>
    %117 = vector.shape_cast %114 : vector<48x768xbf16> to vector<1x48x768xbf16>
    tpu.vector_store %arg3[%c1_103, %c0_104, %c0_105], %117 {strides = array<i32>} : memref<2x240x768xbf16, #tpu.memory_space<vmem>>, vector<1x48x768xbf16>,
    %c0_106 = arith.constant 0 : index
    %c88 = arith.constant 88 : index
    %118 = vector.load %arg0[%c0_106, %c88] : memref<48x896xbf16, #tpu.memory_space<vmem>>, vector<48x768xbf16>
    %cst_107 = arith.constant 0.000000e+00 : bf16
    %119 = vector.broadcast %cst_107 : bf16 to vector<48x768xbf16>
    %120 = arith.maximumf %118, %119 : vector<48x768xbf16>
    %c1_108 = arith.constant 1 : index
    %c48_109 = arith.constant 48 : index
    %c0_110 = arith.constant 0 : index
    %121 = vector.load %arg3[%c1_108, %c48_109, %c0_110] : memref<2x240x768xbf16, #tpu.memory_space<vmem>>, vector<1x48x768xbf16>
    %122 = vector.shape_cast %121 : vector<1x48x768xbf16> to vector<48x768xbf16>
    %123 = vector.shape_cast %120 : vector<48x768xbf16> to vector<1x48x768xbf16>
    tpu.vector_store %arg3[%c1_108, %c48_109, %c0_110], %123 {strides = array<i32>} : memref<2x240x768xbf16, #tpu.memory_space<vmem>>, vector<1x48x768xbf16>,
    %c0_111 = arith.constant 0 : index
    %c89 = arith.constant 89 : index
    %124 = vector.load %arg0[%c0_111, %c89] : memref<48x896xbf16, #tpu.memory_space<vmem>>, vector<48x768xbf16>
    %cst_112 = arith.constant 0.000000e+00 : bf16
    %125 = vector.broadcast %cst_112 : bf16 to vector<48x768xbf16>
    %126 = arith.maximumf %124, %125 : vector<48x768xbf16>
    %c1_113 = arith.constant 1 : index
    %c96_114 = arith.constant 96 : index
    %c0_115 = arith.constant 0 : index
    %127 = vector.load %arg3[%c1_113, %c96_114, %c0_115] : memref<2x240x768xbf16, #tpu.memory_space<vmem>>, vector<1x48x768xbf16>
    %128 = vector.shape_cast %127 : vector<1x48x768xbf16> to vector<48x768xbf16>
    %129 = vector.shape_cast %126 : vector<48x768xbf16> to vector<1x48x768xbf16>
    tpu.vector_store %arg3[%c1_113, %c96_114, %c0_115], %129 {strides = array<i32>} : memref<2x240x768xbf16, #tpu.memory_space<vmem>>, vector<1x48x768xbf16>,
    %c0_116 = arith.constant 0 : index
    %c90 = arith.constant 90 : index
    %130 = vector.load %arg0[%c0_116, %c90] : memref<48x896xbf16, #tpu.memory_space<vmem>>, vector<48x768xbf16>
    %cst_117 = arith.constant 0.000000e+00 : bf16
    %131 = vector.broadcast %cst_117 : bf16 to vector<48x768xbf16>
    %132 = arith.maximumf %130, %131 : vector<48x768xbf16>
    %c1_118 = arith.constant 1 : index
    %c144_119 = arith.constant 144 : index
    %c0_120 = arith.constant 0 : index
    %133 = vector.load %arg3[%c1_118, %c144_119, %c0_120] : memref<2x240x768xbf16, #tpu.memory_space<vmem>>, vector<1x48x768xbf16>
    %134 = vector.shape_cast %133 : vector<1x48x768xbf16> to vector<48x768xbf16>
    %135 = vector.shape_cast %132 : vector<48x768xbf16> to vector<1x48x768xbf16>
    tpu.vector_store %arg3[%c1_118, %c144_119, %c0_120], %135 {strides = array<i32>} : memref<2x240x768xbf16, #tpu.memory_space<vmem>>, vector<1x48x768xbf16>,
    %c0_121 = arith.constant 0 : index
    %c91 = arith.constant 91 : index
    %136 = vector.load %arg0[%c0_121, %c91] : memref<48x896xbf16, #tpu.memory_space<vmem>>, vector<48x768xbf16>
    %cst_122 = arith.constant 0.000000e+00 : bf16
    %137 = vector.broadcast %cst_122 : bf16 to vector<48x768xbf16>
    %138 = arith.maximumf %136, %137 : vector<48x768xbf16>
    %c1_123 = arith.constant 1 : index
    %c192_124 = arith.constant 192 : index
    %c0_125 = arith.constant 0 : index
    %139 = vector.load %arg3[%c1_123, %c192_124, %c0_125] : memref<2x240x768xbf16, #tpu.memory_space<vmem>>, vector<1x48x768xbf16>
    %140 = vector.shape_cast %139 : vector<1x48x768xbf16> to vector<48x768xbf16>
    %141 = vector.shape_cast %138 : vector<48x768xbf16> to vector<1x48x768xbf16>
    tpu.vector_store %arg3[%c1_123, %c192_124, %c0_125], %141 {strides = array<i32>} : memref<2x240x768xbf16, #tpu.memory_space<vmem>>, vector<1x48x768xbf16>,
    %c3_126 = arith.constant 3 : index
    %c0_127 = arith.constant 0 : index
    %c0_128 = arith.constant 0 : index
    %142 = vector.load %arg1[%c3_126, %c0_127, %c0_128] : memref<5x64x240xbf16, #tpu.memory_space<vmem>>, vector<1x64x240xbf16>
    %143 = vector.shape_cast %142 : vector<1x64x240xbf16> to vector<64x240xbf16>
    %c1_129 = arith.constant 1 : index
    %c0_130 = arith.constant 0 : index
    %c0_131 = arith.constant 0 : index
    %144 = vector.load %arg3[%c1_129, %c0_130, %c0_131] : memref<2x240x768xbf16, #tpu.memory_space<vmem>>, vector<1x240x768xbf16>
    %145 = vector.shape_cast %144 : vector<1x240x768xbf16> to vector<240x768xbf16>
    %cst_132 = arith.constant dense<0.000000e+00> : vector<64x768xf32>
    %146 = tpu.matmul %143, %145, %cst_132 {dimension_numbers = #tpu.dot_dimension_numbers<[1], [0], [0], [1], [0, 0, 1, 1], [], []>} : vector<64x240xbf16>, vector<240x768xbf16>, vector<64x768xf32> -> vector<64x768xf32>
    %c0_133 = arith.constant 0 : index
    %c0_134 = arith.constant 0 : index
    %147 = vector.load %arg2[%c0_133, %c0_134] : memref<64x768xf32, #tpu.memory_space<vmem>>, vector<64x768xf32>
    %148 = arith.addf %147, %146 : vector<64x768xf32>
    %c0_135 = arith.constant 0 : index
    %c0_136 = arith.constant 0 : index
    %149 = vector.load %arg2[%c0_135, %c0_136] : memref<64x768xf32, #tpu.memory_space<vmem>>, vector<64x768xf32>
    tpu.vector_store %arg2[%c0_135, %c0_136], %148 {strides = array<i32>} : memref<64x768xf32, #tpu.memory_space<vmem>>, vector<64x768xf32>,
    %c0_137 = arith.constant 0 : index
    %c116 = arith.constant 116 : index
    %150 = vector.load %arg0[%c0_137, %c116] : memref<48x896xbf16, #tpu.memory_space<vmem>>, vector<48x768xbf16>
    %cst_138 = arith.constant 0.000000e+00 : bf16
    %151 = vector.broadcast %cst_138 : bf16 to vector<48x768xbf16>
    %152 = arith.maximumf %150, %151 : vector<48x768xbf16>
    %c0_139 = arith.constant 0 : index
    %c0_140 = arith.constant 0 : index
    %c0_141 = arith.constant 0 : index
    %153 = vector.load %arg3[%c0_139, %c0_140, %c0_141] : memref<2x240x768xbf16, #tpu.memory_space<vmem>>, vector<1x48x768xbf16>
    %154 = vector.shape_cast %153 : vector<1x48x768xbf16> to vector<48x768xbf16>
    %155 = vector.shape_cast %152 : vector<48x768xbf16> to vector<1x48x768xbf16>
    tpu.vector_store %arg3[%c0_139, %c0_140, %c0_141], %155 {strides = array<i32>} : memref<2x240x768xbf16, #tpu.memory_space<vmem>>, vector<1x48x768xbf16>,
    %c0_142 = arith.constant 0 : index
    %c117 = arith.constant 117 : index
    %156 = vector.load %arg0[%c0_142, %c117] : memref<48x896xbf16, #tpu.memory_space<vmem>>, vector<48x768xbf16>
    %cst_143 = arith.constant 0.000000e+00 : bf16
    %157 = vector.broadcast %cst_143 : bf16 to vector<48x768xbf16>
    %158 = arith.maximumf %156, %157 : vector<48x768xbf16>
    %c0_144 = arith.constant 0 : index
    %c48_145 = arith.constant 48 : index
    %c0_146 = arith.constant 0 : index
    %159 = vector.load %arg3[%c0_144, %c48_145, %c0_146] : memref<2x240x768xbf16, #tpu.memory_space<vmem>>, vector<1x48x768xbf16>
    %160 = vector.shape_cast %159 : vector<1x48x768xbf16> to vector<48x768xbf16>
    %161 = vector.shape_cast %158 : vector<48x768xbf16> to vector<1x48x768xbf16>
    tpu.vector_store %arg3[%c0_144, %c48_145, %c0_146], %161 {strides = array<i32>} : memref<2x240x768xbf16, #tpu.memory_space<vmem>>, vector<1x48x768xbf16>,
    %c0_147 = arith.constant 0 : index
    %c118 = arith.constant 118 : index
    %162 = vector.load %arg0[%c0_147, %c118] : memref<48x896xbf16, #tpu.memory_space<vmem>>, vector<48x768xbf16>
    %cst_148 = arith.constant 0.000000e+00 : bf16
    %163 = vector.broadcast %cst_148 : bf16 to vector<48x768xbf16>
    %164 = arith.maximumf %162, %163 : vector<48x768xbf16>
    %c0_149 = arith.constant 0 : index
    %c96_150 = arith.constant 96 : index
    %c0_151 = arith.constant 0 : index
    %165 = vector.load %arg3[%c0_149, %c96_150, %c0_151] : memref<2x240x768xbf16, #tpu.memory_space<vmem>>, vector<1x48x768xbf16>
    %166 = vector.shape_cast %165 : vector<1x48x768xbf16> to vector<48x768xbf16>
    %167 = vector.shape_cast %164 : vector<48x768xbf16> to vector<1x48x768xbf16>
    tpu.vector_store %arg3[%c0_149, %c96_150, %c0_151], %167 {strides = array<i32>} : memref<2x240x768xbf16, #tpu.memory_space<vmem>>, vector<1x48x768xbf16>,
    %c0_152 = arith.constant 0 : index
    %c119 = arith.constant 119 : index
    %168 = vector.load %arg0[%c0_152, %c119] : memref<48x896xbf16, #tpu.memory_space<vmem>>, vector<48x768xbf16>
    %cst_153 = arith.constant 0.000000e+00 : bf16
    %169 = vector.broadcast %cst_153 : bf16 to vector<48x768xbf16>
    %170 = arith.maximumf %168, %169 : vector<48x768xbf16>
    %c0_154 = arith.constant 0 : index
    %c144_155 = arith.constant 144 : index
    %c0_156 = arith.constant 0 : index
    %171 = vector.load %arg3[%c0_154, %c144_155, %c0_156] : memref<2x240x768xbf16, #tpu.memory_space<vmem>>, vector<1x48x768xbf16>
    %172 = vector.shape_cast %171 : vector<1x48x768xbf16> to vector<48x768xbf16>
    %173 = vector.shape_cast %170 : vector<48x768xbf16> to vector<1x48x768xbf16>
    tpu.vector_store %arg3[%c0_154, %c144_155, %c0_156], %173 {strides = array<i32>} : memref<2x240x768xbf16, #tpu.memory_space<vmem>>, vector<1x48x768xbf16>,
    %c0_157 = arith.constant 0 : index
    %c120 = arith.constant 120 : index
    %174 = vector.load %arg0[%c0_157, %c120] : memref<48x896xbf16, #tpu.memory_space<vmem>>, vector<48x768xbf16>
    %cst_158 = arith.constant 0.000000e+00 : bf16
    %175 = vector.broadcast %cst_158 : bf16 to vector<48x768xbf16>
    %176 = arith.maximumf %174, %175 : vector<48x768xbf16>
    %c0_159 = arith.constant 0 : index
    %c192_160 = arith.constant 192 : index
    %c0_161 = arith.constant 0 : index
    %177 = vector.load %arg3[%c0_159, %c192_160, %c0_161] : memref<2x240x768xbf16, #tpu.memory_space<vmem>>, vector<1x48x768xbf16>
    %178 = vector.shape_cast %177 : vector<1x48x768xbf16> to vector<48x768xbf16>
    %179 = vector.shape_cast %176 : vector<48x768xbf16> to vector<1x48x768xbf16>
    tpu.vector_store %arg3[%c0_159, %c192_160, %c0_161], %179 {strides = array<i32>} : memref<2x240x768xbf16, #tpu.memory_space<vmem>>, vector<1x48x768xbf16>,
    %c4_162 = arith.constant 4 : index
    %c0_163 = arith.constant 0 : index
    %c0_164 = arith.constant 0 : index
    %180 = vector.load %arg1[%c4_162, %c0_163, %c0_164] : memref<5x64x240xbf16, #tpu.memory_space<vmem>>, vector<1x64x240xbf16>
    %181 = vector.shape_cast %180 : vector<1x64x240xbf16> to vector<64x240xbf16>
    %c0_165 = arith.constant 0 : index
    %c0_166 = arith.constant 0 : index
    %c0_167 = arith.constant 0 : index
    %182 = vector.load %arg3[%c0_165, %c0_166, %c0_167] : memref<2x240x768xbf16, #tpu.memory_space<vmem>>, vector<1x240x768xbf16>
    %183 = vector.shape_cast %182 : vector<1x240x768xbf16> to vector<240x768xbf16>
    %cst_168 = arith.constant dense<0.000000e+00> : vector<64x768xf32>
    %184 = tpu.matmul %181, %183, %cst_168 {dimension_numbers = #tpu.dot_dimension_numbers<[1], [0], [0], [1], [0, 0, 1, 1], [], []>} : vector<64x240xbf16>, vector<240x768xbf16>, vector<64x768xf32> -> vector<64x768xf32>
    %c0_169 = arith.constant 0 : index
    %c0_170 = arith.constant 0 : index
    %185 = vector.load %arg2[%c0_169, %c0_170] : memref<64x768xf32, #tpu.memory_space<vmem>>, vector<64x768xf32>
    %186 = arith.addf %185, %184 : vector<64x768xf32>
    %c0_171 = arith.constant 0 : index
    %c0_172 = arith.constant 0 : index
    %187 = vector.load %arg2[%c0_171, %c0_172] : memref<64x768xf32, #tpu.memory_space<vmem>>, vector<64x768xf32>
    tpu.vector_store %arg2[%c0_171, %c0_172], %186 {strides = array<i32>} : memref<64x768xf32, #tpu.memory_space<vmem>>, vector<64x768xf32>,
    return
  }
}

</mosaic_0001>

<bundles_post_ra>
// kernel: relu_conv2d.1
= control target key start
LH: loop header
LB: loop body
LE: loop exit
PB: predicated region body
PF: predicated region fallthrough
CT: control target
= control target key end

     0   :  { %v13302_v3 = vmov 0   ;;  %s9240_s25 = smov 127   ;;  %s9241_s3 = smov 126   ;;  %vm333_vm0 = vcmask 1039360   ;;  %vm1218_vm1 = vcmask 916480   ;;  %vm565_vm2 = vcmask 1031168   ;;  %s13292_s0 = inlined_call_operand.vmem [shape: bf16[48,896], index: 0, kind: input, shape index: {}]   ;;  %s13293_s1 = inlined_call_operand.vmem [shape: bf16[5,64,240], index: 1, kind: input, shape index: {}]   ;;  %s13294_s2 = inlined_call_operand.vmem [shape: f32[64,768], index: 2, kind: output, shape index: {}]  }
   0x1   :  { %v157_v0 = vld [vmem:[%s13292_s0 + $0x8] sm:$0xff]  ;;  %v156_v2 = vld [vmem:[%s13292_s0] sm:$0xff]  ;;  %v158_v9 = vld [vmem:[%s13292_s0 + $0x10] sm:$0xff]  ;;  %s9242_s15 = smov 125   ;;  %s9243_s29 = smov 124   ;;  %vm797_vm3 = vcmask 1022976  }
   0x2   :  { %v161_v1 = vld [vmem:[%s13292_s0 + $0x24] sm:$0xff]  ;;  %v181_v4 = vmax.bf16 %v13302_v3, %v157_v0  ;;  %v160_v6 = vld [vmem:[%s13292_s0 + $0x1c] sm:$0xff]  ;;  %v180_v7 = vmax.bf16 %v13302_v3, %v156_v2  ;;  %v162_v10 = vld [vmem:[%s13292_s0 + $0x2c] sm:$0xff]  ;;  %v182_v17 = vmax.bf16 %v13302_v3, %v158_v9  ;;  %s9245_s12 = smov 98   ;;  %vm1029_vm4 = vcmask 1014784   ;;  %s9246_s22 = smov 97  }
   0x3   :  { %v185_v5 = vmax.bf16 %v13302_v3, %v161_v1  ;;  %v184_v8 = vmax.bf16 %v13302_v3, %v160_v6  ;;  %v164_v12 = vld [vmem:[%s13292_s0 + $0x38] sm:$0xff]  ;;  %v186_v18 = vmax.bf16 %v13302_v3, %v162_v10  ;;  %v172_v21 = vld [vmem:[%s13292_s0 + $0x70] sm:$0xff]  ;;  %v165_v33 = vld [vmem:[%s13292_s0 + $0x40] sm:$0xff]  ;;  %vm1675_vm5 = vcmask 809984   ;;  %s9248_s14 = smov 95   ;;  %s9249_s23 = smov 70  }
   0x4   :  { %v168_v13 = vld [vmem:[%s13292_s0 + $0x54] sm:$0xff]  ;;  %v188_v19 = vmax.bf16 %v13302_v3, %v164_v12  ;;  %v176_v22 = vld [vmem:[%s13292_s0 + $0x8c] sm:$0xff]  ;;  %v196_v27 = vmax.bf16 %v13302_v3, %v172_v21  ;;  %v169_v34 = vld [vmem:[%s13292_s0 + $0x5c] sm:$0xff]  ;;  %v189_v35 = vmax.bf16 %v13302_v3, %v165_v33  ;;  %vm1908_vm6 = vcmask 801792   ;;  %s9250_s30 = smov 69   ;;  %s9251_s4 = smov 68  }
   0x5   :  { %v9301_v11 = vcombine.low %v181_v4, %v185_v5  ;;  %v9309_v14 = vcombine.low %v180_v7, %v184_v8  ;;  %v9313_v15 = vcombine.high %v181_v4, %v185_v5  ;;  %v9315_v16 = vcombine.high %v180_v7, %v184_v8  ;;  %v159_v23 = vld [vmem:[%s13292_s0 + $0x18] sm:$0xf]  ;;  %v163_v24 = vld [vmem:[%s13292_s0 + $0x34] sm:$0xf]  ;;  %v166_v39 = vld [vmem:[%s13292_s0 + $0x48] sm:$0xff]  ;;  %s9252_s5 = smov 67  }
   0x6   :  { %v192_v20 = vmax.bf16 %v13302_v3, %v168_v13  ;;  %v9339_v25 = vcombine.high %v182_v17, %v186_v18  ;;  %v200_v28 = vmax.bf16 %v13302_v3, %v176_v22  ;;  %v9347_v29 = vcombine.low %v182_v17, %v186_v18  ;;  %v170_v40 = vld [vmem:[%s13292_s0 + $0x64] sm:$0xff]  ;;  %v167_v45 = vld [vmem:[%s13292_s0 + $0x50] sm:$0xf]  ;;  %v171_v46 = vld [vmem:[%s13292_s0 + $0x6c] sm:$0xf]  ;;  %s9253_s16 = smov 66  }
   0x7   :  { %295 = vrot.lane.b32.xlu1 %v9301_v11, %s9240_s25  ;;  %291 = vrot.lane.b32.xlu0 %v9309_v14, %s9240_s25  ;;  %v183_v31 = vmax.bf16 %v13302_v3, %v159_v23  ;;  %v187_v32 = vmax.bf16 %v13302_v3, %v163_v24  ;;  %v193_v36 = vmax.bf16 %v13302_v3, %v169_v34  ;;  %v173_v53 = vld [vmem:[%s13292_s0 + $0x78] sm:$0xff]  ;;  %v174_v57 = vld [vmem:[%s13292_s0 + $0x80] sm:$0xff]  ;;  %vm2140_vm7 = vcmask 793600   ;;  %s9254_s26 = smov 41   ;;  %s9255_s10 = smov 40  }
   0x8   :  { %1231 = vmatprep.subr.bf16.mxu1 %v9315_v16  ;;  %v9341_v26 = vcombine.high %v188_v19, %v192_v20  ;;  %v9349_v30 = vcombine.low %v188_v19, %v192_v20  ;;  %v9365_v37 = vcombine.high %v196_v27, %v200_v28  ;;  %v9375_v41 = vcombine.low %v196_v27, %v200_v28  ;;  %v177_v54 = vld [vmem:[%s13292_s0 + $0x94] sm:$0xff]  ;;  %v178_v58 = vld [vmem:[%s13292_s0 + $0x9c] sm:$0xff]  ;;  %v175_v63 = vld [vmem:[%s13292_s0 + $0x88] sm:$0xf]  ;;  %s9256_s24 = smov 39  }
   0x9   :  { %1232 = vmatpush1.bf16.msra.mxu1 %v9309_v14  ;;  %v8207_v38 = vcombine.low %v183_v31, %v187_v32  ;;  %v9381_v42 = vcombine.low %v189_v35, %v193_v36  ;;  %v190_v43 = vmax.bf16 %v13302_v3, %v166_v39  ;;  %v194_v44 = vmax.bf16 %v13302_v3, %v170_v40  ;;  %v179_v0 = vld [vmem:[%s13292_s0 + $0xa4] sm:$0xf]  ;;  %v391_v7 = vld [vmem:[%s13292_s0 + $0x18] sm:$0xf]  ;;  %v395_v8 = vld [vmem:[%s13292_s0 + $0x34] sm:$0xf] }
   0xa   :  { %1233 = vmatprep.subr.bf16.mxu1 %v9341_v26  ;;  %v191_v48 = vmax.bf16 %v13302_v3, %v167_v45  ;;  %v195_v49 = vmax.bf16 %v13302_v3, %v171_v46  ;;  %v9400_v50 = vcombine.high %v189_v35, %v193_v36  ;;  %v197_v55 = vmax.bf16 %v13302_v3, %v173_v53  ;;  %v399_v13 = vld [vmem:[%s13292_s0 + $0x50] sm:$0xf]  ;;  %v403_v17 = vld [vmem:[%s13292_s0 + $0x6c] sm:$0xf]  ;;  %v407_v21 = vld [vmem:[%s13292_s0 + $0x88] sm:$0xf] }
   0xb   :  { %297 = vrot.lane.b32.xlu1 %v9313_v15, %s9240_s25  ;;  %293 = vrot.lane.b32.xlu0 %v9315_v16, %s9240_s25  ;;  %v9394_v47 = vcombine.low %v190_v43, %v194_v44  ;;  %v9406_v52 = vcombine.high %v190_v43, %v194_v44  ;;  %v201_v56 = vmax.bf16 %v13302_v3, %v177_v54  ;;  %v411_v22 = vld [vmem:[%s13292_s0 + $0xa4] sm:$0xf]  ;;  %v623_v28 = vld [vmem:[%s13292_s0 + $0x18] sm:$0xf]  ;;  %vm2372_vm8 = vcmask 785408  }
   0xc   :  { %v8214_v51 = vcombine.low %v191_v48, %v195_v49  ;;  %v198_v60 = vmax.bf16 %v13302_v3, %v174_v57  ;;  %v202_v61 = vmax.bf16 %v13302_v3, %v178_v58  ;;  %v199_v4 = vmax.bf16 %v13302_v3, %v175_v63  ;;  %v627_v31 = vld [vmem:[%s13292_s0 + $0x34] sm:$0xf]  ;;  %v631_v35 = vld [vmem:[%s13292_s0 + $0x50] sm:$0xf]  ;;  %v635_v36 = vld [vmem:[%s13292_s0 + $0x6c] sm:$0xf] }
   0xd   :  { %1234 = vmatpush1.bf16.msra.mxu1 %v9349_v30  ;;  %v9427_v59 = vcombine.high %v197_v55, %v201_v56  ;;  %v9433_v62 = vcombine.low %v197_v55, %v201_v56  ;;  %v203_v5 = vmax.bf16 %v13302_v3, %v179_v0  ;;  %v415_v9 = vmax.bf16 %v13302_v3, %v391_v7  ;;  %v639_v44 = vld [vmem:[%s13292_s0 + $0x88] sm:$0xf]  ;;  %v643_v45 = vld [vmem:[%s13292_s0 + $0xa4] sm:$0xf] }
   0xe   :  { %1235 = vmatprep.subr.bf16.mxu1 %v9365_v37  ;;  %v9443_v1 = vcombine.high %v198_v60, %v202_v61  ;;  %v9447_v2 = vcombine.low %v198_v60, %v202_v61  ;;  %v419_v10 = vmax.bf16 %v13302_v3, %v395_v8  ;;  %v423_v18 = vmax.bf16 %v13302_v3, %v399_v13  ;;  %v855_v60 = vld [vmem:[%s13292_s0 + $0x18] sm:$0xf]  ;;  %v859_v61 = vld [vmem:[%s13292_s0 + $0x34] sm:$0xf] }
   0xf   :  { %301 = vrot.lane.b32.xlu1 %v9339_v25, %s9240_s25  ;;  %299 = vrot.lane.b32.xlu0 %v9347_v29, %s9240_s25  ;;  %v8221_v6 = vcombine.low %v199_v4, %v203_v5  ;;  %v427_v19 = vmax.bf16 %v13302_v3, %v403_v17  ;;  %v431_v23 = vmax.bf16 %v13302_v3, %v407_v21  ;;  %v867_v21 = vld [vmem:[%s13292_s0 + $0x6c] sm:$0xf]  ;;  %vm2604_vm9 = vcmask 777216  }
  0x10   :  { %v8228_v12 = vcombine.low %v415_v9, %v419_v10  ;;  %v435_v24 = vmax.bf16 %v13302_v3, %v411_v22  ;;  %v647_v32 = vmax.bf16 %v13302_v3, %v623_v28  ;;  %v651_v33 = vmax.bf16 %v13302_v3, %v627_v31  ;;  %v9652_v31 = vld [vmem:[%s13293_s1 + $0x4] ss:$8 sps:$4 sm:$0xff]  }
  0x11   :  { %1236 = vmatpush1.bf16.msra.mxu1 %v9375_v41  ;;  %v8235_v20 = vcombine.low %v423_v18, %v427_v19  ;;  %v659_v39 = vmax.bf16 %v13302_v3, %v635_v36  ;;  %v663_v48 = vmax.bf16 %v13302_v3, %v639_v44  ;;  %v667_v49 = vmax.bf16 %v13302_v3, %v643_v45 }
  0x12   :  { %v8242_v27 = vcombine.low %v431_v23, %v435_v24  ;;  %v8249_v34 = vcombine.low %v647_v32, %v651_v33  ;;  %v879_v4 = vmax.bf16 %v13302_v3, %v855_v60  ;;  %v883_v5 = vmax.bf16 %v13302_v3, %v859_v61  ;;  %8293 = vmatprep.mubr.msk.bf16.mxu1 %vm1218_vm1, %v9652_v31 }
  0x13   :  { %305 = vrot.lane.b32.xlu1 %v9349_v30, %s9240_s25  ;;  %303 = vrot.lane.b32.xlu0 %v8207_v38, %s9240_s25  ;;  %v655_v38 = vmax.bf16 %v13302_v3, %v631_v35  ;;  %v8263_v56 = vcombine.low %v663_v48, %v667_v49  ;;  %v891_v24 = vmax.bf16 %v13302_v3, %v867_v21  ;;  %vm3346_vm10 = vcmask 572416  }
  0x14   :  { %v8270_v10 = vcombine.low %v879_v4, %v883_v5  ;;  %v1501_v5 = vld [vmem:[%s13292_s0 + $0x18] sm:$0xf]  ;;  %vm3578_vm11 = vcmask 564224   ;;  %vm3810_vm12 = vcmask 556032   ;;  %vm4042_vm13 = vcmask 547840  }
  0x15   :  { %v8256_v40 = vcombine.low %v655_v38, %v659_v39  ;;  %v871_v38 = vld [vmem:[%s13292_s0 + $0x88] sm:$0xf]  ;;  %v875_v39 = vld [vmem:[%s13292_s0 + $0xa4] sm:$0xf]  ;;  %vm4274_vm14 = vcmask 539648   ;;  %vm5016_vm15 = vcmask 334848  }
  0x16   :  { %v895_v45 = vmax.bf16 %v13302_v3, %v871_v38 }
  0x17   :  { %309 = vrot.lane.b32.xlu1 %v9381_v42, %s9240_s25  ;;  %307 = vrot.lane.b32.xlu0 %v9341_v26, %s9240_s25 }
  0x1b   :  { %313 = vrot.lane.b32.xlu1 %v9394_v47, %s9240_s25  ;;  %311 = vrot.lane.b32.xlu0 %v9400_v50, %s9240_s25 }
  0x1f   :  { %317 = vrot.lane.b32.xlu1 %v8214_v51, %s9240_s25  ;;  %315 = vrot.lane.b32.xlu0 %v9406_v52, %s9240_s25 }
  0x23   :  { %321 = vrot.lane.b32.xlu1 %v9365_v37, %s9240_s25  ;;  %319 = vrot.lane.b32.xlu0 %v9375_v41, %s9240_s25 }
  0x27   :  { %325 = vrot.lane.b32.xlu1 %v9427_v59, %s9240_s25  ;;  %323 = vrot.lane.b32.xlu0 %v9433_v62, %s9240_s25 }
  0x2b   :  { %329 = vrot.lane.b32.xlu1 %v9443_v1, %s9240_s25  ;;  %327 = vrot.lane.b32.xlu0 %v9447_v2, %s9240_s25 }
  0x2f   :  { %523 = vrot.lane.b32.xlu1 %v9309_v14, %s9241_s3  ;;  %331 = vrot.lane.b32.xlu0 %v8221_v6, %s9240_s25  ;;  %s9259_s25 = smov 12  }
  0x33   :  { %527 = vrot.lane.b32.xlu1 %v9301_v11, %s9241_s3  ;;  %525 = vrot.lane.b32.xlu0 %v9315_v16, %s9241_s3 }
  0x37   :  { %531 = vrot.lane.b32.xlu1 %v9347_v29, %s9241_s3  ;;  %529 = vrot.lane.b32.xlu0 %v9313_v15, %s9241_s3 }
  0x3b   :  { %535 = vrot.lane.b32.xlu1 %v8228_v12, %s9241_s3  ;;  %533 = vrot.lane.b32.xlu0 %v9339_v25, %s9241_s3 }
  0x3f   :  { %539 = vrot.lane.b32.xlu1 %v9341_v26, %s9241_s3  ;;  %537 = vrot.lane.b32.xlu0 %v9349_v30, %s9241_s3 }
  0x43   :  { %543 = vrot.lane.b32.xlu1 %v9400_v50, %s9241_s3  ;;  %541 = vrot.lane.b32.xlu0 %v9381_v42, %s9241_s3 }
  0x47   :  { %547 = vrot.lane.b32.xlu1 %v9406_v52, %s9241_s3  ;;  %545 = vrot.lane.b32.xlu0 %v9394_v47, %s9241_s3 }
  0x4b   :  { %551 = vrot.lane.b32.xlu1 %v9375_v41, %s9241_s3  ;;  %549 = vrot.lane.b32.xlu0 %v8235_v20, %s9241_s3  ;;  %v863_v20 = vld [vmem:[%s13292_s0 + $0x50] sm:$0xf] }
  0x4c   :  { %v887_v23 = vmax.bf16 %v13302_v3, %v863_v20 }
  0x4f   :  { %555 = vrot.lane.b32.xlu1 %v9433_v62, %s9241_s3  ;;  %553 = vrot.lane.b32.xlu0 %v9365_v37, %s9241_s3 }
  0x53   :  { %559 = vrot.lane.b32.xlu1 %v9447_v2, %s9241_s3  ;;  %557 = vrot.lane.b32.xlu0 %v9427_v59, %s9241_s3 }
  0x57   :  { %563 = vrot.lane.b32.xlu1 %v8242_v27, %s9241_s3  ;;  %561 = vrot.lane.b32.xlu0 %v9443_v1, %s9241_s3  ;;  %s9247_s3 = smov 96  }
  0x5b   :  { %757 = vrot.lane.b32.xlu1 %v9315_v16, %s9242_s15  ;;  %755 = vrot.lane.b32.xlu0 %v9309_v14, %s9242_s15 }
  0x5f   :  { %761 = vrot.lane.b32.xlu1 %v9313_v15, %s9242_s15  ;;  %759 = vrot.lane.b32.xlu0 %v9301_v11, %s9242_s15 }
  0x63   :  { %765 = vrot.lane.b32.xlu1 %v9339_v25, %s9242_s15  ;;  %763 = vrot.lane.b32.xlu0 %v9347_v29, %s9242_s15 }
  0x67   :  { %769 = vrot.lane.b32.xlu1 %v9349_v30, %s9242_s15  ;;  %767 = vrot.lane.b32.xlu0 %v8249_v34, %s9242_s15  ;;  %v8277_v34 = vcombine.low %v887_v23, %v891_v24 }
  0x6b   :  { %773 = vrot.lane.b32.xlu1 %v9381_v42, %s9242_s15  ;;  %771 = vrot.lane.b32.xlu0 %v9341_v26, %s9242_s15 }
  0x6f   :  { %777 = vrot.lane.b32.xlu1 %v9394_v47, %s9242_s15  ;;  %775 = vrot.lane.b32.xlu0 %v9400_v50, %s9242_s15 }
  0x73   :  { %781 = vrot.lane.b32.xlu1 %v8256_v40, %s9242_s15  ;;  %779 = vrot.lane.b32.xlu0 %v9406_v52, %s9242_s15 }
  0x77   :  { %785 = vrot.lane.b32.xlu1 %v9365_v37, %s9242_s15  ;;  %783 = vrot.lane.b32.xlu0 %v9375_v41, %s9242_s15 }
  0x79   :  { %v9565_v43 = vpop.permute.xlu1 %295  ;;  %v292_v46 = vpop.permute.xlu0 %291 }
  0x7b   :  { %789 = vrot.lane.b32.xlu1 %v9427_v59, %s9242_s15  ;;  %787 = vrot.lane.b32.xlu0 %v9433_v62, %s9242_s15 }
  0x7d   :  { %v9579_v51 = vpop.permute.xlu1 %297  ;;  %v294_v53 = vpop.permute.xlu0 %293 }
  0x7e   :  { %v335_v54 = vsel %vm333_vm0, %v294_v53, %v9565_v43  ;;  %v334_v55 = vsel %vm333_vm0, %v292_v46, %v294_v53  ;;  %v899_v46 = vmax.bf16 %v13302_v3, %v875_v39 }
  0x7f   :  { %793 = vrot.lane.b32.xlu1 %v9443_v1, %s9242_s15  ;;  %791 = vrot.lane.b32.xlu0 %v9447_v2, %s9242_s15 }
  0x80   :  { %1237 = vmatprep.subr.bf16.mxu1 %v335_v54 }
  0x81   :  { %1238 = vmatpush1.bf16.msra.mxu1 %v334_v55  ;;  %v9588_v57 = vpop.permute.xlu1 %301  ;;  %v9590_v58 = vpop.permute.xlu0 %299  ;;  %v8284_v55 = vcombine.low %v895_v45, %v899_v46  ;;  %v1735_v45 = vld [vmem:[%s13292_s0 + $0x1c] sm:$0xff] }
  0x82   :  { %13337 = vst [vmem:[#allocation3_spill] sm:$0xff] %v9588_v57  ;;  %13338 = vst [vmem:[#allocation4_spill] sm:$0xff] %v9590_v58 }
  0x83   :  { %987 = vrot.lane.b32.xlu1 %v9309_v14, %s9243_s29  ;;  %795 = vrot.lane.b32.xlu0 %v8263_v56, %s9242_s15  ;;  %s9244_s15 = smov 99  }
  0x85   :  { %v306_v63 = vpop.permute.xlu1 %305  ;;  %v9601_v0 = vpop.permute.xlu0 %303 }
  0x86   :  { %13339 = vst [vmem:[#allocation5_spill] sm:$0xff] %v9601_v0  ;;  %v337_v0 = vsel %vm333_vm0, %v9579_v51, %v9590_v58 }
  0x87   :  { %991 = vrot.lane.b32.xlu1 %v9301_v11, %s9243_s29  ;;  %989 = vrot.lane.b32.xlu0 %v9315_v16, %s9243_s29 }
  0x89   :  { %v9609_v6 = vpop.permute.xlu1 %309  ;;  %v308_v7 = vpop.permute.xlu0 %307 }
  0x8a   :  { %v341_v8 = vsel %vm333_vm0, %v308_v7, %v9609_v6  ;;  %v340_v9 = vsel %vm333_vm0, %v306_v63, %v308_v7  ;;  %v1505_v7 = vld [vmem:[%s13292_s0 + $0x34] sm:$0xf] }
  0x8b   :  { %995 = vrot.lane.b32.xlu1 %v9347_v29, %s9243_s29  ;;  %993 = vrot.lane.b32.xlu0 %v9313_v15, %s9243_s29 }
  0x8c   :  { %1239 = vmatprep.subr.bf16.mxu1 %v341_v8 }
  0x8d   :  { %1240 = vmatpush1.bf16.msra.mxu1 %v340_v9  ;;  %v9618_v12 = vpop.permute.xlu1 %313  ;;  %v9620_v13 = vpop.permute.xlu0 %311 }
  0x8f   :  { %999 = vrot.lane.b32.xlu1 %v8270_v10, %s9243_s29  ;;  %997 = vrot.lane.b32.xlu0 %v9339_v25, %s9243_s29 }
  0x91   :  { %v9625_v17 = vpop.permute.xlu1 %317  ;;  %v9627_v18 = vpop.permute.xlu0 %315 }
  0x92   :  { %13340 = vst [vmem:[#allocation6_spill] sm:$0xff] %v9625_v17  ;;  %13341 = vst [vmem:[#allocation7_spill] sm:$0xff] %v9627_v18 }
  0x93   :  { %1003 = vrot.lane.b32.xlu1 %v9341_v26, %s9243_s29  ;;  %1001 = vrot.lane.b32.xlu0 %v9349_v30, %s9243_s29 }
  0x95   :  { %v322_v19 = vpop.permute.xlu1 %321  ;;  %v320_v22 = vpop.permute.xlu0 %319 }
  0x96   :  { %v346_v33 = vsel %vm333_vm0, %v320_v22, %v322_v19 }
  0x97   :  { %1007 = vrot.lane.b32.xlu1 %v9400_v50, %s9243_s29  ;;  %1005 = vrot.lane.b32.xlu0 %v9381_v42, %s9243_s29 }
  0x99   :  { %v9645_v27 = vpop.permute.xlu1 %325  ;;  %v9647_v28 = vpop.permute.xlu0 %323 }
  0x9a   :  { %v347_v32 = vsel %vm333_vm0, %v322_v19, %v9647_v28 }
  0x9b   :  { %1011 = vrot.lane.b32.xlu1 %v9406_v52, %s9243_s29  ;;  %1009 = vrot.lane.b32.xlu0 %v9394_v47, %s9243_s29 }
  0x9c   :  { %1241 = vmatprep.subr.bf16.mxu1 %v347_v32 }
  0x9d   :  { %1242 = vmatpush1.bf16.msra.mxu1 %v346_v33  ;;  %v9661_v35 = vpop.permute.xlu1 %329  ;;  %v9665_v36 = vpop.permute.xlu0 %327 }
  0x9e   :  { %13342 = vst [vmem:[#allocation8_spill] sm:$0xff] %v9661_v35 }
  0x9f   :  { %1015 = vrot.lane.b32.xlu1 %v9375_v41, %s9243_s29  ;;  %1013 = vrot.lane.b32.xlu0 %v8277_v34, %s9243_s29 }
  0xa1   :  { %v524_v40 = vpop.permute.xlu1 %523  ;;  %v9676_v44 = vpop.permute.xlu0 %331 }
  0xa2   :  { %13343 = vst [vmem:[#allocation9_spill] sm:$0xff] %v9676_v44 }
  0xa3   :  { %1019 = vrot.lane.b32.xlu1 %v9433_v62, %s9243_s29  ;;  %1017 = vrot.lane.b32.xlu0 %v9365_v37, %s9243_s29 }
  0xa5   :  { %v9684_v48 = vpop.permute.xlu1 %527  ;;  %v526_v49 = vpop.permute.xlu0 %525 }
  0xa6   :  { %v567_v53 = vsel %vm565_vm2, %v526_v49, %v9684_v48  ;;  %v566_v54 = vsel %vm565_vm2, %v524_v40, %v526_v49 }
  0xa7   :  { %1023 = vrot.lane.b32.xlu1 %v9447_v2, %s9243_s29  ;;  %1021 = vrot.lane.b32.xlu0 %v9427_v59, %s9243_s29 }
  0xa8   :  { %1243 = vmatprep.subr.bf16.mxu1 %v567_v53  ;;  %v1759_v53 = vmax.bf16 %v13302_v3, %v1735_v45 }
  0xa9   :  { %1244 = vmatpush1.bf16.msra.mxu1 %v566_v54  ;;  %v9693_v56 = vpop.permute.xlu1 %531  ;;  %v9695_v60 = vpop.permute.xlu0 %529 }
  0xab   :  { %1027 = vrot.lane.b32.xlu1 %v8284_v55, %s9243_s29  ;;  %1025 = vrot.lane.b32.xlu0 %v9443_v1, %s9243_s29  ;;  %s9261_s29 = smov 10  }
  0xad   :  { %v9700_v61 = vpop.permute.xlu1 %535  ;;  %v9702_v63 = vpop.permute.xlu0 %533 }
  0xae   :  { %13344 = vst [vmem:[#allocation10_spill] sm:$0xff] %v9700_v61  ;;  %13345 = vst [vmem:[#allocation11_spill] sm:$0xff] %v9702_v63 }
  0xaf   :  { %1635 = vrot.lane.b32.xlu1 %v9315_v16, %s9244_s15  ;;  %1633 = vrot.lane.b32.xlu0 %v9309_v14, %s9244_s15  ;;  %v1525_v16 = vmax.bf16 %v13302_v3, %v1501_v5  ;;  %v1529_v14 = vmax.bf16 %v13302_v3, %v1505_v7  ;;  %v1736_v5 = vld [vmem:[%s13292_s0 + $0x24] sm:$0xff] }
  0xb1   :  { %v540_v4 = vpop.permute.xlu1 %539  ;;  %v538_v8 = vpop.permute.xlu0 %537 }
  0xb3   :  { %1639 = vrot.lane.b32.xlu1 %v9313_v15, %s9244_s15  ;;  %1637 = vrot.lane.b32.xlu0 %v9301_v11, %s9244_s15  ;;  %v572_v11 = vsel %vm565_vm2, %v538_v8, %v540_v4  ;;  %v8311_v15 = vcombine.low %v1525_v16, %v1529_v14  ;;  %v1760_v14 = vmax.bf16 %v13302_v3, %v1736_v5 }
  0xb5   :  { %v9720_v9 = vpop.permute.xlu1 %543  ;;  %v9722_v10 = vpop.permute.xlu0 %541 }
  0xb6   :  { %v573_v19 = vsel %vm565_vm2, %v540_v4, %v9722_v10  ;;  %v1732_v4 = vld [vmem:[%s13292_s0 + $0x8] sm:$0xff] }
  0xb7   :  { %1643 = vrot.lane.b32.xlu1 %v9339_v25, %s9244_s15  ;;  %1641 = vrot.lane.b32.xlu0 %v9347_v29, %s9244_s15  ;;  %v1509_v25 = vld [vmem:[%s13292_s0 + $0x50] sm:$0xf]  ;;  %v1513_v29 = vld [vmem:[%s13292_s0 + $0x6c] sm:$0xf]  ;;  %v1756_v16 = vmax.bf16 %v13302_v3, %v1732_v4 }
  0xb8   :  { %1245 = vmatprep.subr.bf16.mxu1 %v573_v19  ;;  %v1533_v24 = vmax.bf16 %v13302_v3, %v1509_v25 }
  0xb9   :  { %1246 = vmatpush1.bf16.msra.mxu1 %v572_v11  ;;  %v9731_v20 = vpop.permute.xlu1 %547  ;;  %v9733_v21 = vpop.permute.xlu0 %545 }
  0xba   :  { %13346 = vst [vmem:[#allocation12_spill] sm:$0xff] %v9731_v20  ;;  %v1749_v20 = vld [vmem:[%s13292_s0 + $0x80] sm:$0xff] }
  0xbb   :  { %1647 = vrot.lane.b32.xlu1 %v9349_v30, %s9244_s15  ;;  %1645 = vrot.lane.b32.xlu0 %v8311_v15, %s9244_s15  ;;  %v1537_v30 = vmax.bf16 %v13302_v3, %v1513_v29  ;;  %v1737_v15 = vld [vmem:[%s13292_s0 + $0x2c] sm:$0xff] }
  0xbd   :  { %v552_v22 = vpop.permute.xlu1 %551  ;;  %v9744_v23 = vpop.permute.xlu0 %549  ;;  %v8318_v39 = vcombine.low %v1533_v24, %v1537_v30  ;;  %v1761_v24 = vmax.bf16 %v13302_v3, %v1737_v15  ;;  %v1734_v30 = vld [vmem:[%s13292_s0 + $0x18] sm:$0xf] }
  0xbe   :  { %13347 = vst [vmem:[#allocation13_spill] sm:$0xff] %v9744_v23  ;;  %v1753_v23 = vld [vmem:[%s13292_s0 + $0x9c] sm:$0xff] }
  0xbf   :  { %1651 = vrot.lane.b32.xlu1 %v9381_v42, %s9244_s15  ;;  %1649 = vrot.lane.b32.xlu0 %v9341_v26, %s9244_s15 }
  0xc1   :  { %v9752_v32 = vpop.permute.xlu1 %555  ;;  %v554_v33 = vpop.permute.xlu0 %553 }
  0xc2   :  { %v579_v34 = vsel %vm565_vm2, %v554_v33, %v9752_v32  ;;  %v578_v38 = vsel %vm565_vm2, %v552_v22, %v554_v33  ;;  %v1738_v33 = vld [vmem:[%s13292_s0 + $0x34] sm:$0xf] }
  0xc3   :  { %1655 = vrot.lane.b32.xlu1 %v9394_v47, %s9244_s15  ;;  %1653 = vrot.lane.b32.xlu0 %v9400_v50, %s9244_s15  ;;  %v1731_v50 = vld [vmem:[%s13292_s0] sm:$0xff]  ;;  %v1762_v45 = vmax.bf16 %v13302_v3, %v1738_v33  ;;  %v1741_v33 = vld [vmem:[%s13292_s0 + $0x48] sm:$0xff] }
  0xc4   :  { %1247 = vmatprep.subr.bf16.mxu1 %v579_v34 }
  0xc5   :  { %1248 = vmatpush1.bf16.msra.mxu1 %v578_v38  ;;  %v9761_v42 = vpop.permute.xlu1 %559  ;;  %v9763_v26 = vpop.permute.xlu0 %557 }
  0xc7   :  { %1659 = vrot.lane.b32.xlu1 %v8318_v39, %s9244_s15  ;;  %1657 = vrot.lane.b32.xlu0 %v9406_v52, %s9244_s15  ;;  %v1517_v52 = vld [vmem:[%s13292_s0 + $0x88] sm:$0xf] }
  0xc8   :  { %v1541_v54 = vmax.bf16 %v13302_v3, %v1517_v52  ;;  %v9852_v52 = vcombine.high %v1756_v16, %v1760_v14 }
  0xc9   :  { %v9768_v47 = vpop.permute.xlu1 %563  ;;  %v9770_v40 = vpop.permute.xlu0 %561 }
  0xca   :  { %13348 = vst [vmem:[#allocation14_spill] sm:$0xff] %v9768_v47  ;;  %13349 = vst [vmem:[#allocation15_spill] sm:$0xff] %v9770_v40 }
  0xcb   :  { %1663 = vrot.lane.b32.xlu1 %v9365_v37, %s9244_s15  ;;  %1661 = vrot.lane.b32.xlu0 %v9375_v41, %s9244_s15  ;;  %v1521_v37 = vld [vmem:[%s13292_s0 + $0xa4] sm:$0xf]  ;;  %v1755_v41 = vmax.bf16 %v13302_v3, %v1731_v50  ;;  %v1758_v50 = vmax.bf16 %v13302_v3, %v1734_v30  ;;  %13352 = vst [vmem:[#allocation18_spill] sm:$0xff] %v9852_v52 }
  0xcc   :  { %v1545_v55 = vmax.bf16 %v13302_v3, %v1521_v37  ;;  %v1739_v37 = vld [vmem:[%s13292_s0 + $0x38] sm:$0xff] }
  0xcd   :  { %v758_v46 = vpop.permute.xlu1 %757  ;;  %v756_v49 = vpop.permute.xlu0 %755  ;;  %v9810_v8 = vcombine.low %v1755_v41, %v1759_v53  ;;  %v9840_v34 = vcombine.high %v1755_v41, %v1759_v53  ;;  %v1763_v5 = vmax.bf16 %v13302_v3, %v1739_v37 }
  0xce   :  { %v798_v19 = vsel %vm797_vm3, %v756_v49, %v758_v46  ;;  %v8325_v11 = vcombine.low %v1541_v54, %v1545_v55  ;;  %v1743_v49 = vld [vmem:[%s13292_s0 + $0x54] sm:$0xff]  ;;  %v8332_v54 = vcombine.low %v1758_v50, %v1762_v45 }
  0xcf   :  { %1667 = vrot.lane.b32.xlu1 %v9427_v59, %s9244_s15  ;;  %1665 = vrot.lane.b32.xlu0 %v9433_v62, %s9244_s15 }
  0xd1   :  { %v9802_v59 = vpop.permute.xlu1 %761  ;;  %v9804_v7 = vpop.permute.xlu0 %759 }
  0xd2   :  { %v799_v62 = vsel %vm797_vm3, %v758_v46, %v9804_v7 }
  0xd3   :  { %1671 = vrot.lane.b32.xlu1 %v9443_v1, %s9244_s15  ;;  %1669 = vrot.lane.b32.xlu0 %v9447_v2, %s9244_s15  ;;  %v1733_v1 = vld [vmem:[%s13292_s0 + $0x10] sm:$0xff]  ;;  %v9829_v2 = vcombine.low %v1756_v16, %v1760_v14  ;;  %v1740_v14 = vld [vmem:[%s13292_s0 + $0x40] sm:$0xff] }
  0xd4   :  { %1249 = vmatprep.subr.bf16.mxu1 %v799_v62  ;;  %v1757_v22 = vmax.bf16 %v13302_v3, %v1733_v1  ;;  %v1767_v62 = vmax.bf16 %v13302_v3, %v1743_v49  ;;  %v1765_v49 = vmax.bf16 %v13302_v3, %v1741_v33 }
  0xd5   :  { %1250 = vmatpush1.bf16.msra.mxu1 %v798_v19  ;;  %v9823_v25 = vpop.permute.xlu1 %765  ;;  %v9825_v29 = vpop.permute.xlu0 %763  ;;  %v1744_v19 = vld [vmem:[%s13292_s0 + $0x5c] sm:$0xff] }
  0xd6   :  { %13350 = vst [vmem:[#allocation16_spill] sm:$0xff] %v9823_v25  ;;  %v9848_v46 = vcombine.low %v1757_v22, %v1761_v24  ;;  %v9871_v16 = vcombine.high %v1757_v22, %v1761_v24  ;;  %v9884_v15 = vcombine.high %v1763_v5, %v1767_v62  ;;  %v1764_v22 = vmax.bf16 %v13302_v3, %v1740_v14  ;;  %v1746_v14 = vld [vmem:[%s13292_s0 + $0x6c] sm:$0xf]  ;;  %v1748_v25 = vld [vmem:[%s13292_s0 + $0x78] sm:$0xff] }
  0xd7   :  { %1866 = vrot.lane.b32.xlu1 %v9810_v8, %s9245_s12  ;;  %1673 = vrot.lane.b32.xlu0 %v8325_v11, %s9244_s15  ;;  %v1768_v24 = vmax.bf16 %v13302_v3, %v1744_v19  ;;  %v9890_v30 = vcombine.low %v1763_v5, %v1767_v62  ;;  %v1742_v62 = vld [vmem:[%s13292_s0 + $0x50] sm:$0xf] }
  0xd9   :  { %v770_v38 = vpop.permute.xlu1 %769  ;;  %v9842_v39 = vpop.permute.xlu0 %767  ;;  %v9904_v37 = vcombine.high %v1764_v22, %v1768_v24 }
  0xda   :  { %13351 = vst [vmem:[#allocation17_spill] sm:$0xff] %v9842_v39  ;;  %v1752_v39 = vld [vmem:[%s13292_s0 + $0x94] sm:$0xff] }
  0xdb   :  { %1870 = vrot.lane.b32.xlu1 %v9829_v2, %s9245_s12  ;;  %1868 = vrot.lane.b32.xlu0 %v9840_v34, %s9245_s12  ;;  %13355 = vst [vmem:[#allocation21_spill] sm:$0xff] %v9904_v37 }
  0xdd   :  { %v9860_v41 = vpop.permute.xlu1 %773  ;;  %v772_v53 = vpop.permute.xlu0 %771 }
  0xde   :  { %v805_v55 = vsel %vm797_vm3, %v772_v53, %v9860_v41  ;;  %v804_v4 = vsel %vm797_vm3, %v770_v38, %v772_v53  ;;  %v1745_v38 = vld [vmem:[%s13292_s0 + $0x64] sm:$0xff] }
  0xdf   :  { %1874 = vrot.lane.b32.xlu1 %v9848_v46, %s9245_s12  ;;  %1872 = vrot.lane.b32.xlu0 %v9852_v52, %s9245_s12  ;;  %v1769_v53 = vmax.bf16 %v13302_v3, %v1745_v38 }
  0xe0   :  { %1251 = vmatprep.subr.bf16.mxu1 %v805_v55  ;;  %v1747_v55 = vld [vmem:[%s13292_s0 + $0x70] sm:$0xff] }
  0xe1   :  { %1252 = vmatpush1.bf16.msra.mxu1 %v804_v4  ;;  %v9879_v11 = vpop.permute.xlu1 %777  ;;  %v9881_v1 = vpop.permute.xlu0 %775  ;;  %v1751_v4 = vld [vmem:[%s13292_s0 + $0x8c] sm:$0xff]  ;;  %v9932_v38 = vcombine.low %v1765_v49, %v1769_v53 }
  0xe2   :  { %v1775_v33 = vmax.bf16 %v13302_v3, %v1751_v4 }
  0xe3   :  { %1878 = vrot.lane.b32.xlu1 %v8332_v54, %s9245_s12  ;;  %1876 = vrot.lane.b32.xlu0 %v9871_v16, %s9245_s12  ;;  %v9910_v54 = vcombine.low %v1764_v22, %v1768_v24  ;;  %v9926_v22 = vcombine.high %v1765_v49, %v1769_v53  ;;  %v1771_v24 = vmax.bf16 %v13302_v3, %v1747_v55 }
  0xe4   :  { %13356 = vst [vmem:[#allocation22_spill] sm:$0xff] %v9932_v38 }
  0xe5   :  { %v9898_v50 = vpop.permute.xlu1 %781  ;;  %v9900_v45 = vpop.permute.xlu0 %779  ;;  %v9950_v53 = vcombine.low %v1771_v24, %v1775_v33 }
  0xe6   :  { %13353 = vst [vmem:[#allocation19_spill] sm:$0xff] %v9898_v50  ;;  %13354 = vst [vmem:[#allocation20_spill] sm:$0xff] %v9900_v45  ;;  %v1766_v45 = vmax.bf16 %v13302_v3, %v1742_v62  ;;  %v1770_v50 = vmax.bf16 %v13302_v3, %v1746_v14  ;;  %v1772_v62 = vmax.bf16 %v13302_v3, %v1748_v25 }
  0xe7   :  { %1882 = vrot.lane.b32.xlu1 %v9884_v15, %s9245_s12  ;;  %1880 = vrot.lane.b32.xlu0 %v9890_v30, %s9245_s12  ;;  %v1776_v14 = vmax.bf16 %v13302_v3, %v1752_v39 }
  0xe8   :  { %v8339_v47 = vcombine.low %v1766_v45, %v1770_v50  ;;  %v1773_v50 = vmax.bf16 %v13302_v3, %v1749_v20  ;;  %v1777_v45 = vmax.bf16 %v13302_v3, %v1753_v23 }
  0xe9   :  { %v786_v5 = vpop.permute.xlu1 %785  ;;  %v784_v19 = vpop.permute.xlu0 %783  ;;  %v9969_v39 = vcombine.low %v1772_v62, %v1776_v14 }
  0xea   :  { %v810_v40 = vsel %vm797_vm3, %v784_v19, %v786_v5  ;;  %v1754_v19 = vld [vmem:[%s13292_s0 + $0xa4] sm:$0xf]  ;;  %v9986_v20 = vcombine.low %v1773_v50, %v1777_v45 }
  0xeb   :  { %1886 = vrot.lane.b32.xlu1 %v9904_v37, %s9245_s12  ;;  %1884 = vrot.lane.b32.xlu0 %v9910_v54, %s9245_s12 }
  0xed   :  { %v9942_v55 = vpop.permute.xlu1 %789  ;;  %v9944_v4 = vpop.permute.xlu0 %787 }
  0xee   :  { %v811_v49 = vsel %vm797_vm3, %v786_v5, %v9944_v4  ;;  %v9974_v5 = vcombine.high %v1771_v24, %v1775_v33  ;;  %v9992_v24 = vcombine.high %v1772_v62, %v1776_v14 }
  0xef   :  { %1890 = vrot.lane.b32.xlu1 %v9926_v22, %s9245_s12  ;;  %1888 = vrot.lane.b32.xlu0 %v9932_v38, %s9245_s12 }
  0xf0   :  { %1253 = vmatprep.subr.bf16.mxu1 %v811_v49  ;;  %13359 = vst [vmem:[#allocation25_spill] sm:$0xff] %v9992_v24 }
  0xf1   :  { %1254 = vmatpush1.bf16.msra.mxu1 %v810_v40  ;;  %v9963_v63 = vpop.permute.xlu1 %793  ;;  %v9965_v25 = vpop.permute.xlu0 %791  ;;  %v1750_v40 = vld [vmem:[%s13292_s0 + $0x88] sm:$0xf] }
  0xf2   :  { %13357 = vst [vmem:[#allocation23_spill] sm:$0xff] %v9963_v63  ;;  %v1774_v23 = vmax.bf16 %v13302_v3, %v1750_v40 }
  0xf3   :  { %1894 = vrot.lane.b32.xlu1 %v9950_v53, %s9245_s12  ;;  %1892 = vrot.lane.b32.xlu0 %v8339_v47, %s9245_s12  ;;  %v1778_v47 = vmax.bf16 %v13302_v3, %v1754_v19  ;;  %v10003_v19 = vcombine.high %v1773_v50, %v1777_v45  ;;  %v1970_v50 = vld [vmem:[%s13292_s0 + $0x34] sm:$0xf] }
  0xf5   :  { %v988_v49 = vpop.permute.xlu1 %987  ;;  %v9982_v63 = vpop.permute.xlu0 %795  ;;  %v8346_v40 = vcombine.low %v1774_v23, %v1778_v47 }
  0xf6   :  { %13358 = vst [vmem:[#allocation24_spill] sm:$0xff] %v9982_v63 }
  0xf7   :  { %1898 = vrot.lane.b32.xlu1 %v9969_v39, %s9245_s12  ;;  %1896 = vrot.lane.b32.xlu0 %v9974_v5, %s9245_s12 }
  0xf9   :  { %v9994_v33 = vpop.permute.xlu1 %991  ;;  %v990_v61 = vpop.permute.xlu0 %989 }
  0xfa   :  { %v1031_v63 = vsel %vm1029_vm4, %v990_v61, %v9994_v33  ;;  %v1030_v35 = vsel %vm1029_vm4, %v988_v49, %v990_v61  ;;  %v13362_v49 = vmov 0  }
  0xfb   :  { %1902 = vrot.lane.b32.xlu1 %v9986_v20, %s9245_s12  ;;  %1900 = vrot.lane.b32.xlu0 %v9992_v24, %s9245_s12  ;;  %v1994_v47 = vmax.bf16 %v13362_v49, %v1970_v50 }
  0xfc   :  { %1255 = vmatprep.subr.bf16.mxu1 %v1031_v63  ;;  %v1966_v63 = vld [vmem:[%s13292_s0 + $0x18] sm:$0xf] }
  0xfd   :  { %1256 = vmatpush1.bf16.msra.mxu1 %v1030_v35  ;;  %v10005_v62 = vpop.permute.xlu1 %995  ;;  %v10007_v14 = vpop.permute.xlu0 %993  ;;  %v1990_v23 = vmax.bf16 %v13362_v49, %v1966_v63 }
  0xff   :  { %1906 = vrot.lane.b32.xlu1 %v8346_v40, %s9245_s12  ;;  %1904 = vrot.lane.b32.xlu0 %v10003_v19, %s9245_s12  ;;  %v8353_v18 = vcombine.low %v1990_v23, %v1994_v47  ;;  %v10075_v47 = vld [vmem:[%s13293_s1 + $0x14] ss:$8 sps:$4 sm:$0xff]  }
 0x101   :  { %v10012_v3 = vpop.permute.xlu1 %999  ;;  %v10014_v61 = vpop.permute.xlu0 %997 }
 0x102   :  { %13360 = vst [vmem:[#allocation26_spill] sm:$0xff] %v10012_v3  ;;  %13361 = vst [vmem:[#allocation27_spill] sm:$0xff] %v10014_v61 }
 0x103   :  { %2100 = vrot.lane.b32.xlu1 %v9840_v34, %s9246_s22  ;;  %2098 = vrot.lane.b32.xlu0 %v9810_v8, %s9246_s22 }
 0x105   :  { %v1004_v35 = vpop.permute.xlu1 %1003  ;;  %v1002_v45 = vpop.permute.xlu0 %1001 }
 0x106   :  { %v1036_v44 = vsel %vm1029_vm4, %v1002_v45, %v1004_v35  ;;  %v10068_v45 = vld [vmem:[%s13293_s1] ss:$8 sps:$4 sm:$0xff]  }
 0x107   :  { %2104 = vrot.lane.b32.xlu1 %v9852_v52, %s9246_s22  ;;  %2102 = vrot.lane.b32.xlu0 %v9829_v2, %s9246_s22 }
 0x109   :  { %v10032_v40 = vpop.permute.xlu1 %1007  ;;  %v10034_v61 = vpop.permute.xlu0 %1005 }
 0x10a   :  { %v1037_v3 = vsel %vm1029_vm4, %v1004_v35, %v10034_v61 }
 0x10b   :  { %2108 = vrot.lane.b32.xlu1 %v9871_v16, %s9246_s22  ;;  %2106 = vrot.lane.b32.xlu0 %v9848_v46, %s9246_s22 }
 0x10c   :  { %1257 = vmatprep.subr.bf16.mxu1 %v1037_v3 }
 0x10d   :  { %1258 = vmatpush1.bf16.msra.mxu1 %v1036_v44  ;;  %v10043_v63 = vpop.permute.xlu1 %1011  ;;  %v10045_v50 = vpop.permute.xlu0 %1009 }
 0x10e   :  { %13363 = vst [vmem:[#allocation28_spill] sm:$0xff] %v10043_v63 }
 0x10f   :  { %2112 = vrot.lane.b32.xlu1 %v9890_v30, %s9246_s22  ;;  %2110 = vrot.lane.b32.xlu0 %v8353_v18, %s9246_s22 }
 0x111   :  { %v1016_v17 = vpop.permute.xlu1 %1015  ;;  %v10050_v57 = vpop.permute.xlu0 %1013 }
 0x112   :  { %13364 = vst [vmem:[#allocation29_spill] sm:$0xff] %v10050_v57 }
 0x113   :  { %2116 = vrot.lane.b32.xlu1 %v9910_v54, %s9246_s22  ;;  %2114 = vrot.lane.b32.xlu0 %v9884_v15, %s9246_s22 }
 0x115   :  { %v10056_v3 = vpop.permute.xlu1 %1019  ;;  %v1018_v44 = vpop.permute.xlu0 %1017 }
 0x116   :  { %v1043_v35 = vsel %vm1029_vm4, %v1018_v44, %v10056_v3  ;;  %v1042_v18 = vsel %vm1029_vm4, %v1016_v17, %v1018_v44 }
 0x117   :  { %2120 = vrot.lane.b32.xlu1 %v9932_v38, %s9246_s22  ;;  %2118 = vrot.lane.b32.xlu0 %v9904_v37, %s9246_s22 }
 0x118   :  { %1259 = vmatprep.subr.bf16.mxu1 %v1043_v35  ;;  %v10100_v35 = vld [vmem:[%s13293_s1 + $0x10] ss:$8 sps:$4 sm:$0xff]  }
 0x119   :  { %1260 = vmatpush1.bf16.msra.mxu1 %v1042_v18  ;;  %v10070_v23 = vpop.permute.xlu1 %1023  ;;  %v10077_v63 = vpop.permute.xlu0 %1021  ;;  %13367 = vst [vmem:[#allocation32_spill] sm:$0xff] %v10100_v35 }
 0x11a   :  { %1304 = vmatprep.subr.bf16.mxu1 %v9852_v52 }
 0x11b   :  { %2130 = vrot.lane.b32.xlu1 %v9969_v39, %s9246_s22  ;;  %2128 = vrot.lane.b32.xlu0 %v9974_v5, %s9246_s22 }
 0x11c   :  { %1264 = vmatmul.mubr.bf16.vlgmr.msra.gmra.mrb[0].mxu1 %v10068_v45 }
 0x11d   :  { %1305 = vmatpush1.bf16.msra.mxu1 %v9829_v2  ;;  %v10086_v17 = vpop.permute.xlu1 %1027  ;;  %8294 = vmatprep.mubr.msk.bf16.mxu1 %vm1218_vm1, %v10075_v47  ;;  %v10090_v44 = vpop.permute.xlu0 %1025 }
 0x11e   :  { %13365 = vst [vmem:[#allocation30_spill] sm:$0xff] %v10086_v17  ;;  %13366 = vst [vmem:[#allocation31_spill] sm:$0xff] %v10090_v44  ;;  %1306 = vmatprep.subr.bf16.mxu1 %v9904_v37  ;;  %v10106_v44 = vld [vmem:[%s13293_s1 + $0x24] ss:$8 sps:$4 sm:$0xff]  }
 0x11f   :  { %2332 = vrot.lane.b32.xlu1 %v9840_v34, %s9247_s3  ;;  %2126 = vrot.lane.b32.xlu0 %v9950_v53, %s9246_s22  ;;  %13368 = vst [vmem:[#allocation33_spill] sm:$0xff] %v10106_v44 }
 0x121   :  { %1307 = vmatpush1.bf16.msra.mxu1 %v9910_v54  ;;  %v1636_v18 = vpop.permute.xlu1 %1635  ;;  %v1634_v17 = vpop.permute.xlu0 %1633 }
 0x122   :  { %1308 = vmatprep.subr.bf16.mxu1 %v9992_v24  ;;  %v1676_v58 = vsel %vm1675_vm5, %v1634_v17, %v1636_v18  ;;  %v569_v17 = vsel %vm565_vm2, %v9695_v60, %v9693_v56 }
 0x123   :  { %2330 = vrot.lane.b32.xlu1 %v9810_v8, %s9247_s3  ;;  %2334 = vrot.lane.b32.xlu0 %v9829_v2, %s9247_s3 }
 0x124   :  { %1274 = vmatmul.mubr.bf16.gmra.mrb[4].mxu1 %v10100_v35 }
 0x125   :  { %1309 = vmatpush1.bf16.msra.mxu1 %v9969_v39  ;;  %v10115_v57 = vpop.permute.xlu1 %1639  ;;  %8295 = vmatprep.mubr.msk.bf16.mxu1 %vm1218_vm1, %v10106_v44  ;;  %v10122_v38 = vpop.permute.xlu0 %1637 }
 0x126   :  { %13369 = vst [vmem:[#allocation34_spill] sm:$0xff] %v10115_v57  ;;  %13370 = vst [vmem:[#allocation35_spill] sm:$0xff] %v10122_v38  ;;  %1310 = vmatprep.subr.bf16.mxu1 %v337_v0  ;;  %v1677_v35 = vsel %vm1675_vm5, %v1636_v18, %v10122_v38  ;;  %v336_v57 = vsel %vm333_vm0, %v9565_v43, %v9579_v51  ;;  %v10137_v0 = vld [vmem:[%s13293_s1 + $0x20] ss:$8 sps:$4 sm:$0xff]   ;;  %v343_v38 = vsel %vm333_vm0, %v9620_v13, %v9618_v12 }
 0x127   :  { %2348 = vrot.lane.b32.xlu1 %v9910_v54, %s9247_s3  ;;  %2346 = vrot.lane.b32.xlu0 %v9884_v15, %s9247_s3  ;;  %v342_v51 = vsel %vm333_vm0, %v9609_v6, %v9620_v13  ;;  %v348_v6 = vsel %vm333_vm0, %v9647_v28, %v9645_v27 }
 0x128   :  { %2806 = vmatprep.subr.bf16.mxu0 %v1677_v35  ;;  %v10147_v35 = vld [vmem:[%s13293_s1 + $0x34] ss:$8 sps:$4 sm:$0xff]  }
 0x129   :  { %1311 = vmatpush1.bf16.msra.mxu1 %v336_v57  ;;  %2807 = vmatpush1.bf16.msra.mxu0 %v1676_v58  ;;  %v10139_v44 = vpop.permute.xlu1 %1643  ;;  %v10149_v43 = vpop.permute.xlu0 %1641  ;;  %v349_v58 = vsel %vm333_vm0, %v9645_v27, %v9665_v36 }
 0x12a   :  { %1312 = vmatprep.subr.bf16.mxu1 %v343_v38 }
 0x12b   :  { %2360 = vrot.lane.b32.xlu1 %v9974_v5, %s9247_s3  ;;  %2344 = vrot.lane.b32.xlu0 %v9890_v30, %s9247_s3 }
 0x12c   :  { %1284 = vmatmul.mubr.bf16.gmra.mrb[8].mxu1 %v10137_v0 }
 0x12d   :  { %1313 = vmatpush1.bf16.msra.mxu1 %v342_v51  ;;  %v1648_v57 = vpop.permute.xlu1 %1647  ;;  %8296 = vmatprep.mubr.msk.bf16.mxu1 %vm1218_vm1, %v10147_v35  ;;  %v10164_v38 = vpop.permute.xlu0 %1645  ;;  %v10181_v51 = vld [vmem:[%s13293_s1 + $0x30] ss:$8 sps:$4 sm:$0xff]  }
 0x12e   :  { %1314 = vmatprep.subr.bf16.mxu1 %v349_v58  ;;  %v568_v58 = vsel %vm565_vm2, %v9684_v48, %v9695_v60  ;;  %v574_v48 = vsel %vm565_vm2, %v9722_v10, %v9720_v9 }
 0x12f   :  { %2358 = vrot.lane.b32.xlu1 %v9950_v53, %s9247_s3  ;;  %2362 = vrot.lane.b32.xlu0 %v9969_v39, %s9247_s3 }
 0x131   :  { %1315 = vmatpush1.bf16.msra.mxu1 %v348_v6  ;;  %v10173_v13 = vpop.permute.xlu1 %1651  ;;  %v1650_v18 = vpop.permute.xlu0 %1649 }
 0x132   :  { %1316 = vmatprep.subr.bf16.mxu1 %v569_v17  ;;  %v1683_v27 = vsel %vm1675_vm5, %v1650_v18, %v10173_v13  ;;  %v1682_v28 = vsel %vm1675_vm5, %v1648_v57, %v1650_v18 }
 0x133   :  { %2566 = vrot.lane.b32.xlu1 %v9829_v2, %s9248_s14  ;;  %2564 = vrot.lane.b32.xlu0 %v9840_v34, %s9248_s14  ;;  %v575_v2 = vsel %vm565_vm2, %v9720_v9, %v9733_v21  ;;  %v581_v34 = vsel %vm565_vm2, %v9763_v26, %v9761_v42  ;;  %v580_v9 = vsel %vm565_vm2, %v9752_v32, %v9763_v26 }
 0x134   :  { %2808 = vmatprep.subr.bf16.mxu0 %v1683_v27  ;;  %1294 = vmatmul.mubr.bf16.gmra.mrb[12].mxu1 %v10181_v51  ;;  %v800_v32 = vsel %vm797_vm3, %v9804_v7, %v9802_v59  ;;  %v806_v7 = vsel %vm797_vm3, %v9860_v41, %v9881_v1 }
 0x135   :  { %1317 = vmatpush1.bf16.msra.mxu1 %v568_v58  ;;  %2809 = vmatpush1.bf16.msra.mxu0 %v1682_v28  ;;  %v10193_v6 = vpop.permute.xlu1 %1655  ;;  %v10198_v17 = vpop.permute.xlu0 %1653  ;;  %v807_v28 = vsel %vm797_vm3, %v9881_v1, %v9879_v11  ;;  %v812_v1 = vsel %vm797_vm3, %v9944_v4, %v9942_v55 }
 0x136   :  { %1318 = vmatprep.subr.bf16.mxu1 %v575_v2  ;;  %8297 = vmatprep.mubr.msk.bf16.mxu1 %vm1218_vm1, %v9652_v31  ;;  %v10220_v31 = vld [vmem:[%s13293_s1 + $0x44] ss:$8 sps:$4 sm:$0xff]  }
 0x137   :  { %2578 = vrot.lane.b32.xlu1 %v9884_v15, %s9248_s14  ;;  %2562 = vrot.lane.b32.xlu0 %v9810_v8, %s9248_s14  ;;  %v801_v8 = vsel %vm797_vm3, %v9802_v59, %v9825_v29  ;;  %v1974_v15 = vld [vmem:[%s13292_s0 + $0x50] sm:$0xf] }
 0x138   :  { %8426 = vmatprep.mubr.msk.bf16.mxu0 %vm1218_vm1, %v10220_v31  ;;  %v1998_v26 = vmax.bf16 %v13362_v49, %v1974_v15  ;;  %v1033_v15 = vsel %vm1029_vm4, %v10007_v14, %v10005_v62 }
 0x139   :  { %1319 = vmatpush1.bf16.msra.mxu1 %v574_v48  ;;  %v10210_v60 = vpop.permute.xlu1 %1659  ;;  %v10215_v57 = vpop.permute.xlu0 %1657  ;;  %v813_v48 = vsel %vm797_vm3, %v9942_v55, %v9965_v25  ;;  %v1032_v55 = vsel %vm1029_vm4, %v9994_v33, %v10007_v14 }
 0x13a   :  { %1320 = vmatprep.subr.bf16.mxu1 %v581_v34  ;;  %v1986_v34 = vld [vmem:[%s13292_s0 + $0xa4] sm:$0xf] }
 0x13b   :  { %2576 = vrot.lane.b32.xlu1 %v9890_v30, %s9248_s14  ;;  %2580 = vrot.lane.b32.xlu0 %v9910_v54, %s9248_s14  ;;  %v1978_v30 = vld [vmem:[%s13292_s0 + $0x6c] sm:$0xf] }
 0x13c   :  { %v2002_v18 = vmax.bf16 %v13362_v49, %v1978_v30 }
 0x13d   :  { %1321 = vmatpush1.bf16.msra.mxu1 %v580_v9  ;;  %v1664_v10 = vpop.permute.xlu1 %1663  ;;  %v1662_v54 = vpop.permute.xlu0 %1661 }
 0x13e   :  { %1322 = vmatprep.subr.bf16.mxu1 %v801_v8 }
 0x13f   :  { %2594 = vrot.lane.b32.xlu1 %v9969_v39, %s9248_s14  ;;  %2592 = vrot.lane.b32.xlu0 %v9974_v5, %s9248_s14  ;;  %v1688_v39 = vsel %vm1675_vm5, %v1662_v54, %v1664_v10  ;;  %v8360_v5 = vcombine.low %v1998_v26, %v2002_v18  ;;  %v2198_v26 = vld [vmem:[%s13292_s0 + $0x18] sm:$0xf]  ;;  %v2202_v18 = vld [vmem:[%s13292_s0 + $0x34] sm:$0xf] }
 0x141   :  { %1323 = vmatpush1.bf16.msra.mxu1 %v800_v32  ;;  %v10249_v27 = vpop.permute.xlu1 %1667  ;;  %v10254_v58 = vpop.permute.xlu0 %1665  ;;  %v1039_v32 = vsel %vm1029_vm4, %v10032_v40, %v10045_v50 }
 0x142   :  { %1324 = vmatprep.subr.bf16.mxu1 %v807_v28  ;;  %v1689_v59 = vsel %vm1675_vm5, %v1664_v10, %v10254_v58  ;;  %v2010_v10 = vmax.bf16 %v13362_v49, %v1986_v34 }
 0x143   :  { %2122 = vrot.lane.b32.xlu1 %v9926_v22, %s9246_s22  ;;  %2590 = vrot.lane.b32.xlu0 %v9950_v53, %s9248_s14  ;;  %v1982_v53 = vld [vmem:[%s13292_s0 + $0x88] sm:$0xf] }
 0x144   :  { %2810 = vmatprep.subr.bf16.mxu0 %v1689_v59  ;;  %v2006_v9 = vmax.bf16 %v13362_v49, %v1982_v53  ;;  %v1038_v59 = vsel %vm1029_vm4, %v10034_v61, %v10032_v40  ;;  %v1044_v61 = vsel %vm1029_vm4, %v10056_v3, %v10077_v63 }
 0x145   :  { %1325 = vmatpush1.bf16.msra.mxu1 %v806_v7  ;;  %2811 = vmatpush1.bf16.msra.mxu0 %v1688_v39  ;;  %v10266_v2 = vpop.permute.xlu1 %1671  ;;  %v10277_v41 = vpop.permute.xlu0 %1669  ;;  %v2222_v7 = vmax.bf16 %v13362_v49, %v2198_v26  ;;  %v2226_v39 = vmax.bf16 %v13362_v49, %v2202_v18  ;;  %v13371_v26 = vld [vmem:[#allocation22_spill] sm:$0xff] }
 0x146   :  { %1326 = vmatprep.subr.bf16.mxu1 %v813_v48  ;;  %v8367_v4 = vcombine.low %v2006_v9, %v2010_v10  ;;  %v1045_v48 = vsel %vm1029_vm4, %v10077_v63, %v10070_v23  ;;  %v2210_v9 = vld [vmem:[%s13292_s0 + $0x6c] sm:$0xf] }
 0x147   :  { %2132 = vrot.lane.b32.xlu1 %v9992_v24, %s9246_s22  ;;  %2124 = vrot.lane.b32.xlu0 %v8360_v5, %s9246_s22  ;;  %v8374_v40 = vcombine.low %v2222_v7, %v2226_v39  ;;  %v2234_v3 = vmax.bf16 %v13362_v49, %v2210_v9 }
 0x149   :  { %1327 = vmatpush1.bf16.msra.mxu1 %v812_v1  ;;  %v1867_v8 = vpop.permute.xlu1 %1866  ;;  %v10290_v30 = vpop.permute.xlu0 %1673  ;;  %v2206_v1 = vld [vmem:[%s13292_s0 + $0x50] sm:$0xf] }
 0x14a   :  { %1328 = vmatprep.subr.bf16.mxu1 %v1033_v15  ;;  %v2230_v63 = vmax.bf16 %v13362_v49, %v2206_v1  ;;  %v2218_v15 = vld [vmem:[%s13292_s0 + $0xa4] sm:$0xf] }
 0x14b   :  { %2136 = vrot.lane.b32.xlu1 %v10003_v19, %s9246_s22  ;;  %2134 = vrot.lane.b32.xlu0 %v9986_v20, %s9246_s22  ;;  %v13373_v1 = vld [vmem:[#allocation3_spill] sm:$0xff] }
 0x14c   :  { %v8381_v18 = vcombine.low %v2230_v63, %v2234_v3  ;;  %v2430_v63 = vld [vmem:[%s13292_s0 + $0x18] sm:$0xf]  ;;  %v2434_v3 = vld [vmem:[%s13292_s0 + $0x34] sm:$0xf] }
 0x14d   :  { %1329 = vmatpush1.bf16.msra.mxu1 %v1032_v55  ;;  %v10299_v54 = vpop.permute.xlu1 %1870  ;;  %v1869_v28 = vpop.permute.xlu0 %1868 }
 0x14e   :  { %1330 = vmatprep.subr.bf16.mxu1 %v1039_v32  ;;  %v1910_v33 = vsel %vm1908_vm6, %v1869_v28, %v10299_v54  ;;  %v1909_v14 = vsel %vm1908_vm6, %v1867_v8, %v1869_v28  ;;  %v2214_v8 = vld [vmem:[%s13292_s0 + $0x88] sm:$0xf]  ;;  %v2242_v32 = vmax.bf16 %v13362_v49, %v2218_v15  ;;  %v2433_v28 = vld [vmem:[%s13292_s0 + $0x2c] sm:$0xff] }
 0x14f   :  { %2336 = vrot.lane.b32.xlu1 %v9852_v52, %s9247_s3  ;;  %2138 = vrot.lane.b32.xlu0 %v8367_v4, %s9246_s22  ;;  %v2238_v4 = vmax.bf16 %v13362_v49, %v2214_v8  ;;  %v2457_v39 = vmax.bf16 %v13362_v49, %v2433_v28  ;;  %v13374_v15 = vld [vmem:[#allocation32_spill] sm:$0xff]  ;;  %s9262_s22 = smov 9  }
 0x150   :  { %2812 = vmatprep.subr.bf16.mxu0 %v1910_v33  ;;  %v2442_v28 = vld [vmem:[%s13292_s0 + $0x6c] sm:$0xf] }
 0x151   :  { %1331 = vmatpush1.bf16.msra.mxu1 %v1038_v59  ;;  %2813 = vmatpush1.bf16.msra.mxu0 %v1909_v14  ;;  %v10321_v5 = vpop.permute.xlu1 %1874  ;;  %v10326_v53 = vpop.permute.xlu0 %1872  ;;  %v8388_v59 = vcombine.low %v2238_v4, %v2242_v32  ;;  %v13377_v4 = vld [vmem:[#allocation4_spill] sm:$0xff] }
 0x152   :  { %1332 = vmatprep.subr.bf16.mxu1 %v1045_v48  ;;  %v338_v32 = vsel %vm333_vm0, %v13377_v4, %v13373_v1 }
 0x153   :  { %2340 = vrot.lane.b32.xlu1 %v9871_v16, %s9247_s3  ;;  %2338 = vrot.lane.b32.xlu0 %v9848_v46, %s9247_s3 }
 0x155   :  { %1333 = vmatpush1.bf16.msra.mxu1 %v1044_v61  ;;  %v10335_v34 = vpop.permute.xlu1 %1878  ;;  %v10343_v10 = vpop.permute.xlu0 %1876 }
 0x156   :  { %1377 = vmatprep.subr.bf16.mxu1 %v9871_v16 }
 0x157   :  { %2350 = vrot.lane.b32.xlu1 %v9904_v37, %s9247_s3  ;;  %2342 = vrot.lane.b32.xlu0 %v8374_v40, %s9247_s3  ;;  %v13372_v40 = vld [vmem:[#allocation5_spill] sm:$0xff] }
 0x158   :  { %1337 = vmatmul.mubr.bf16.vlgmr.msra.gmra.mrb[16].mxu1 %v10068_v45  ;;  %v339_v9 = vsel %vm333_vm0, %v13373_v1, %v13372_v40  ;;  %v2437_v1 = vld [vmem:[%s13292_s0 + $0x48] sm:$0xff] }
 0x159   :  { %1378 = vmatpush1.bf16.msra.mxu1 %v9848_v46  ;;  %v1883_v16 = vpop.permute.xlu1 %1882  ;;  %8298 = vmatprep.mubr.msk.bf16.mxu1 %vm1218_vm1, %v10075_v47  ;;  %v1881_v55 = vpop.permute.xlu0 %1880  ;;  %v2429_v46 = vld [vmem:[%s13292_s0 + $0x10] sm:$0xff]  ;;  %v2461_v37 = vmax.bf16 %v13362_v49, %v2437_v1 }
 0x15a   :  { %1379 = vmatprep.subr.bf16.mxu1 %v9926_v22  ;;  %v2453_v7 = vmax.bf16 %v13362_v49, %v2429_v46  ;;  %v1915_v48 = vsel %vm1908_vm6, %v1881_v55, %v1883_v16  ;;  %v13376_v55 = vld [vmem:[#allocation33_spill] sm:$0xff] }
 0x15b   :  { %2354 = vrot.lane.b32.xlu1 %v9926_v22, %s9247_s3  ;;  %2352 = vrot.lane.b32.xlu0 %v13371_v26, %s9247_s3  ;;  %v2438_v46 = vld [vmem:[%s13292_s0 + $0x50] sm:$0xf] }
 0x15c   :  { %v2462_v4 = vmax.bf16 %v13362_v49, %v2438_v46 }
 0x15d   :  { %1380 = vmatpush1.bf16.msra.mxu1 %v13371_v26  ;;  %v10375_v33 = vpop.permute.xlu1 %1886  ;;  %v10377_v22 = vpop.permute.xlu0 %1884  ;;  %v2454_v26 = vmax.bf16 %v13362_v49, %v2430_v63 }
 0x15e   :  { %1381 = vmatprep.subr.bf16.mxu1 %v10003_v19  ;;  %v1916_v14 = vsel %vm1908_vm6, %v1883_v16, %v10377_v22  ;;  %v10404_v16 = vcombine.high %v2453_v7, %v2457_v39 }
 0x15f   :  { %2364 = vrot.lane.b32.xlu1 %v9992_v24, %s9247_s3  ;;  %2356 = vrot.lane.b32.xlu0 %v8381_v18, %s9247_s3  ;;  %v2458_v18 = vmax.bf16 %v13362_v49, %v2434_v3  ;;  %v10434_v3 = vcombine.low %v2453_v7, %v2457_v39  ;;  %v13381_v7 = vld [vmem:[#allocation9_spill] sm:$0xff]  ;;  %v13382_v39 = vld [vmem:[#allocation8_spill] sm:$0xff] }
 0x160   :  { %2814 = vmatprep.subr.bf16.mxu0 %v1916_v14  ;;  %1347 = vmatmul.mubr.bf16.gmra.mrb[20].mxu1 %v13374_v15  ;;  %13375 = vst [vmem:[#allocation22_spill] sm:$0xff] %v10404_v16  ;;  %v351_v46 = vsel %vm333_vm0, %v13382_v39, %v13381_v7  ;;  %v13385_v7 = vld [vmem:[#allocation11_spill] sm:$0xff] }
 0x161   :  { %1382 = vmatpush1.bf16.msra.mxu1 %v9986_v20  ;;  %2815 = vmatpush1.bf16.msra.mxu0 %v1915_v48  ;;  %v10389_v61 = vpop.permute.xlu1 %1890  ;;  %v10400_v8 = vpop.permute.xlu0 %1888  ;;  %v13379_v48 = vld [vmem:[#allocation7_spill] sm:$0xff]  ;;  %13380 = vst [vmem:[#allocation5_spill] sm:$0xff] %v10434_v3  ;;  %v8395_v24 = vcombine.low %v2454_v26, %v2458_v18 }
 0x162   :  { %1383 = vmatprep.subr.bf16.mxu1 %v339_v9  ;;  %8299 = vmatprep.mubr.msk.bf16.mxu1 %vm1218_vm1, %v13376_v55  ;;  %v2441_v9 = vld [vmem:[%s13292_s0 + $0x64] sm:$0xff] }
 0x163   :  { %2370 = vrot.lane.b32.xlu1 %v8388_v59, %s9247_s3  ;;  %2368 = vrot.lane.b32.xlu0 %v10003_v19, %s9247_s3  ;;  %v13378_v59 = vld [vmem:[#allocation6_spill] sm:$0xff] }
 0x164   :  { %v345_v40 = vsel %vm333_vm0, %v13379_v48, %v13378_v59  ;;  %v344_v59 = vsel %vm333_vm0, %v9618_v12, %v13379_v48  ;;  %v350_v48 = vsel %vm333_vm0, %v9665_v36, %v13382_v39  ;;  %v570_v36 = vsel %vm565_vm2, %v9693_v56, %v13385_v7 }
 0x165   :  { %1384 = vmatpush1.bf16.msra.mxu1 %v338_v32  ;;  %v1895_v14 = vpop.permute.xlu1 %1894  ;;  %v10430_v63 = vpop.permute.xlu0 %1892  ;;  %v2466_v32 = vmax.bf16 %v13362_v49, %v2442_v28  ;;  %vm5248_vm0 = vcmask 326656  }
 0x166   :  { %1385 = vmatprep.subr.bf16.mxu1 %v345_v40  ;;  %v2465_v40 = vmax.bf16 %v13362_v49, %v2441_v9 }
 0x167   :  { %2572 = vrot.lane.b32.xlu1 %v10404_v16, %s9248_s14  ;;  %2366 = vrot.lane.b32.xlu0 %v9986_v20, %s9247_s3  ;;  %v8402_v18 = vcombine.low %v2462_v4, %v2466_v32  ;;  %v2446_v4 = vld [vmem:[%s13292_s0 + $0x88] sm:$0xf] }
 0x168   :  { %1357 = vmatmul.mubr.bf16.gmra.mrb[24].mxu1 %v10137_v0  ;;  %v10462_v1 = vcombine.high %v2461_v37, %v2465_v40  ;;  %v10483_v39 = vcombine.low %v2461_v37, %v2465_v40  ;;  %v3169_v37 = vld [vmem:[%s13292_s0] sm:$0xff] }
 0x169   :  { %1386 = vmatpush1.bf16.msra.mxu1 %v344_v59  ;;  %v10445_v52 = vpop.permute.xlu1 %1898  ;;  %v1897_v28 = vpop.permute.xlu0 %1896  ;;  %8300 = vmatprep.mubr.msk.bf16.mxu1 %vm1218_vm1, %v10147_v35  ;;  %v13384_v59 = vld [vmem:[#allocation10_spill] sm:$0xff] }
 0x16a   :  { %1387 = vmatprep.subr.bf16.mxu1 %v351_v46  ;;  %v1922_v12 = vsel %vm1908_vm6, %v1897_v28, %v10445_v52  ;;  %v1921_v26 = vsel %vm1908_vm6, %v1895_v14, %v1897_v28  ;;  %13383 = vst [vmem:[#allocation3_spill] sm:$0xff] %v10462_v1  ;;  %v571_v14 = vsel %vm565_vm2, %v13385_v7, %v13384_v59  ;;  %13386 = vst [vmem:[#allocation32_spill] sm:$0xff] %v10483_v39  ;;  %v13389_v59 = vld [vmem:[#allocation12_spill] sm:$0xff]  ;;  %v3173_v40 = vld [vmem:[%s13292_s0 + $0x1c] sm:$0xff] }
 0x16b   :  { %2570 = vrot.lane.b32.xlu1 %v10434_v3, %s9248_s14  ;;  %2574 = vrot.lane.b32.xlu0 %v8395_v24, %s9248_s14  ;;  %v2450_v24 = vld [vmem:[%s13292_s0 + $0xa4] sm:$0xf]  ;;  %v2470_v46 = vmax.bf16 %v13362_v49, %v2446_v4 }
 0x16c   :  { %2816 = vmatprep.subr.bf16.mxu0 %v1922_v12  ;;  %v2474_v28 = vmax.bf16 %v13362_v49, %v2450_v24  ;;  %v3170_v12 = vld [vmem:[%s13292_s0 + $0x8] sm:$0xff] }
 0x16d   :  { %1388 = vmatpush1.bf16.msra.mxu1 %v350_v48  ;;  %2817 = vmatpush1.bf16.msra.mxu0 %v1921_v26  ;;  %v10464_v9 = vpop.permute.xlu1 %1902  ;;  %v10475_v32 = vpop.permute.xlu0 %1900  ;;  %v3174_v26 = vld [vmem:[%s13292_s0 + $0x24] sm:$0xff]  ;;  %v13388_v48 = vld [vmem:[#allocation13_spill] sm:$0xff] }
 0x16e   :  { %1389 = vmatprep.subr.bf16.mxu1 %v571_v14  ;;  %v577_v56 = vsel %vm565_vm2, %v13389_v59, %v13388_v48  ;;  %v10510_v14 = vmax.bf16 %v13362_v49, %v3170_v12  ;;  %v10513_v4 = vmax.bf16 %v13362_v49, %v3174_v26  ;;  %v9224_v24 = vld [vmem:[%s13293_s1 + $0x4] ss:$8 sps:$4 sm:$0xff]   ;;  %v3193_v12 = vmax.bf16 %v13362_v49, %v3169_v37  ;;  %v3177_v26 = vld [vmem:[%s13292_s0 + $0x38] sm:$0xff] }
 0x16f   :  { %2588 = vrot.lane.b32.xlu1 %v8402_v18, %s9248_s14  ;;  %2586 = vrot.lane.b32.xlu0 %v10462_v1, %s9248_s14  ;;  %v3197_v48 = vmax.bf16 %v13362_v49, %v3173_v40  ;;  %v13394_v1 = vld [vmem:[#allocation15_spill] sm:$0xff]  ;;  %v13396_v40 = vld [vmem:[#allocation16_spill] sm:$0xff] }
 0x170   :  { %1367 = vmatmul.mubr.bf16.gmra.mrb[28].mxu1 %v10181_v51  ;;  %13391 = vst [vmem:[#allocation6_spill] sm:$0xff] %v10510_v14  ;;  %13392 = vst [vmem:[#allocation7_spill] sm:$0xff] %v10513_v4  ;;  %v582_v37 = vsel %vm565_vm2, %v9761_v42, %v13394_v1 }
 0x171   :  { %1390 = vmatpush1.bf16.msra.mxu1 %v570_v36  ;;  %v10493_v18 = vpop.permute.xlu1 %1906  ;;  %v10504_v7 = vpop.permute.xlu0 %1904  ;;  %8301 = vmatprep.mubr.msk.bf16.mxu1 %vm1218_vm1, %v9224_v24  ;;  %v576_v36 = vsel %vm565_vm2, %v9733_v21, %v13389_v59 }
 0x172   :  { %13387 = vst [vmem:[#allocation33_spill] sm:$0xff] %v10493_v18  ;;  %13390 = vst [vmem:[#allocation4_spill] sm:$0xff] %v10504_v7  ;;  %1391 = vmatprep.subr.bf16.mxu1 %v577_v56  ;;  %v3181_v56 = vld [vmem:[%s13292_s0 + $0x54] sm:$0xff] }
 0x173   :  { %2600 = vrot.lane.b32.xlu1 %v10003_v19, %s9248_s14  ;;  %2584 = vrot.lane.b32.xlu0 %v10483_v39, %s9248_s14  ;;  %v8409_v19 = vcombine.low %v2470_v46, %v2474_v28  ;;  %v13393_v39 = vld [vmem:[#allocation14_spill] sm:$0xff]  ;;  %v10539_v46 = vcombine.low %v10510_v14, %v10513_v4  ;;  %v3201_v28 = vmax.bf16 %v13362_v49, %v3177_v26  ;;  %v3178_v26 = vld [vmem:[%s13292_s0 + $0x40] sm:$0xff] }
 0x174   :  { %v583_v3 = vsel %vm565_vm2, %v13394_v1, %v13393_v39  ;;  %v3205_v59 = vmax.bf16 %v13362_v49, %v3181_v56  ;;  %v10547_v39 = vcombine.high %v3193_v12, %v3197_v48  ;;  %v802_v1 = vsel %vm797_vm3, %v9825_v29, %v13396_v40  ;;  %v3186_v29 = vld [vmem:[%s13292_s0 + $0x78] sm:$0xff] }
 0x175   :  { %1392 = vmatpush1.bf16.msra.mxu1 %v576_v36  ;;  %v2101_v24 = vpop.permute.xlu1 %2100  ;;  %v2099_v21 = vpop.permute.xlu0 %2098  ;;  %v10577_v14 = vmax.bf16 %v13362_v49, %v3178_v26  ;;  %v3185_v26 = vld [vmem:[%s13292_s0 + $0x70] sm:$0xff]  ;;  %vm5480_vm2 = vcmask 318464  }
 0x176   :  { %1393 = vmatprep.subr.bf16.mxu1 %v583_v3 }
 0x177   :  { %2598 = vrot.lane.b32.xlu1 %v9986_v20, %s9248_s14  ;;  %2602 = vrot.lane.b32.xlu0 %v8409_v19, %s9248_s14  ;;  %v13395_v20 = vld [vmem:[#allocation17_spill] sm:$0xff]  ;;  %v3182_v19 = vld [vmem:[%s13292_s0 + $0x5c] sm:$0xff]  ;;  %13397 = vst [vmem:[#allocation9_spill] sm:$0xff] %v10577_v14 }
 0x178   :  { %v803_v36 = vsel %vm797_vm3, %v13396_v40, %v13395_v20  ;;  %v10571_v20 = vcombine.low %v3193_v12, %v3197_v48  ;;  %v10580_v4 = vmax.bf16 %v13362_v49, %v3182_v19  ;;  %v3190_v12 = vld [vmem:[%s13292_s0 + $0x94] sm:$0xff]  ;;  %v13400_v40 = vld [vmem:[#allocation19_spill] sm:$0xff]  ;;  %v3189_v19 = vld [vmem:[%s13292_s0 + $0x8c] sm:$0xff] }
 0x179   :  { %1394 = vmatpush1.bf16.msra.mxu1 %v582_v37  ;;  %v10549_v3 = vpop.permute.xlu1 %2104  ;;  %v10560_v56 = vpop.permute.xlu0 %2102  ;;  %v10569_v37 = vcombine.high %v3201_v28, %v3205_v59 }
 0x17a   :  { %1395 = vmatprep.subr.bf16.mxu1 %v803_v36  ;;  %v2142_v42 = vsel %vm2140_vm7, %v2101_v24, %v10560_v56  ;;  %v2141_v36 = vsel %vm2140_vm7, %v2099_v21, %v2101_v24  ;;  %13398 = vst [vmem:[#allocation8_spill] sm:$0xff] %v10580_v4  ;;  %v13401_v24 = vld [vmem:[#allocation20_spill] sm:$0xff] }
 0x17b   :  { %3308 = vrot.lane.b32.xlu1 %v10539_v46, %s9249_s23  ;;  %3306 = vrot.lane.b32.xlu0 %v10547_v39, %s9249_s23  ;;  %v809_v21 = vsel %vm797_vm3, %v13401_v24, %v13400_v40  ;;  %v10609_v40 = vmax.bf16 %v13362_v49, %v3190_v12  ;;  %v808_v16 = vsel %vm797_vm3, %v9879_v11, %v13401_v24  ;;  %v13405_v12 = vld [vmem:[#allocation23_spill] sm:$0xff] }
 0x17c   :  { %2818 = vmatprep.subr.bf16.mxu0 %v2142_v42 }
 0x17d   :  { %1396 = vmatpush1.bf16.msra.mxu1 %v802_v1  ;;  %2819 = vmatpush1.bf16.msra.mxu0 %v2141_v36  ;;  %v10588_v48 = vpop.permute.xlu1 %2108  ;;  %v10599_v42 = vpop.permute.xlu0 %2106  ;;  %v10603_v1 = vcombine.low %v3201_v28, %v3205_v59  ;;  %v10606_v36 = vmax.bf16 %v13362_v49, %v3186_v29  ;;  %13403 = vst [vmem:[#allocation13_spill] sm:$0xff] %v10609_v40 }
 0x17e   :  { %13399 = vst [vmem:[#allocation10_spill] sm:$0xff] %v10588_v48  ;;  %1397 = vmatprep.subr.bf16.mxu1 %v809_v21  ;;  %v10618_v21 = vcombine.low %v10577_v14, %v10580_v4  ;;  %v3209_v28 = vmax.bf16 %v13362_v49, %v3185_v26  ;;  %v3213_v59 = vmax.bf16 %v13362_v49, %v3189_v19  ;;  %v13404_v48 = vld [vmem:[#allocation24_spill] sm:$0xff]  ;;  %v13408_v26 = vld [vmem:[#allocation27_spill] sm:$0xff] }
 0x17f   :  { %3320 = vrot.lane.b32.xlu1 %v10569_v37, %s9249_s23  ;;  %13402 = vst [vmem:[#allocation11_spill] sm:$0xff] %v10606_v36  ;;  %3304 = vrot.lane.b32.xlu0 %v10571_v20, %s9249_s23  ;;  %v815_v7 = vsel %vm797_vm3, %v13405_v12, %v13404_v48  ;;  %v10631_v11 = vcombine.low %v10606_v36, %v10609_v40 }
 0x180   :  { %v10638_v24 = vcombine.high %v3209_v28, %v3213_v59 }
 0x181   :  { %1398 = vmatpush1.bf16.msra.mxu1 %v808_v16  ;;  %v2113_v29 = vpop.permute.xlu1 %2112  ;;  %v10625_v18 = vpop.permute.xlu0 %2110  ;;  %v814_v16 = vsel %vm797_vm3, %v9965_v25, %v13405_v12  ;;  %v1034_v25 = vsel %vm1029_vm4, %v10005_v62, %v13408_v26  ;;  %v10655_v12 = vcombine.low %v3209_v28, %v3213_v59  ;;  %vm5712_vm3 = vcmask 310272  }
 0x182   :  { %13406 = vst [vmem:[#allocation12_spill] sm:$0xff] %v10625_v18  ;;  %1399 = vmatprep.subr.bf16.mxu1 %v815_v7  ;;  %v13407_v7 = vld [vmem:[#allocation26_spill] sm:$0xff] }
 0x183   :  { %3318 = vrot.lane.b32.xlu1 %v10603_v1, %s9249_s23  ;;  %3322 = vrot.lane.b32.xlu0 %v10618_v21, %s9249_s23  ;;  %v1035_v19 = vsel %vm1029_vm4, %v13408_v26, %v13407_v7  ;;  %v13409_v7 = vld [vmem:[#allocation29_spill] sm:$0xff]  ;;  %v13413_v26 = vld [vmem:[#allocation34_spill] sm:$0xff] }
 0x185   :  { %1400 = vmatpush1.bf16.msra.mxu1 %v814_v16  ;;  %v10640_v48 = vpop.permute.xlu1 %2116  ;;  %v2115_v14 = vpop.permute.xlu0 %2114 }
 0x186   :  { %1401 = vmatprep.subr.bf16.mxu1 %v1035_v19  ;;  %v2148_v36 = vsel %vm2140_vm7, %v2115_v14, %v10640_v48  ;;  %v2147_v40 = vsel %vm2140_vm7, %v2113_v29, %v2115_v14  ;;  %v13410_v19 = vld [vmem:[#allocation28_spill] sm:$0xff] }
 0x187   :  { %3336 = vrot.lane.b32.xlu1 %v10631_v11, %s9249_s23  ;;  %3334 = vrot.lane.b32.xlu0 %v10638_v24, %s9249_s23  ;;  %v1041_v4 = vsel %vm1029_vm4, %v13410_v19, %v13409_v7  ;;  %v1040_v62 = vsel %vm1029_vm4, %v10045_v50, %v13410_v19 }
 0x188   :  { %2820 = vmatprep.subr.bf16.mxu0 %v2148_v36  ;;  %v13411_v36 = vld [vmem:[#allocation30_spill] sm:$0xff] }
 0x189   :  { %1402 = vmatpush1.bf16.msra.mxu1 %v1034_v25  ;;  %2821 = vmatpush1.bf16.msra.mxu0 %v2147_v40  ;;  %v10657_v16 = vpop.permute.xlu1 %2120  ;;  %v10662_v18 = vpop.permute.xlu0 %2118  ;;  %v13412_v40 = vld [vmem:[#allocation31_spill] sm:$0xff]  ;;  %v1679_v25 = vsel %vm1675_vm5, %v13413_v26, %v10149_v43 }
 0x18a   :  { %1403 = vmatprep.subr.bf16.mxu1 %v1041_v4  ;;  %v1047_v28 = vsel %vm1029_vm4, %v13412_v40, %v13411_v36  ;;  %v1046_v50 = vsel %vm1029_vm4, %v10070_v23, %v13412_v40  ;;  %v13414_v23 = vld [vmem:[#allocation35_spill] sm:$0xff]  ;;  %vm5944_vm4 = vcmask 302080  }
 0x18b   :  { %3538 = vrot.lane.b32.xlu1 %v10547_v39, %s9250_s30  ;;  %3332 = vrot.lane.b32.xlu0 %v10655_v12, %s9249_s23 }
 0x18d   :  { %1404 = vmatpush1.bf16.msra.mxu1 %v1040_v62  ;;  %v10671_v14 = vpop.permute.xlu1 %2130  ;;  %v2129_v59 = vpop.permute.xlu0 %2128  ;;  %v1678_v62 = vsel %vm1675_vm5, %v13414_v23, %v13413_v26  ;;  %v1691_v26 = vsel %vm1675_vm5, %v10249_v27, %v10277_v41 }
 0x18e   :  { %1405 = vmatprep.subr.bf16.mxu1 %v1047_v28  ;;  %v2154_v4 = vsel %vm2140_vm7, %v2129_v59, %v10671_v14  ;;  %v1685_v28 = vsel %vm1675_vm5, %v10198_v17, %v10193_v6 }
 0x18f   :  { %3536 = vrot.lane.b32.xlu1 %v10571_v20, %s9250_s30  ;;  %3540 = vrot.lane.b32.xlu0 %v10539_v46, %s9250_s30 }
 0x190   :  { %2822 = vmatprep.subr.bf16.mxu0 %v2154_v4  ;;  %v1684_v4 = vsel %vm1675_vm5, %v10173_v13, %v10198_v17  ;;  %v1690_v13 = vsel %vm1675_vm5, %v10254_v58, %v10249_v27  ;;  %v1911_v27 = vsel %vm1908_vm6, %v10299_v54, %v10326_v53  ;;  %v1917_v54 = vsel %vm1908_vm6, %v10377_v22, %v10375_v33 }
 0x191   :  { %1406 = vmatpush1.bf16.msra.mxu1 %v1046_v50  ;;  %v2333_v29 = vpop.permute.xlu1 %2332  ;;  %v2127_v7 = vpop.permute.xlu0 %2126 }
 0x192   :  { %2879 = vmatprep.subr.bf16.mxu1 %v1679_v25  ;;  %v2153_v19 = vsel %vm2140_vm7, %v2127_v7, %v2129_v59  ;;  %v1912_v7 = vsel %vm1908_vm6, %v10326_v53, %v10321_v5 }
 0x193   :  { %3554 = vrot.lane.b32.xlu1 %v10618_v21, %s9250_s30  ;;  %3552 = vrot.lane.b32.xlu0 %v10569_v37, %s9250_s30 }
 0x194   :  { %2823 = vmatpush1.bf16.msra.mxu0 %v2153_v19  ;;  %1410 = vmatmul.mubr.bf16.vlgmr.msra.gmra.mrb[32].mxu1 %v10068_v45 }
 0x195   :  { %v2331_v36 = vpop.permute.xlu1 %2330  ;;  %2880 = vmatpush1.bf16.msra.mxu1 %v1678_v62  ;;  %v10697_v40 = vpop.permute.xlu0 %2334  ;;  %8302 = vmatprep.mubr.msk.bf16.mxu1 %vm1218_vm1, %v10075_v47 }
 0x196   :  { %v2373_v59 = vsel %vm2372_vm8, %v2331_v36, %v2333_v29  ;;  %2881 = vmatprep.subr.bf16.mxu1 %v1685_v28  ;;  %v2374_v45 = vsel %vm2372_vm8, %v2333_v29, %v10697_v40  ;;  %v1924_v28 = vsel %vm1908_vm6, %v10475_v32, %v10464_v9 }
 0x197   :  { %3566 = vrot.lane.b32.xlu1 %v10638_v24, %s9250_s30  ;;  %3550 = vrot.lane.b32.xlu0 %v10603_v1, %s9250_s30 }
 0x198   :  { %2824 = vmatprep.subr.bf16.mxu0 %v2374_v45 }
 0x199   :  { %2825 = vmatpush1.bf16.msra.mxu0 %v2373_v59  ;;  %v10714_v50 = vpop.permute.xlu1 %2348  ;;  %2882 = vmatpush1.bf16.msra.mxu1 %v1684_v4  ;;  %v2347_v47 = vpop.permute.xlu0 %2346 }
 0x19a   :  { %2883 = vmatprep.subr.bf16.mxu1 %v1691_v26  ;;  %v2380_v29 = vsel %vm2372_vm8, %v2347_v47, %v10714_v50 }
 0x19b   :  { %3564 = vrot.lane.b32.xlu1 %v10655_v12, %s9250_s30  ;;  %3568 = vrot.lane.b32.xlu0 %v10631_v11, %s9250_s30 }
 0x19c   :  { %2826 = vmatprep.subr.bf16.mxu0 %v2380_v29  ;;  %1420 = vmatmul.mubr.bf16.gmra.mrb[36].mxu1 %v13374_v15 }
 0x19d   :  { %v2361_v17 = vpop.permute.xlu1 %2360  ;;  %2884 = vmatpush1.bf16.msra.mxu1 %v1690_v13  ;;  %v2345_v25 = vpop.permute.xlu0 %2344  ;;  %8303 = vmatprep.mubr.msk.bf16.mxu1 %vm1218_vm1, %v13376_v55  ;;  %v1918_v55 = vsel %vm1908_vm6, %v10375_v33, %v10400_v8 }
 0x19e   :  { %2885 = vmatprep.subr.bf16.mxu1 %v1912_v7  ;;  %v2379_v19 = vsel %vm2372_vm8, %v2345_v25, %v2347_v47  ;;  %v2150_v47 = vsel %vm2140_vm7, %v10662_v18, %v10657_v16  ;;  %v1681_v7 = vsel %vm1675_vm5, %v10139_v44, %v10164_v38  ;;  %v1687_v38 = vsel %vm1675_vm5, %v10215_v57, %v10210_v60 }
 0x19f   :  { %3772 = vrot.lane.b32.xlu1 %v10539_v46, %s9251_s4  ;;  %3770 = vrot.lane.b32.xlu0 %v10547_v39, %s9251_s4  ;;  %v1686_v60 = vsel %vm1675_vm5, %v10193_v6, %v10215_v57  ;;  %v1692_v6 = vsel %vm1675_vm5, %v10277_v41, %v10266_v2  ;;  %v1914_v57 = vsel %vm1908_vm6, %v10343_v10, %v10335_v34 }
 0x1a0   :  { %2827 = vmatpush1.bf16.msra.mxu0 %v2379_v19  ;;  %v1913_v41 = vsel %vm1908_vm6, %v10321_v5, %v10343_v10  ;;  %v1919_v5 = vsel %vm1908_vm6, %v10400_v8, %v10389_v61  ;;  %v3172_v10 = vld [vmem:[%s13292_s0 + $0x18] sm:$0xf] }
 0x1a1   :  { %v2359_v58 = vpop.permute.xlu1 %2358  ;;  %2886 = vmatpush1.bf16.msra.mxu1 %v1911_v27  ;;  %v10742_v15 = vpop.permute.xlu0 %2362  ;;  %v10829_v27 = vld [vmem:[%s13293_s1 + $0x54] ss:$8 sps:$4 sm:$0xff]  }
 0x1a2   :  { %v2385_v23 = vsel %vm2372_vm8, %v2359_v58, %v2361_v17  ;;  %2887 = vmatprep.subr.bf16.mxu1 %v1918_v55  ;;  %v2386_v62 = vsel %vm2372_vm8, %v2361_v17, %v10742_v15  ;;  %v1680_v55 = vsel %vm1675_vm5, %v10149_v43, %v10139_v44  ;;  %v10857_v43 = vld [vmem:[%s13293_s1 + $0x50] ss:$8 sps:$4 sm:$0xff]  }
 0x1a3   :  { %3784 = vrot.lane.b32.xlu1 %v10569_v37, %s9251_s4  ;;  %3768 = vrot.lane.b32.xlu0 %v10571_v20, %s9251_s4 }
 0x1a4   :  { %2828 = vmatprep.subr.bf16.mxu0 %v2386_v62  ;;  %1430 = vmatmul.mubr.bf16.gmra.mrb[40].mxu1 %v10137_v0  ;;  %v1923_v0 = vsel %vm1908_vm6, %v10445_v52, %v10475_v32  ;;  %v2143_v52 = vsel %vm2140_vm7, %v10560_v56, %v10549_v3 }
 0x1a5   :  { %2829 = vmatpush1.bf16.msra.mxu0 %v2385_v23  ;;  %v10757_v53 = vpop.permute.xlu1 %2566  ;;  %2888 = vmatpush1.bf16.msra.mxu1 %v1917_v54  ;;  %v2565_v36 = vpop.permute.xlu0 %2564 }
 0x1a6   :  { %8304 = vmatprep.mubr.msk.bf16.mxu1 %vm1218_vm1, %v10147_v35  ;;  %2889 = vmatprep.subr.bf16.mxu1 %v1924_v28  ;;  %v2606_v33 = vsel %vm2604_vm9, %v2565_v36, %v10757_v53  ;;  %v2144_v35 = vsel %vm2140_vm7, %v10549_v3, %v10599_v42  ;;  %v2149_v3 = vsel %vm2140_vm7, %v10640_v48, %v10662_v18  ;;  %v10819_v48 = vld [vmem:[%s13293_s1 + $0x40] ss:$8 sps:$4 sm:$0xff]  }
 0x1a7   :  { %3782 = vrot.lane.b32.xlu1 %v10603_v1, %s9251_s4  ;;  %3786 = vrot.lane.b32.xlu0 %v10618_v21, %s9251_s4  ;;  %v1693_v28 = vsel %vm1675_vm5, %v10266_v2, %v10290_v30  ;;  %v10900_v2 = vld [vmem:[%s13293_s1 + $0x60] ss:$8 sps:$4 sm:$0xff]   ;;  %vm6686_vm5 = vcmask 97280  }
 0x1a8   :  { %2830 = vmatprep.subr.bf16.mxu0 %v2606_v33 }
 0x1a9   :  { %v2579_v22 = vpop.permute.xlu1 %2578  ;;  %2890 = vmatpush1.bf16.msra.mxu1 %v1923_v0  ;;  %v2563_v59 = vpop.permute.xlu0 %2562 }
 0x1aa   :  { %2891 = vmatprep.subr.bf16.mxu1 %v2144_v35  ;;  %v2605_v45 = vsel %vm2604_vm9, %v2563_v59, %v2565_v36  ;;  %v10869_v36 = vld [vmem:[%s13293_s1 + $0x64] ss:$8 sps:$4 sm:$0xff]   ;;  %v3196_v35 = vmax.bf16 %v13362_v49, %v3172_v10  ;;  %v3408_v10 = vld [vmem:[%s13292_s0 + $0x34] sm:$0xf] }
 0x1ab   :  { %3800 = vrot.lane.b32.xlu1 %v10631_v11, %s9251_s4  ;;  %3798 = vrot.lane.b32.xlu0 %v10638_v24, %s9251_s4 }
 0x1ac   :  { %2831 = vmatpush1.bf16.msra.mxu0 %v2605_v45  ;;  %1440 = vmatmul.mubr.bf16.gmra.mrb[44].mxu1 %v10181_v51  ;;  %v10950_v45 = vld [vmem:[%s13293_s1 + $0x70] ss:$8 sps:$4 sm:$0xff]  }
 0x1ad   :  { %v2577_v32 = vpop.permute.xlu1 %2576  ;;  %2892 = vmatpush1.bf16.msra.mxu1 %v2143_v52  ;;  %v10786_v4 = vpop.permute.xlu0 %2580  ;;  %8430 = vmatprep.mubr.msk.bf16.mxu1 %vm1218_vm1, %v10220_v31 }
 0x1ae   :  { %v2611_v26 = vsel %vm2604_vm9, %v2577_v32, %v2579_v22  ;;  %2893 = vmatprep.subr.bf16.mxu1 %v2150_v47  ;;  %v2612_v51 = vsel %vm2604_vm9, %v2579_v22, %v10786_v4  ;;  %v3180_v47 = vld [vmem:[%s13292_s0 + $0x50] sm:$0xf] }
 0x1af   :  { %4002 = vrot.lane.b32.xlu1 %v10547_v39, %s9252_s5  ;;  %3796 = vrot.lane.b32.xlu0 %v10655_v12, %s9251_s4 }
 0x1b0   :  { %2832 = vmatprep.subr.bf16.mxu0 %v2612_v51  ;;  %v13418_v51 = vld [vmem:[#allocation10_spill] sm:$0xff] }
 0x1b1   :  { %2833 = vmatpush1.bf16.msra.mxu0 %v2611_v26  ;;  %v10803_v56 = vpop.permute.xlu1 %2594  ;;  %2894 = vmatpush1.bf16.msra.mxu1 %v2149_v3  ;;  %v2593_v29 = vpop.permute.xlu0 %2592  ;;  %v3184_v26 = vld [vmem:[%s13292_s0 + $0x6c] sm:$0xf] }
 0x1b2   :  { %v2618_v13 = vsel %vm2604_vm9, %v2593_v29, %v10803_v56 }
 0x1b3   :  { %4000 = vrot.lane.b32.xlu1 %v10571_v20, %s9252_s5  ;;  %4004 = vrot.lane.b32.xlu0 %v10539_v46, %s9252_s5 }
 0x1b4   :  { %2834 = vmatprep.subr.bf16.mxu0 %v2618_v13  ;;  %v3204_v13 = vmax.bf16 %v13362_v49, %v3180_v47  ;;  %v3411_v47 = vld [vmem:[%s13292_s0 + $0x48] sm:$0xff] }
 0x1b5   :  { %v10811_v17 = vpop.permute.xlu1 %2122  ;;  %v2591_v25 = vpop.permute.xlu0 %2590 }
 0x1b6   :  { %v2617_v18 = vsel %vm2604_vm9, %v2591_v25, %v2593_v29  ;;  %v3208_v25 = vmax.bf16 %v13362_v49, %v3184_v26  ;;  %v3415_v26 = vld [vmem:[%s13292_s0 + $0x64] sm:$0xff] }
 0x1b7   :  { %4018 = vrot.lane.b32.xlu1 %v10618_v21, %s9252_s5  ;;  %4016 = vrot.lane.b32.xlu0 %v10569_v37, %s9252_s5 }
 0x1b8   :  { %2835 = vmatpush1.bf16.msra.mxu0 %v2617_v18  ;;  %v2145_v18 = vsel %vm2140_vm7, %v10599_v42, %v13418_v51 }
 0x1b9   :  { %2952 = vmatprep.subr.bf16.mxu0 %v1681_v7  ;;  %v2133_v19 = vpop.permute.xlu1 %2132  ;;  %v10831_v58 = vpop.permute.xlu0 %2124 }
 0x1ba   :  { %v2155_v54 = vsel %vm2140_vm7, %v10671_v14, %v2133_v19  ;;  %v1920_v14 = vsel %vm1908_vm6, %v10389_v61, %v10430_v63  ;;  %v13415_v63 = vld [vmem:[#allocation33_spill] sm:$0xff] }
 0x1bb   :  { %4030 = vrot.lane.b32.xlu1 %v10638_v24, %s9252_s5  ;;  %2839 = vmatmul.mubr.bf16.vlgmr.msra.gmra.mrb[0].mxu0 %v10819_v48 }
 0x1bc   :  { %4014 = vrot.lane.b32.xlu0 %v10603_v1, %s9252_s5  ;;  %2953 = vmatpush1.bf16.msra.mxu0 %v1680_v55  ;;  %v3191_v55 = vld [vmem:[%s13292_s0 + $0x9c] sm:$0xff] }
 0x1bd   :  { %2954 = vmatprep.subr.bf16.mxu0 %v1687_v38  ;;  %v10844_v23 = vpop.permute.xlu1 %2136  ;;  %8427 = vmatprep.mubr.msk.bf16.mxu0 %vm1218_vm1, %v10829_v27  ;;  %v10848_v62 = vpop.permute.xlu0 %2134 }
 0x1be   :  { %v2156_v44 = vsel %vm2140_vm7, %v2133_v19, %v10848_v62  ;;  %v3187_v19 = vld [vmem:[%s13292_s0 + $0x80] sm:$0xff] }
 0x1bf   :  { %4028 = vrot.lane.b32.xlu1 %v10655_v12, %s9252_s5  ;;  %2895 = vmatprep.subr.bf16.mxu1 %v2156_v44  ;;  %v13420_v44 = vld [vmem:[#allocation5_spill] sm:$0xff] }
 0x1c0   :  { %4032 = vrot.lane.b32.xlu0 %v10631_v11, %s9252_s5  ;;  %2955 = vmatpush1.bf16.msra.mxu0 %v1686_v60  ;;  %v8451_v60 = vcombine.low %v3204_v13, %v3208_v25 }
 0x1c1   :  { %2896 = vmatpush1.bf16.msra.mxu1 %v2155_v54  ;;  %v2337_v33 = vpop.permute.xlu1 %2336  ;;  %2956 = vmatprep.subr.bf16.mxu0 %v1693_v28  ;;  %v10874_v0 = vpop.permute.xlu0 %2138  ;;  %v3211_v54 = vmax.bf16 %v13362_v49, %v3187_v19  ;;  %v3215_v28 = vmax.bf16 %v13362_v49, %v3191_v55 }
 0x1c2   :  { %v2375_v34 = vsel %vm2372_vm8, %v10697_v40, %v2337_v33  ;;  %v13416_v40 = vld [vmem:[#allocation4_spill] sm:$0xff] }
 0x1c3   :  { %4236 = vrot.lane.b32.xlu1 %v10539_v46, %s9253_s16  ;;  %2849 = vmatmul.mubr.bf16.gmra.mrb[4].mxu0 %v10857_v43  ;;  %v1925_v52 = vsel %vm1908_vm6, %v10464_v9, %v13416_v40 }
 0x1c4   :  { %4234 = vrot.lane.b32.xlu0 %v10547_v39, %s9253_s16  ;;  %8428 = vmatprep.mubr.msk.bf16.mxu0 %vm1218_vm1, %v10869_v36 }
 0x1c5   :  { %2957 = vmatpush1.bf16.msra.mxu0 %v1692_v6  ;;  %v10889_v30 = vpop.permute.xlu1 %2340  ;;  %v10891_v46 = vpop.permute.xlu0 %2338 }
 0x1c6   :  { %2958 = vmatprep.subr.bf16.mxu0 %v1914_v57  ;;  %v2376_v39 = vsel %vm2372_vm8, %v2337_v33, %v10891_v46  ;;  %v2158_v33 = vsel %vm2140_vm7, %v10844_v23, %v10874_v0  ;;  %v3192_v57 = vld [vmem:[%s13292_s0 + $0xa4] sm:$0xf]  ;;  %v2157_v0 = vsel %vm2140_vm7, %v10848_v62, %v10844_v23  ;;  %v3407_v62 = vld [vmem:[%s13292_s0 + $0x2c] sm:$0xff] }
 0x1c7   :  { %4248 = vrot.lane.b32.xlu1 %v10569_v37, %s9253_s16  ;;  %2897 = vmatprep.subr.bf16.mxu1 %v2376_v39  ;;  %v10912_v37 = vld [vmem:[%s13293_s1 + $0x74] ss:$8 sps:$4 sm:$0xff]  }
 0x1c8   :  { %4232 = vrot.lane.b32.xlu0 %v10571_v20, %s9253_s16  ;;  %2898 = vmatpush1.bf16.msra.mxu1 %v2375_v34  ;;  %v13421_v34 = vld [vmem:[#allocation3_spill] sm:$0xff] }
 0x1c9   :  { %2959 = vmatpush1.bf16.msra.mxu0 %v1913_v41  ;;  %v2351_v20 = vpop.permute.xlu1 %2350  ;;  %v10917_v22 = vpop.permute.xlu0 %2342 }
 0x1ca   :  { %2960 = vmatprep.subr.bf16.mxu0 %v1920_v14 }
 0x1cb   :  { %4246 = vrot.lane.b32.xlu1 %v10603_v1, %s9253_s16  ;;  %2859 = vmatmul.mubr.bf16.gmra.mrb[8].mxu0 %v10900_v2  ;;  %v1926_v1 = vsel %vm1908_vm6, %v13416_v40, %v13415_v63  ;;  %v2378_v63 = vsel %vm2372_vm8, %v10889_v30, %v10917_v22  ;;  %v3432_v22 = vmax.bf16 %v13362_v49, %v3408_v10  ;;  %v3640_v10 = vld [vmem:[%s13292_s0 + $0x34] sm:$0xf]  ;;  %vm6918_vm6 = vcmask 89088  }
 0x1cc   :  { %4250 = vrot.lane.b32.xlu0 %v10618_v21, %s9253_s16  ;;  %8429 = vmatprep.mubr.msk.bf16.mxu0 %vm1218_vm1, %v10912_v37  ;;  %v3176_v21 = vld [vmem:[%s13292_s0 + $0x34] sm:$0xf] }
 0x1cd   :  { %2961 = vmatpush1.bf16.msra.mxu0 %v1919_v5  ;;  %v10935_v59 = vpop.permute.xlu1 %2354  ;;  %v10940_v61 = vpop.permute.xlu0 %2352  ;;  %v3200_v32 = vmax.bf16 %v13362_v49, %v3176_v21  ;;  %v3404_v5 = vld [vmem:[%s13292_s0 + $0x18] sm:$0xf] }
 0x1ce   :  { %2962 = vmatprep.subr.bf16.mxu0 %v1926_v1  ;;  %v2382_v8 = vsel %vm2372_vm8, %v2351_v20, %v10940_v61  ;;  %v11043_v1 = vcombine.low %v3211_v54, %v3215_v28  ;;  %v3428_v21 = vmax.bf16 %v13362_v49, %v3404_v5  ;;  %v3636_v5 = vld [vmem:[%s13292_s0 + $0x18] sm:$0xf] }
 0x1cf   :  { %4264 = vrot.lane.b32.xlu1 %v10631_v11, %s9253_s16  ;;  %2899 = vmatprep.subr.bf16.mxu1 %v2382_v8  ;;  %v2381_v11 = vsel %vm2372_vm8, %v10714_v50, %v2351_v20  ;;  %v13419_v50 = vld [vmem:[#allocation22_spill] sm:$0xff]  ;;  %v8444_v7 = vcombine.low %v3196_v35, %v3200_v32  ;;  %v3216_v20 = vmax.bf16 %v13362_v49, %v3192_v57  ;;  %v13422_v8 = vld [vmem:[#allocation32_spill] sm:$0xff] }
 0x1d0   :  { %4262 = vrot.lane.b32.xlu0 %v10638_v24, %s9253_s16  ;;  %2900 = vmatpush1.bf16.msra.mxu1 %v2381_v11  ;;  %v13417_v24 = vld [vmem:[#allocation12_spill] sm:$0xff]  ;;  %v2377_v35 = vsel %vm2372_vm8, %v10891_v46, %v10889_v30  ;;  %v3431_v32 = vmax.bf16 %v13362_v49, %v3407_v62  ;;  %v8465_v46 = vcombine.low %v3428_v21, %v3432_v22  ;;  %v3644_v21 = vld [vmem:[%s13292_s0 + $0x50] sm:$0xf] }
 0x1d1   :  { %2963 = vmatpush1.bf16.msra.mxu0 %v1925_v52  ;;  %v2146_v3 = vsel %vm2140_vm7, %v13418_v51, %v13417_v24  ;;  %v2365_v9 = vpop.permute.xlu1 %2364  ;;  %v2357_v29 = vpop.permute.xlu0 %2356  ;;  %v3660_v62 = vmax.bf16 %v13362_v49, %v3636_v5  ;;  %v3648_v22 = vld [vmem:[%s13292_s0 + $0x6c] sm:$0xf] }
 0x1d2   :  { %2964 = vmatprep.subr.bf16.mxu0 %v2146_v3  ;;  %v2387_v14 = vsel %vm2372_vm8, %v10742_v15, %v2365_v9  ;;  %v3403_v15 = vld [vmem:[%s13292_s0 + $0x10] sm:$0xff]  ;;  %v2384_v24 = vsel %vm2372_vm8, %v10935_v59, %v2357_v29  ;;  %v3435_v3 = vmax.bf16 %v13362_v49, %v3411_v47  ;;  %v3672_v47 = vmax.bf16 %v13362_v49, %v3648_v22  ;;  %v11238_v22 = vld [vmem:[%s13293_s1 + $0x84] ss:$8 sps:$4 sm:$0xff]  }
 0x1d3   :  { %3314 = vrot.lane.b32.xlu1 %v13419_v50, %s9249_s23  ;;  %2869 = vmatmul.mubr.bf16.gmra.mrb[12].mxu0 %v10950_v45  ;;  %v3427_v11 = vmax.bf16 %v13362_v49, %v3403_v15  ;;  %v2383_v50 = vsel %vm2372_vm8, %v10940_v61, %v10935_v59 }
 0x1d4   :  { %4260 = vrot.lane.b32.xlu0 %v10655_v12, %s9253_s16  ;;  %8434 = vmatprep.mubr.msk.bf16.mxu0 %vm1218_vm1, %v10220_v31  ;;  %v2152_v12 = vsel %vm2140_vm7, %v10811_v17, %v10831_v58  ;;  %v2151_v31 = vsel %vm2140_vm7, %v10657_v16, %v10811_v17  ;;  %v3188_v58 = vld [vmem:[%s13292_s0 + $0x88] sm:$0xf]  ;;  %v11013_v17 = vcombine.high %v3211_v54, %v3215_v28  ;;  %vm7150_vm7 = vcmask 80896  }
 0x1d5   :  { %2965 = vmatpush1.bf16.msra.mxu0 %v2145_v18  ;;  %v2371_v38 = vpop.permute.xlu1 %2370  ;;  %v10990_v42 = vpop.permute.xlu0 %2368  ;;  %v3212_v41 = vmax.bf16 %v13362_v49, %v3188_v58  ;;  %v11070_v13 = vcombine.high %v3427_v11, %v3431_v32  ;;  %v3412_v18 = vld [vmem:[%s13292_s0 + $0x50] sm:$0xf]  ;;  %v11089_v55 = vcombine.low %v3427_v11, %v3431_v32  ;;  %v3668_v32 = vmax.bf16 %v13362_v49, %v3644_v21 }
 0x1d6   :  { %2966 = vmatprep.subr.bf16.mxu0 %v2152_v12  ;;  %v2390_v29 = vsel %vm2372_vm8, %v10990_v42, %v2371_v38  ;;  %v3436_v12 = vmax.bf16 %v13362_v49, %v3412_v18 }
 0x1d7   :  { %3312 = vrot.lane.b32.xlu1 %v13420_v44, %s9249_s23  ;;  %v8458_v52 = vcombine.low %v3212_v41, %v3216_v20  ;;  %v3420_v44 = vld [vmem:[%s13292_s0 + $0x88] sm:$0xf] }
 0x1d8   :  { %3316 = vrot.lane.b32.xlu0 %v8444_v7, %s9249_s23  ;;  %v3416_v7 = vld [vmem:[%s13292_s0 + $0x6c] sm:$0xf]  ;;  %v3444_v58 = vmax.bf16 %v13362_v49, %v3420_v44 }
 0x1d9   :  { %2967 = vmatpush1.bf16.msra.mxu0 %v2151_v31  ;;  %v11006_v6 = vpop.permute.xlu1 %2572  ;;  %v2367_v39 = vpop.permute.xlu0 %2366  ;;  %v3440_v38 = vmax.bf16 %v13362_v49, %v3416_v7 }
 0x1da   :  { %2968 = vmatprep.subr.bf16.mxu0 %v2158_v33  ;;  %v2388_v16 = vsel %vm2372_vm8, %v2365_v9, %v2367_v39  ;;  %v3439_v9 = vmax.bf16 %v13362_v49, %v3415_v26  ;;  %v2389_v61 = vsel %vm2372_vm8, %v2367_v39, %v10990_v42  ;;  %vm7382_vm8 = vcmask 72704  }
 0x1db   :  { %3330 = vrot.lane.b32.xlu1 %v8451_v60, %s9249_s23  ;;  %2901 = vmatprep.subr.bf16.mxu1 %v2388_v16  ;;  %v3424_v60 = vld [vmem:[%s13292_s0 + $0xa4] sm:$0xf]  ;;  %v8472_v39 = vcombine.low %v3436_v12, %v3440_v38  ;;  %v3872_v12 = vld [vmem:[%s13292_s0 + $0x34] sm:$0xf] }
 0x1dc   :  { %3328 = vrot.lane.b32.xlu0 %v13421_v34, %s9249_s23  ;;  %2902 = vmatpush1.bf16.msra.mxu1 %v2387_v14  ;;  %v11083_v59 = vcombine.high %v3435_v3, %v3439_v9  ;;  %v11105_v31 = vcombine.low %v3435_v3, %v3439_v9  ;;  %v3448_v33 = vmax.bf16 %v13362_v49, %v3424_v60 }
 0x1dd   :  { %2969 = vmatpush1.bf16.msra.mxu0 %v2157_v0  ;;  %v11033_v23 = vpop.permute.xlu1 %2570  ;;  %v2575_v40 = vpop.permute.xlu0 %2574  ;;  %v8493_v3 = vcombine.low %v3668_v32, %v3672_v47 }
 0x1de   :  { %2970 = vmatprep.subr.bf16.mxu0 %v2378_v63  ;;  %v2610_v54 = vsel %vm2604_vm9, %v11006_v6, %v2575_v40  ;;  %v2609_v57 = vsel %vm2604_vm9, %v11033_v23, %v11006_v6  ;;  %v8479_v0 = vcombine.low %v3444_v58, %v3448_v33  ;;  %v3664_v40 = vmax.bf16 %v13362_v49, %v3640_v10 }
 0x1df   :  { %3342 = vrot.lane.b32.xlu1 %v11013_v17, %s9249_s23  ;;  %v3896_v58 = vmax.bf16 %v13362_v49, %v3872_v12 }
 0x1e0   :  { %3326 = vrot.lane.b32.xlu0 %v13422_v8, %s9249_s23 }
 0x1e1   :  { %2971 = vmatpush1.bf16.msra.mxu0 %v2377_v35  ;;  %v2589_v51 = vpop.permute.xlu1 %2588  ;;  %v2587_v30 = vpop.permute.xlu0 %2586 }
 0x1e2   :  { %2972 = vmatprep.subr.bf16.mxu0 %v2384_v24  ;;  %v2616_v16 = vsel %vm2604_vm9, %v2587_v30, %v2589_v51  ;;  %v8486_v24 = vcombine.low %v3660_v62, %v3664_v40 }
 0x1e3   :  { %3340 = vrot.lane.b32.xlu1 %v11043_v1, %s9249_s23 }
 0x1e4   :  { %3344 = vrot.lane.b32.xlu0 %v8458_v52, %s9249_s23 }
 0x1e5   :  { %2973 = vmatpush1.bf16.msra.mxu0 %v2383_v50  ;;  %v2601_v25 = vpop.permute.xlu1 %2600  ;;  %v11080_v19 = vpop.permute.xlu0 %2584  ;;  %v3652_v50 = vld [vmem:[%s13292_s0 + $0x88] sm:$0xf] }
 0x1e6   :  { %2974 = vmatprep.subr.bf16.mxu0 %v2390_v29  ;;  %v2615_v14 = vsel %vm2604_vm9, %v11080_v19, %v2587_v30  ;;  %v3676_v18 = vmax.bf16 %v13362_v49, %v3652_v50 }
 0x1e7   :  { %3548 = vrot.lane.b32.xlu1 %v8465_v46, %s9250_s30 }
 0x1e8   :  { %3546 = vrot.lane.b32.xlu0 %v11070_v13, %s9250_s30 }
 0x1e9   :  { %2975 = vmatpush1.bf16.msra.mxu0 %v2389_v61  ;;  %v11101_v28 = vpop.permute.xlu1 %2598  ;;  %v2603_v42 = vpop.permute.xlu0 %2602  ;;  %v3868_v61 = vld [vmem:[%s13292_s0 + $0x18] sm:$0xf] }
 0x1ea   :  { %2976 = vmatprep.subr.bf16.mxu0 %v2610_v54  ;;  %v2622_v6 = vsel %vm2604_vm9, %v2601_v25, %v2603_v42  ;;  %v2621_v15 = vsel %vm2604_vm9, %v11101_v28, %v2601_v25  ;;  %v3892_v42 = vmax.bf16 %v13362_v49, %v3868_v61  ;;  %v4112_v61 = vld [vmem:[%s13292_s0 + $0x6c] sm:$0xf] }
 0x1eb   :  { %3560 = vrot.lane.b32.xlu1 %v11083_v59, %s9250_s30 }
 0x1ec   :  { %3544 = vrot.lane.b32.xlu0 %v11089_v55, %s9250_s30 }
 0x1ed   :  { %2977 = vmatpush1.bf16.msra.mxu0 %v2609_v57  ;;  %v11115_v41 = vpop.permute.xlu1 %3308  ;;  %v3307_v34 = vpop.permute.xlu0 %3306 }
 0x1ee   :  { %2978 = vmatprep.subr.bf16.mxu0 %v2616_v16  ;;  %v3348_v8 = vsel %vm3346_vm10, %v3307_v34, %v11115_v41 }
 0x1ef   :  { %3558 = vrot.lane.b32.xlu1 %v11105_v31, %s9250_s30 }
 0x1f0   :  { %3562 = vrot.lane.b32.xlu0 %v8472_v39, %s9250_s30  ;;  %v8507_v39 = vcombine.low %v3892_v42, %v3896_v58  ;;  %v4136_v42 = vmax.bf16 %v13362_v49, %v4112_v61  ;;  %v4847_v61 = vld [vmem:[%s13292_s0 + $0x38] sm:$0xff] }
 0x1f1   :  { %2979 = vmatpush1.bf16.msra.mxu0 %v2615_v14  ;;  %v3321_v20 = vpop.permute.xlu1 %3320  ;;  %v3305_v63 = vpop.permute.xlu0 %3304 }
 0x1f2   :  { %2980 = vmatprep.subr.bf16.mxu0 %v2622_v6  ;;  %v3347_v26 = vsel %vm3346_vm10, %v3305_v63, %v3307_v34  ;;  %v3876_v34 = vld [vmem:[%s13292_s0 + $0x50] sm:$0xf] }
 0x1f3   :  { %3576 = vrot.lane.b32.xlu1 %v8479_v0, %s9250_s30  ;;  %v3880_v0 = vld [vmem:[%s13292_s0 + $0x6c] sm:$0xf] }
 0x1f4   :  { %3574 = vrot.lane.b32.xlu0 %v11013_v17, %s9250_s30  ;;  %v3904_v5 = vmax.bf16 %v13362_v49, %v3880_v0 }
 0x1f5   :  { %2981 = vmatpush1.bf16.msra.mxu0 %v2621_v15  ;;  %v3319_v35 = vpop.permute.xlu1 %3318  ;;  %v11144_v52 = vpop.permute.xlu0 %3322 }
 0x1f6   :  { %4476 = vmatprep.subr.bf16.mxu0 %v3348_v8  ;;  %v3354_v11 = vsel %vm3346_vm10, %v3321_v20, %v11144_v52  ;;  %v3353_v9 = vsel %vm3346_vm10, %v3319_v35, %v3321_v20  ;;  %v3900_v20 = vmax.bf16 %v13362_v49, %v3876_v34 }
 0x1f7   :  { %3778 = vrot.lane.b32.xlu1 %v11070_v13, %s9251_s4 }
 0x1f8   :  { %3572 = vrot.lane.b32.xlu0 %v11043_v1, %s9250_s30  ;;  %2985 = vmatmul.mubr.bf16.vlgmr.msra.gmra.mrb[16].mxu0 %v10819_v48  ;;  %v8514_v8 = vcombine.low %v3900_v20, %v3904_v5 }
 0x1f9   :  { %4477 = vmatpush1.bf16.msra.mxu0 %v3347_v26  ;;  %v11156_v51 = vpop.permute.xlu1 %3336  ;;  %8435 = vmatprep.mubr.msk.bf16.mxu0 %vm1218_vm1, %v10829_v27  ;;  %v3335_v30 = vpop.permute.xlu0 %3334  ;;  %v3656_v27 = vld [vmem:[%s13292_s0 + $0xa4] sm:$0xf]  ;;  %v4100_v26 = vld [vmem:[%s13292_s0 + $0x18] sm:$0xf] }
 0x1fa   :  { %4478 = vmatprep.subr.bf16.mxu0 %v3354_v11  ;;  %v3360_v46 = vsel %vm3346_vm10, %v3335_v30, %v11156_v51  ;;  %v3680_v7 = vmax.bf16 %v13362_v49, %v3656_v27 }
 0x1fb   :  { %3776 = vrot.lane.b32.xlu1 %v11089_v55, %s9251_s4 }
 0x1fc   :  { %3780 = vrot.lane.b32.xlu0 %v8486_v24, %s9251_s4 }
 0x1fd   :  { %4479 = vmatpush1.bf16.msra.mxu0 %v3353_v9  ;;  %v3539_v48 = vpop.permute.xlu1 %3538  ;;  %v3333_v29 = vpop.permute.xlu0 %3332 }
 0x1fe   :  { %4480 = vmatprep.subr.bf16.mxu0 %v3360_v46  ;;  %v3359_v25 = vsel %vm3346_vm10, %v3333_v29, %v3335_v30  ;;  %v13423_v29 = vld [vmem:[#allocation18_spill] sm:$0xff] }
 0x1ff   :  { %3794 = vrot.lane.b32.xlu1 %v8493_v3, %s9251_s4  ;;  %v4124_v3 = vmax.bf16 %v13362_v49, %v4100_v26 }
 0x200   :  { %3792 = vrot.lane.b32.xlu0 %v11083_v59, %s9251_s4  ;;  %2995 = vmatmul.mubr.bf16.gmra.mrb[20].mxu0 %v10857_v43  ;;  %v8500_v43 = vcombine.low %v3676_v18, %v3680_v7  ;;  %v4108_v7 = vld [vmem:[%s13292_s0 + $0x50] sm:$0xf] }
 0x201   :  { %4481 = vmatpush1.bf16.msra.mxu0 %v3359_v25  ;;  %v3537_v38 = vpop.permute.xlu1 %3536  ;;  %8436 = vmatprep.mubr.msk.bf16.mxu0 %vm1218_vm1, %v10869_v36  ;;  %v11188_v60 = vpop.permute.xlu0 %3540 }
 0x202   :  { %v3579_v44 = vsel %vm3578_vm11, %v3537_v38, %v3539_v48  ;;  %v3580_v54 = vsel %vm3578_vm11, %v3539_v48, %v11188_v60 }
 0x203   :  { %3806 = vrot.lane.b32.xlu1 %v11013_v17, %s9251_s4  ;;  %4482 = vmatprep.subr.bf16.mxu0 %v3580_v54  ;;  %v4132_v54 = vmax.bf16 %v13362_v49, %v4108_v7 }
 0x204   :  { %3790 = vrot.lane.b32.xlu0 %v11105_v31, %s9251_s4 }
 0x205   :  { %4483 = vmatpush1.bf16.msra.mxu0 %v3579_v44  ;;  %v11198_v36 = vpop.permute.xlu1 %3554  ;;  %v3553_v33 = vpop.permute.xlu0 %3552 }
 0x206   :  { %v3586_v57 = vsel %vm3578_vm11, %v3553_v33, %v11198_v36 }
 0x207   :  { %3804 = vrot.lane.b32.xlu1 %v11043_v1, %s9251_s4  ;;  %4484 = vmatprep.subr.bf16.mxu0 %v3586_v57  ;;  %v13424_v57 = vld [vmem:[#allocation21_spill] sm:$0xff] }
 0x208   :  { %3808 = vrot.lane.b32.xlu0 %v8500_v43, %s9251_s4  ;;  %3005 = vmatmul.mubr.bf16.gmra.mrb[24].mxu0 %v10900_v2  ;;  %v3884_v2 = vld [vmem:[%s13292_s0 + $0x88] sm:$0xf] }
 0x209   :  { %v3567_v16 = vpop.permute.xlu1 %3566  ;;  %v3551_v14 = vpop.permute.xlu0 %3550  ;;  %8437 = vmatprep.mubr.msk.bf16.mxu0 %vm1218_vm1, %v10912_v37  ;;  %v3888_v37 = vld [vmem:[%s13292_s0 + $0xa4] sm:$0xf]  ;;  %v3908_v40 = vmax.bf16 %v13362_v49, %v3884_v2 }
 0x20a   :  { %v3585_v6 = vsel %vm3578_vm11, %v3551_v14, %v3553_v33  ;;  %v3912_v21 = vmax.bf16 %v13362_v49, %v3888_v37  ;;  %v13425_v37 = vld [vmem:[#allocation25_spill] sm:$0xff] }
 0x20b   :  { %4012 = vrot.lane.b32.xlu1 %v8507_v39, %s9252_s5  ;;  %4485 = vmatpush1.bf16.msra.mxu0 %v3585_v6  ;;  %v8535_v39 = vcombine.low %v4132_v54, %v4136_v42  ;;  %v13430_v54 = vld [vmem:[#allocation8_spill] sm:$0xff]  ;;  %v13431_v42 = vld [vmem:[#allocation9_spill] sm:$0xff] }
 0x20c   :  { %4010 = vrot.lane.b32.xlu0 %v11070_v13, %s9252_s5  ;;  %v8521_v47 = vcombine.low %v3908_v40, %v3912_v21  ;;  %v4839_v21 = vld [vmem:[%s13292_s0] sm:$0xff] }
 0x20d   :  { %v3565_v10 = vpop.permute.xlu1 %3564  ;;  %v11227_v15 = vpop.permute.xlu0 %3568 }
 0x20e   :  { %v3591_v63 = vsel %vm3578_vm11, %v3565_v10, %v3567_v16  ;;  %v3592_v62 = vsel %vm3578_vm11, %v3567_v16, %v11227_v15  ;;  %v4116_v16 = vld [vmem:[%s13292_s0 + $0x88] sm:$0xf] }
 0x20f   :  { %4024 = vrot.lane.b32.xlu1 %v11083_v59, %s9252_s5  ;;  %4486 = vmatprep.subr.bf16.mxu0 %v3592_v62  ;;  %v4844_v62 = vld [vmem:[%s13292_s0 + $0x24] sm:$0xff] }
 0x210   :  { %4008 = vrot.lane.b32.xlu0 %v11089_v55, %s9252_s5  ;;  %4487 = vmatpush1.bf16.msra.mxu0 %v3591_v63 }
 0x211   :  { %v11242_v35 = vpop.permute.xlu1 %3772  ;;  %v3771_v11 = vpop.permute.xlu0 %3770  ;;  %3015 = vmatmul.mubr.bf16.gmra.mrb[28].mxu0 %v10950_v45  ;;  %v4104_v45 = vld [vmem:[%s13292_s0 + $0x34] sm:$0xf] }
 0x212   :  { %v3812_v32 = vsel %vm3810_vm12, %v3771_v11, %v11242_v35  ;;  %8559 = vmatprep.mubr.msk.bf16.mxu0 %vm1218_vm1, %v11238_v22  ;;  %v4128_v9 = vmax.bf16 %v13362_v49, %v4104_v45 }
 0x213   :  { %4022 = vrot.lane.b32.xlu1 %v11105_v31, %s9252_s5  ;;  %4488 = vmatprep.subr.bf16.mxu0 %v3812_v32  ;;  %v13426_v32 = vld [vmem:[#allocation7_spill] sm:$0xff] }
 0x214   :  { %4026 = vrot.lane.b32.xlu0 %v8514_v8, %s9252_s5  ;;  %v8528_v18 = vcombine.low %v4124_v3, %v4128_v9  ;;  %v4843_v8 = vld [vmem:[%s13292_s0 + $0x1c] sm:$0xff] }
 0x215   :  { %v3785_v24 = vpop.permute.xlu1 %3784  ;;  %v3769_v30 = vpop.permute.xlu0 %3768 }
 0x216   :  { %v3811_v46 = vsel %vm3810_vm12, %v3769_v30, %v3771_v11  ;;  %v4863_v30 = vmax.bf16 %v13362_v49, %v4839_v21  ;;  %v13433_v21 = vld [vmem:[#allocation13_spill] sm:$0xff] }
 0x217   :  { %4040 = vrot.lane.b32.xlu1 %v8521_v47, %s9252_s5  ;;  %4489 = vmatpush1.bf16.msra.mxu0 %v3811_v46  ;;  %v13427_v47 = vld [vmem:[#allocation6_spill] sm:$0xff]  ;;  %v4867_v46 = vmax.bf16 %v13362_v49, %v4843_v8  ;;  %v13434_v8 = vld [vmem:[#allocation11_spill] sm:$0xff] }
 0x218   :  { %4038 = vrot.lane.b32.xlu0 %v11013_v17, %s9252_s5  ;;  %v11333_v26 = vcombine.high %v13427_v47, %v13426_v32 }
 0x219   :  { %v3783_v48 = vpop.permute.xlu1 %3782  ;;  %v11265_v27 = vpop.permute.xlu0 %3786 }
 0x21a   :  { %v3817_v50 = vsel %vm3810_vm12, %v3783_v48, %v3785_v24  ;;  %v3818_v25 = vsel %vm3810_vm12, %v3785_v24, %v11265_v27  ;;  %v11339_v24 = vmax.bf16 %v13362_v49, %v4844_v62 }
 0x21b   :  { %2568 = vrot.lane.b32.xlu1 %v13423_v29, %s9248_s14  ;;  %4490 = vmatprep.subr.bf16.mxu0 %v3818_v25  ;;  %v4848_v25 = vld [vmem:[%s13292_s0 + $0x40] sm:$0xff] }
 0x21c   :  { %4036 = vrot.lane.b32.xlu0 %v11043_v1, %s9252_s5  ;;  %4491 = vmatpush1.bf16.msra.mxu0 %v3817_v50 }
 0x21d   :  { %v11279_v12 = vpop.permute.xlu1 %3800  ;;  %v3799_v38 = vpop.permute.xlu0 %3798 }
 0x21e   :  { %v3824_v44 = vsel %vm3810_vm12, %v3799_v38, %v11279_v12 }
 0x21f   :  { %4244 = vrot.lane.b32.xlu1 %v8528_v18, %s9253_s16  ;;  %4492 = vmatprep.subr.bf16.mxu0 %v3824_v44  ;;  %v4852_v18 = vld [vmem:[%s13292_s0 + $0x5c] sm:$0xff] }
 0x220   :  { %4242 = vrot.lane.b32.xlu0 %v11070_v13, %s9253_s16  ;;  %v4120_v13 = vld [vmem:[%s13292_s0 + $0xa4] sm:$0xf] }
 0x221   :  { %v4003_v58 = vpop.permute.xlu1 %4002  ;;  %v3797_v43 = vpop.permute.xlu0 %3796  ;;  %v4144_v20 = vmax.bf16 %v13362_v49, %v4120_v13 }
 0x222   :  { %v3823_v33 = vsel %vm3810_vm12, %v3797_v43, %v3799_v38  ;;  %v11383_v43 = vmax.bf16 %v13362_v49, %v4848_v25 }
 0x223   :  { %2582 = vrot.lane.b32.xlu1 %v13424_v57, %s9248_s14  ;;  %4493 = vmatpush1.bf16.msra.mxu0 %v3823_v33  ;;  %v11386_v33 = vmax.bf16 %v13362_v49, %v4852_v18  ;;  %v11390_v57 = vcombine.low %v4863_v30, %v4867_v46 }
 0x224   :  { %4240 = vrot.lane.b32.xlu0 %v11089_v55, %s9253_s16  ;;  %v4140_v55 = vmax.bf16 %v13362_v49, %v4116_v16 }
 0x225   :  { %v4001_v34 = vpop.permute.xlu1 %4000  ;;  %v11300_v14 = vpop.permute.xlu0 %4004 }
 0x226   :  { %v4043_v0 = vsel %vm4042_vm13, %v4001_v34, %v4003_v58  ;;  %v4044_v6 = vsel %vm4042_vm13, %v4003_v58, %v11300_v14  ;;  %v8542_v63 = vcombine.low %v4140_v55, %v4144_v20  ;;  %v11380_v58 = vcombine.high %v13431_v42, %v13430_v54  ;;  %v4856_v20 = vld [vmem:[%s13292_s0 + $0x78] sm:$0xff] }
 0x227   :  { %4258 = vrot.lane.b32.xlu1 %v8535_v39, %s9253_s16  ;;  %4494 = vmatprep.subr.bf16.mxu0 %v4044_v6  ;;  %v4871_v39 = vmax.bf16 %v13362_v49, %v4847_v61  ;;  %v11399_v6 = vcombine.low %v11383_v43, %v11386_v33 }
 0x228   :  { %4256 = vrot.lane.b32.xlu0 %v11083_v59, %s9253_s16  ;;  %4495 = vmatpush1.bf16.msra.mxu0 %v4043_v0  ;;  %v4840_v59 = vld [vmem:[%s13292_s0 + $0x8] sm:$0xff] }
 0x229   :  { %v11309_v5 = vpop.permute.xlu1 %4018  ;;  %v4017_v2 = vpop.permute.xlu0 %4016  ;;  %v11336_v45 = vmax.bf16 %v13362_v49, %v4840_v59 }
 0x22a   :  { %v4050_v10 = vsel %vm4042_vm13, %v4017_v2, %v11309_v5 }
 0x22b   :  { %2596 = vrot.lane.b32.xlu1 %v13425_v37, %s9248_s14  ;;  %4496 = vmatprep.subr.bf16.mxu0 %v4050_v10  ;;  %v11354_v29 = vcombine.low %v11336_v45, %v11339_v24  ;;  %v4855_v10 = vld [vmem:[%s13292_s0 + $0x70] sm:$0xff] }
 0x22c   :  { %4254 = vrot.lane.b32.xlu0 %v11105_v31, %s9253_s16 }
 0x22d   :  { %v4031_v40 = vpop.permute.xlu1 %4030 }
 0x22e   :  { %v4015_v11 = vpop.permute.xlu0 %4014 }
 0x22f   :  { %v4049_v31 = vsel %vm4042_vm13, %v4015_v11, %v4017_v2  ;;  %4272 = vrot.lane.b32.xlu1 %v8542_v63, %s9253_s16  ;;  %v4860_v2 = vld [vmem:[%s13292_s0 + $0x94] sm:$0xff]  ;;  %v4859_v63 = vld [vmem:[%s13292_s0 + $0x8c] sm:$0xff]  ;;  %v11426_v11 = vcombine.high %v13434_v8, %v13433_v21 }
 0x230   :  { %4270 = vrot.lane.b32.xlu0 %v11013_v17, %s9253_s16  ;;  %4497 = vmatpush1.bf16.msra.mxu0 %v4049_v31  ;;  %v11358_v17 = vcombine.high %v4863_v30, %v4867_v46  ;;  %v11429_v31 = vmax.bf16 %v13362_v49, %v4856_v20  ;;  %v11432_v32 = vmax.bf16 %v13362_v49, %v4860_v2 }
 0x231   :  { %v4029_v3 = vpop.permute.xlu1 %4028  ;;  %v4879_v30 = vmax.bf16 %v13362_v49, %v4855_v10  ;;  %v4883_v46 = vmax.bf16 %v13362_v49, %v4859_v63  ;;  %v11496_v63 = vld [vmem:[%s13293_s1 + $0xa4] ss:$8 sps:$4 sm:$0xff]  }
 0x232   :  { %v4055_v9 = vsel %vm4042_vm13, %v4029_v3, %v4031_v40  ;;  %v11346_v48 = vpop.permute.xlu0 %4032  ;;  %v11448_v25 = vcombine.low %v11429_v31, %v11432_v32 }
 0x233   :  { %13428 = vst [vmem:[#allocation14_spill] sm:$0xff] %v11346_v48  ;;  %3310 = vrot.lane.b32.xlu1 %v11333_v26, %s9249_s23  ;;  %v4056_v50 = vsel %vm4042_vm13, %v4031_v40, %v11346_v48  ;;  %v11452_v18 = vcombine.high %v4879_v30, %v4883_v46  ;;  %v11464_v54 = vcombine.low %v4879_v30, %v4883_v46 }
 0x234   :  { %4268 = vrot.lane.b32.xlu0 %v11043_v1, %s9253_s16  ;;  %4498 = vmatprep.subr.bf16.mxu0 %v4056_v50  ;;  %v4851_v1 = vld [vmem:[%s13292_s0 + $0x54] sm:$0xff] }
 0x235   :  { %4499 = vmatpush1.bf16.msra.mxu0 %v4055_v9  ;;  %v11366_v7 = vpop.permute.xlu1 %4236  ;;  %v4875_v16 = vmax.bf16 %v13362_v49, %v4851_v1 }
 0x236   :  { %13429 = vst [vmem:[#allocation15_spill] sm:$0xff] %v11366_v7  ;;  %v4235_v38 = vpop.permute.xlu0 %4234 }
 0x237   :  { %4978 = vrot.lane.b32.xlu1 %v11354_v29, %s9254_s26  ;;  %v4276_v44 = vsel %vm4274_vm14, %v4235_v38, %v11366_v7  ;;  %v11403_v55 = vcombine.high %v4871_v39, %v4875_v16  ;;  %v11436_v47 = vcombine.low %v4871_v39, %v4875_v16  ;;  %v11471_v39 = vld [vmem:[%s13293_s1 + $0x94] ss:$8 sps:$4 sm:$0xff]  }
 0x238   :  { %4976 = vrot.lane.b32.xlu0 %v11358_v17, %s9254_s26  ;;  %4500 = vmatprep.subr.bf16.mxu0 %v4276_v44  ;;  %v11460_v44 = vld [vmem:[%s13293_s1 + $0x80] ss:$8 sps:$4 sm:$0xff]  }
 0x239   :  { %v4249_v13 = vpop.permute.xlu1 %4248 }
 0x23a   :  { %v4233_v34 = vpop.permute.xlu0 %4232 }
 0x23b   :  { %v4275_v0 = vsel %vm4274_vm14, %v4233_v34, %v4235_v38  ;;  %3324 = vrot.lane.b32.xlu1 %v11380_v58, %s9249_s23 }
 0x23c   :  { %4974 = vrot.lane.b32.xlu0 %v11390_v57, %s9254_s26  ;;  %4501 = vmatpush1.bf16.msra.mxu0 %v4275_v0 }
 0x23d   :  { %v4247_v37 = vpop.permute.xlu1 %4246 }
 0x23e   :  { %v4281_v59 = vsel %vm4274_vm14, %v4247_v37, %v4249_v13  ;;  %v11418_v62 = vpop.permute.xlu0 %4250  ;;  %v11489_v37 = vld [vmem:[%s13293_s1 + $0x90] ss:$8 sps:$4 sm:$0xff]  }
 0x23f   :  { %13432 = vst [vmem:[#allocation17_spill] sm:$0xff] %v11418_v62  ;;  %4992 = vrot.lane.b32.xlu1 %v11399_v6, %s9254_s26  ;;  %v4282_v40 = vsel %vm4274_vm14, %v4249_v13, %v11418_v62 }
 0x240   :  { %4990 = vrot.lane.b32.xlu0 %v11403_v55, %s9254_s26  ;;  %4502 = vmatprep.subr.bf16.mxu0 %v4282_v40 }
 0x241   :  { %4503 = vmatpush1.bf16.msra.mxu0 %v4281_v59  ;;  %v11440_v3 = vpop.permute.xlu1 %4264 }
 0x242   :  { %13435 = vst [vmem:[#allocation16_spill] sm:$0xff] %v11440_v3  ;;  %v4263_v9 = vpop.permute.xlu0 %4262 }
 0x243   :  { %3338 = vrot.lane.b32.xlu1 %v11426_v11, %s9249_s23  ;;  %v4288_v50 = vsel %vm4274_vm14, %v4263_v9, %v11440_v3 }
 0x244   :  { %4988 = vrot.lane.b32.xlu0 %v11436_v47, %s9254_s26  ;;  %4504 = vmatprep.subr.bf16.mxu0 %v4288_v50 }
 0x245   :  { %v3315_v61 = vpop.permute.xlu1 %3314 }
 0x246   :  { %v4261_v1 = vpop.permute.xlu0 %4260 }
 0x247   :  { %v4287_v38 = vsel %vm4274_vm14, %v4261_v1, %v4263_v9  ;;  %5006 = vrot.lane.b32.xlu1 %v11448_v25, %s9254_s26  ;;  %v11519_v9 = vld [vmem:[%s13293_s1 + $0xa0] ss:$8 sps:$4 sm:$0xff]  }
 0x248   :  { %5004 = vrot.lane.b32.xlu0 %v11452_v18, %s9254_s26  ;;  %4505 = vmatpush1.bf16.msra.mxu0 %v4287_v38 }
 0x249   :  { %v11466_v42 = vpop.permute.xlu1 %3312 }
 0x24a   :  { %v3317_v16 = vpop.permute.xlu0 %3316  ;;  %v3351_v13 = vsel %vm3346_vm10, %v11466_v42, %v3315_v61 }
 0x24b   :  { %3542 = vrot.lane.b32.xlu1 %v11333_v26, %s9250_s30  ;;  %v3352_v34 = vsel %vm3346_vm10, %v3315_v61, %v3317_v16  ;;  %4509 = vmatmul.mubr.bf16.vlgmr.msra.gmra.mrb[0].mxu0 %v11460_v44  ;;  %v11526_v61 = vld [vmem:[%s13293_s1 + $0xb4] ss:$8 sps:$4 sm:$0xff]  }
 0x24c   :  { %5002 = vrot.lane.b32.xlu0 %v11464_v54, %s9254_s26  ;;  %4622 = vmatprep.subr.bf16.mxu0 %v3352_v34 }
 0x24d   :  { %4623 = vmatpush1.bf16.msra.mxu0 %v3351_v13  ;;  %v3331_v0 = vpop.permute.xlu1 %3330  ;;  %8560 = vmatprep.mubr.msk.bf16.mxu0 %vm1218_vm1, %v11471_v39 }
 0x24e   :  { %v3329_v20 = vpop.permute.xlu0 %3328 }
 0x24f   :  { %5210 = vrot.lane.b32.xlu1 %v11354_v29, %s9255_s10  ;;  %v3358_v2 = vsel %vm3346_vm10, %v3329_v20, %v3331_v0  ;;  %v11545_v0 = vld [vmem:[%s13293_s1 + $0xb0] ss:$8 sps:$4 sm:$0xff]  }
 0x250   :  { %5208 = vrot.lane.b32.xlu0 %v11358_v17, %s9255_s10  ;;  %4624 = vmatprep.subr.bf16.mxu0 %v3358_v2 }
 0x251   :  { %v3343_v10 = vpop.permute.xlu1 %3342 }
 0x252   :  { %v11498_v59 = vpop.permute.xlu0 %3326 }
 0x253   :  { %3556 = vrot.lane.b32.xlu1 %v11380_v58, %s9250_s30  ;;  %v3357_v40 = vsel %vm3346_vm10, %v11498_v59, %v3329_v20  ;;  %4519 = vmatmul.mubr.bf16.gmra.mrb[4].mxu0 %v11489_v37 }
 0x254   :  { %5206 = vrot.lane.b32.xlu0 %v11390_v57, %s9255_s10  ;;  %4625 = vmatpush1.bf16.msra.mxu0 %v3357_v40 }
 0x255   :  { %v11507_v21 = vpop.permute.xlu1 %3340  ;;  %8561 = vmatprep.mubr.msk.bf16.mxu0 %vm1218_vm1, %v11496_v63 }
 0x256   :  { %v3345_v8 = vpop.permute.xlu0 %3344  ;;  %v3363_v30 = vsel %vm3346_vm10, %v11507_v21, %v3343_v10 }
 0x257   :  { %5224 = vrot.lane.b32.xlu1 %v11399_v6, %s9255_s10  ;;  %v3364_v46 = vsel %vm3346_vm10, %v3343_v10, %v3345_v8 }
 0x258   :  { %5222 = vrot.lane.b32.xlu0 %v11403_v55, %s9255_s10  ;;  %4626 = vmatprep.subr.bf16.mxu0 %v3364_v46 }
 0x259   :  { %4627 = vmatpush1.bf16.msra.mxu0 %v3363_v30  ;;  %v3549_v50 = vpop.permute.xlu1 %3548 }
 0x25a   :  { %v3547_v1 = vpop.permute.xlu0 %3546 }
 0x25b   :  { %3570 = vrot.lane.b32.xlu1 %v11426_v11, %s9250_s30  ;;  %v3584_v38 = vsel %vm3578_vm11, %v3547_v1, %v3549_v50  ;;  %4529 = vmatmul.mubr.bf16.gmra.mrb[8].mxu0 %v11519_v9 }
 0x25c   :  { %5220 = vrot.lane.b32.xlu0 %v11436_v47, %s9255_s10  ;;  %4628 = vmatprep.subr.bf16.mxu0 %v3584_v38 }
 0x25d   :  { %v3561_v16 = vpop.permute.xlu1 %3560  ;;  %8562 = vmatprep.mubr.msk.bf16.mxu0 %vm1218_vm1, %v11526_v61 }
 0x25e   :  { %v11536_v13 = vpop.permute.xlu0 %3544 }
 0x25f   :  { %5238 = vrot.lane.b32.xlu1 %v11448_v25, %s9255_s10  ;;  %v3583_v34 = vsel %vm3578_vm11, %v11536_v13, %v3547_v1 }
 0x260   :  { %5236 = vrot.lane.b32.xlu0 %v11452_v18, %s9255_s10  ;;  %4629 = vmatpush1.bf16.msra.mxu0 %v3583_v34 }
 0x261   :  { %v11549_v20 = vpop.permute.xlu1 %3558 }
 0x262   :  { %v3563_v2 = vpop.permute.xlu0 %3562  ;;  %v3589_v10 = vsel %vm3578_vm11, %v11549_v20, %v3561_v16 }
 0x263   :  { %3774 = vrot.lane.b32.xlu1 %v11333_v26, %s9251_s4  ;;  %v3590_v40 = vsel %vm3578_vm11, %v3561_v16, %v3563_v2  ;;  %4539 = vmatmul.mubr.bf16.gmra.mrb[12].mxu0 %v11545_v0 }
 0x264   :  { %5234 = vrot.lane.b32.xlu0 %v11464_v54, %s9255_s10  ;;  %4630 = vmatprep.subr.bf16.mxu0 %v3590_v40 }
 0x265   :  { %4631 = vmatpush1.bf16.msra.mxu0 %v3589_v10  ;;  %v3577_v8 = vpop.permute.xlu1 %3576  ;;  %8567 = vmatprep.mubr.msk.bf16.mxu0 %vm1218_vm1, %v11238_v22 }
 0x266   :  { %v3575_v30 = vpop.permute.xlu0 %3574 }
 0x267   :  { %5442 = vrot.lane.b32.xlu1 %v11354_v29, %s9256_s24  ;;  %v3596_v46 = vsel %vm3578_vm11, %v3575_v30, %v3577_v8 }
 0x268   :  { %5440 = vrot.lane.b32.xlu0 %v11358_v17, %s9256_s24  ;;  %4632 = vmatprep.subr.bf16.mxu0 %v3596_v46 }
 0x269   :  { %v3779_v50 = vpop.permute.xlu1 %3778 }
 0x26a   :  { %v11566_v1 = vpop.permute.xlu0 %3572 }
 0x26b   :  { %3788 = vrot.lane.b32.xlu1 %v11380_v58, %s9251_s4  ;;  %v3595_v38 = vsel %vm3578_vm11, %v11566_v1, %v3575_v30 }
 0x26c   :  { %5438 = vrot.lane.b32.xlu0 %v11390_v57, %s9256_s24  ;;  %4633 = vmatpush1.bf16.msra.mxu0 %v3595_v38 }
 0x26d   :  { %v11574_v16 = vpop.permute.xlu1 %3776 }
 0x26e   :  { %v3781_v34 = vpop.permute.xlu0 %3780  ;;  %v3815_v2 = vsel %vm3810_vm12, %v11574_v16, %v3779_v50 }
 0x26f   :  { %5456 = vrot.lane.b32.xlu1 %v11399_v6, %s9256_s24  ;;  %v3816_v10 = vsel %vm3810_vm12, %v3779_v50, %v3781_v34 }
 0x270   :  { %5454 = vrot.lane.b32.xlu0 %v11403_v55, %s9256_s24  ;;  %4634 = vmatprep.subr.bf16.mxu0 %v3816_v10 }
 0x271   :  { %4635 = vmatpush1.bf16.msra.mxu0 %v3815_v2  ;;  %v3795_v40 = vpop.permute.xlu1 %3794 }
 0x272   :  { %v3793_v8 = vpop.permute.xlu0 %3792 }
 0x273   :  { %3802 = vrot.lane.b32.xlu1 %v11426_v11, %s9251_s4  ;;  %v3822_v30 = vsel %vm3810_vm12, %v3793_v8, %v3795_v40  ;;  %s9257_s4 = smov 38  }
 0x274   :  { %5452 = vrot.lane.b32.xlu0 %v11436_v47, %s9256_s24  ;;  %4636 = vmatprep.subr.bf16.mxu0 %v3822_v30 }
 0x275   :  { %v3807_v46 = vpop.permute.xlu1 %3806 }
 0x276   :  { %v11588_v38 = vpop.permute.xlu0 %3790 }
 0x277   :  { %5470 = vrot.lane.b32.xlu1 %v11448_v25, %s9256_s24  ;;  %v3821_v50 = vsel %vm3810_vm12, %v11588_v38, %v3793_v8 }
 0x278   :  { %5468 = vrot.lane.b32.xlu0 %v11452_v18, %s9256_s24  ;;  %4637 = vmatpush1.bf16.msra.mxu0 %v3821_v50 }
 0x279   :  { %v11596_v34 = vpop.permute.xlu1 %3804 }
 0x27a   :  { %v3809_v2 = vpop.permute.xlu0 %3808  ;;  %v3827_v10 = vsel %vm3810_vm12, %v11596_v34, %v3807_v46 }
 0x27b   :  { %4006 = vrot.lane.b32.xlu1 %v11333_v26, %s9252_s5  ;;  %v3828_v40 = vsel %vm3810_vm12, %v3807_v46, %v3809_v2 }
 0x27c   :  { %5466 = vrot.lane.b32.xlu0 %v11464_v54, %s9256_s24  ;;  %4638 = vmatprep.subr.bf16.mxu0 %v3828_v40 }
 0x27d   :  { %4639 = vmatpush1.bf16.msra.mxu0 %v3827_v10  ;;  %v4013_v8 = vpop.permute.xlu1 %4012 }
 0x27e   :  { %v4011_v30 = vpop.permute.xlu0 %4010 }
 0x27f   :  { %5674 = vrot.lane.b32.xlu1 %v11354_v29, %s9257_s4  ;;  %v4048_v50 = vsel %vm4042_vm13, %v4011_v30, %v4013_v8 }
 0x280   :  { %5672 = vrot.lane.b32.xlu0 %v11358_v17, %s9257_s4  ;;  %4640 = vmatprep.subr.bf16.mxu0 %v4048_v50 }
 0x281   :  { %v4025_v3 = vpop.permute.xlu1 %4024 }
 0x282   :  { %v11610_v62 = vpop.permute.xlu0 %4008 }
 0x283   :  { %4020 = vrot.lane.b32.xlu1 %v11380_v58, %s9252_s5  ;;  %v4047_v46 = vsel %vm4042_vm13, %v11610_v62, %v4011_v30 }
 0x284   :  { %5670 = vrot.lane.b32.xlu0 %v11390_v57, %s9257_s4  ;;  %4641 = vmatpush1.bf16.msra.mxu0 %v4047_v46 }
 0x285   :  { %v11618_v2 = vpop.permute.xlu1 %4022 }
 0x286   :  { %v4027_v10 = vpop.permute.xlu0 %4026  ;;  %v4053_v40 = vsel %vm4042_vm13, %v11618_v2, %v4025_v3 }
 0x287   :  { %5688 = vrot.lane.b32.xlu1 %v11399_v6, %s9257_s4  ;;  %v4054_v8 = vsel %vm4042_vm13, %v4025_v3, %v4027_v10 }
 0x288   :  { %5686 = vrot.lane.b32.xlu0 %v11403_v55, %s9257_s4  ;;  %4642 = vmatprep.subr.bf16.mxu0 %v4054_v8 }
 0x289   :  { %4643 = vmatpush1.bf16.msra.mxu0 %v4053_v40  ;;  %v4041_v30 = vpop.permute.xlu1 %4040 }
 0x28a   :  { %v4039_v50 = vpop.permute.xlu0 %4038 }
 0x28b   :  { %4034 = vrot.lane.b32.xlu1 %v11426_v11, %s9252_s5  ;;  %v4060_v46 = vsel %vm4042_vm13, %v4039_v50, %v4041_v30  ;;  %s9258_s5 = smov 37  }
 0x28c   :  { %5684 = vrot.lane.b32.xlu0 %v11436_v47, %s9257_s4  ;;  %4644 = vmatprep.subr.bf16.mxu0 %v4060_v46 }
 0x28d   :  { %v2569_v7 = vpop.permute.xlu1 %2568 }
 0x28e   :  { %v11632_v48 = vpop.permute.xlu0 %4036  ;;  %v2608_v3 = vsel %vm2604_vm9, %v2569_v7, %v11033_v23  ;;  %v2607_v10 = vsel %vm2604_vm9, %v10757_v53, %v2569_v7 }
 0x28f   :  { %5702 = vrot.lane.b32.xlu1 %v11448_v25, %s9257_s4  ;;  %2903 = vmatprep.subr.bf16.mxu1 %v2608_v3  ;;  %v4059_v40 = vsel %vm4042_vm13, %v11632_v48, %v4039_v50 }
 0x290   :  { %5700 = vrot.lane.b32.xlu0 %v11452_v18, %s9257_s4  ;;  %4645 = vmatpush1.bf16.msra.mxu0 %v4059_v40 }
 0x291   :  { %2904 = vmatpush1.bf16.msra.mxu1 %v2607_v10  ;;  %v4245_v8 = vpop.permute.xlu1 %4244 }
 0x292   :  { %v4243_v30 = vpop.permute.xlu0 %4242 }
 0x293   :  { %4238 = vrot.lane.b32.xlu1 %v11333_v26, %s9253_s16  ;;  %v4280_v23 = vsel %vm4274_vm14, %v4243_v30, %v4245_v8 }
 0x294   :  { %5698 = vrot.lane.b32.xlu0 %v11464_v54, %s9257_s4  ;;  %4646 = vmatprep.subr.bf16.mxu0 %v4280_v23 }
 0x295   :  { %v2583_v53 = vpop.permute.xlu1 %2582 }
 0x296   :  { %v11649_v7 = vpop.permute.xlu0 %4240  ;;  %v2614_v50 = vsel %vm2604_vm9, %v2583_v53, %v11080_v19  ;;  %v2613_v46 = vsel %vm2604_vm9, %v10786_v4, %v2583_v53  ;;  %v11700_v53 = vcombine.high %v11336_v45, %v11339_v24  ;;  %v4842_v24 = vld [vmem:[%s13292_s0 + $0x18] sm:$0xf] }
 0x297   :  { %5906 = vrot.lane.b32.xlu1 %v11354_v29, %s9258_s5  ;;  %2905 = vmatprep.subr.bf16.mxu1 %v2614_v50  ;;  %v4279_v26 = vsel %vm4274_vm14, %v11649_v7, %v4243_v30  ;;  %v9225_v30 = vld [vmem:[%s13293_s1 + $0x40] ss:$8 sps:$4 sm:$0xff]   ;;  %v9226_v50 = vld [vmem:[%s13293_s1 + $0x54] ss:$8 sps:$4 sm:$0xff]  }
 0x298   :  { %5904 = vrot.lane.b32.xlu0 %v11358_v17, %s9258_s5  ;;  %4647 = vmatpush1.bf16.msra.mxu0 %v4279_v26 }
 0x299   :  { %2906 = vmatpush1.bf16.msra.mxu1 %v2613_v46  ;;  %v4259_v3 = vpop.permute.xlu1 %4258 }
 0x29a   :  { %v4257_v10 = vpop.permute.xlu0 %4256 }
 0x29b   :  { %4252 = vrot.lane.b32.xlu1 %v11380_v58, %s9253_s16  ;;  %v4286_v4 = vsel %vm4274_vm14, %v4257_v10, %v4259_v3 }
 0x29c   :  { %5902 = vrot.lane.b32.xlu0 %v11390_v57, %s9258_s5  ;;  %4648 = vmatprep.subr.bf16.mxu0 %v4286_v4  ;;  %v4866_v4 = vmax.bf16 %v13362_v49, %v4842_v24  ;;  %v4861_v24 = vld [vmem:[%s13292_s0 + $0x9c] sm:$0xff] }
 0x29d   :  { %v2597_v19 = vpop.permute.xlu1 %2596 }
 0x29e   :  { %v11666_v29 = vpop.permute.xlu0 %4254  ;;  %v2620_v40 = vsel %vm2604_vm9, %v2597_v19, %v11101_v28  ;;  %v2619_v17 = vsel %vm2604_vm9, %v10803_v56, %v2597_v19  ;;  %v4841_v56 = vld [vmem:[%s13292_s0 + $0x10] sm:$0xff]  ;;  %vm7614_vm9 = vcmask 64512  }
 0x29f   :  { %5920 = vrot.lane.b32.xlu1 %v11399_v6, %s9258_s5  ;;  %2907 = vmatprep.subr.bf16.mxu1 %v2620_v40  ;;  %v4285_v58 = vsel %vm4274_vm14, %v11666_v29, %v4257_v10  ;;  %v4845_v6 = vld [vmem:[%s13292_s0 + $0x2c] sm:$0xff]  ;;  %v4865_v46 = vmax.bf16 %v13362_v49, %v4841_v56 }
 0x2a0   :  { %5918 = vrot.lane.b32.xlu0 %v11403_v55, %s9258_s5  ;;  %4649 = vmatpush1.bf16.msra.mxu0 %v4285_v58  ;;  %v4849_v40 = vld [vmem:[%s13292_s0 + $0x48] sm:$0xff] }
 0x2a1   :  { %2908 = vmatpush1.bf16.msra.mxu1 %v2619_v17  ;;  %v4273_v57 = vpop.permute.xlu1 %4272  ;;  %v4853_v17 = vld [vmem:[%s13292_s0 + $0x64] sm:$0xff] }
 0x2a2   :  { %v4271_v8 = vpop.permute.xlu0 %4270  ;;  %v9228_v56 = vld [vmem:[%s13293_s1 + $0x64] ss:$8 sps:$4 sm:$0xff]  }
 0x2a3   :  { %4266 = vrot.lane.b32.xlu1 %v11426_v11, %s9253_s16  ;;  %v4292_v28 = vsel %vm4274_vm14, %v4271_v8, %v4273_v57  ;;  %s9260_s16 = smov 11  }
 0x2a4   :  { %5916 = vrot.lane.b32.xlu0 %v11436_v47, %s9258_s5  ;;  %4650 = vmatprep.subr.bf16.mxu0 %v4292_v28  ;;  %v11752_v28 = vcombine.high %v11383_v43, %v11386_v33 }
 0x2a5   :  { %v3311_v55 = vpop.permute.xlu1 %3310  ;;  %2912 = vmatmul.mubr.bf16.vlgmr.msra.gmra.mrb[16].mxu1 %v9225_v30 }
 0x2a6   :  { %v11692_v11 = vpop.permute.xlu0 %4268  ;;  %v3350_v47 = vsel %vm3346_vm10, %v3311_v55, %v11466_v42  ;;  %v3349_v23 = vsel %vm3346_vm10, %v11115_v41, %v3311_v55  ;;  %8431 = vmatprep.mubr.msk.bf16.mxu1 %vm1218_vm1, %v9226_v50  ;;  %v4869_v41 = vmax.bf16 %v13362_v49, %v4845_v6  ;;  %v4854_v55 = vld [vmem:[%s13292_s0 + $0x6c] sm:$0xf] }
 0x2a7   :  { %5934 = vrot.lane.b32.xlu1 %v11448_v25, %s9258_s5  ;;  %4549 = vmatprep.subr.bf16.mxu1 %v3350_v47  ;;  %v4291_v42 = vsel %vm4274_vm14, %v11692_v11, %v4271_v8  ;;  %v4846_v25 = vld [vmem:[%s13292_s0 + $0x34] sm:$0xf] }
 0x2a8   :  { %5932 = vrot.lane.b32.xlu0 %v11452_v18, %s9258_s5  ;;  %4651 = vmatpush1.bf16.msra.mxu0 %v4291_v42  ;;  %v11726_v3 = vcombine.high %v4865_v46, %v4869_v41  ;;  %v11731_v10 = vcombine.low %v4865_v46, %v4869_v41  ;;  %v4870_v19 = vmax.bf16 %v13362_v49, %v4846_v25  ;;  %v4857_v41 = vld [vmem:[%s13292_s0 + $0x80] sm:$0xff] }
 0x2a9   :  { %4550 = vmatpush1.bf16.msra.mxu1 %v3349_v23  ;;  %v11714_v45 = vpop.permute.xlu1 %4978  ;;  %v4878_v46 = vmax.bf16 %v13362_v49, %v4854_v55 }
 0x2aa   :  { %v4977_v26 = vpop.permute.xlu0 %4976  ;;  %v8577_v43 = vcombine.low %v4866_v4, %v4870_v19  ;;  %v11802_v19 = vcombine.high %v11429_v31, %v11432_v32 }
 0x2ab   :  { %4980 = vrot.lane.b32.xlu1 %v11700_v53, %s9254_s26  ;;  %v5018_v18 = vsel %vm5016_vm15, %v4977_v26, %v11714_v45  ;;  %4655 = vmatmul.mubr.bf16.vlgmr.msra.gmra.mrb[16].mxu0 %v11460_v44  ;;  %v9227_v44 = vld [vmem:[%s13293_s1 + $0x50] ss:$8 sps:$4 sm:$0xff]  }
 0x2ac   :  { %5930 = vrot.lane.b32.xlu0 %v11464_v54, %s9258_s5  ;;  %6146 = vmatprep.subr.bf16.mxu0 %v5018_v18 }
 0x2ad   :  { %v3325_v58 = vpop.permute.xlu1 %3324  ;;  %2922 = vmatmul.mubr.bf16.gmra.mrb[20].mxu1 %v9227_v44  ;;  %8568 = vmatprep.mubr.msk.bf16.mxu0 %vm1218_vm1, %v11471_v39  ;;  %v4873_v39 = vmax.bf16 %v13362_v49, %v4849_v40  ;;  %v9230_v40 = vld [vmem:[%s13293_s1 + $0x74] ss:$8 sps:$4 sm:$0xff]  }
 0x2ae   :  { %v4975_v54 = vpop.permute.xlu0 %4974  ;;  %v3356_v57 = vsel %vm3346_vm10, %v3325_v58, %v11498_v59  ;;  %v3355_v8 = vsel %vm3346_vm10, %v11144_v52, %v3325_v58  ;;  %8432 = vmatprep.mubr.msk.bf16.mxu1 %vm1218_vm1, %v9228_v56  ;;  %v4877_v52 = vmax.bf16 %v13362_v49, %v4853_v17  ;;  %v4850_v59 = vld [vmem:[%s13292_s0 + $0x50] sm:$0xf]  ;;  %v4862_v58 = vld [vmem:[%s13292_s0 + $0xa4] sm:$0xf] }
 0x2af   :  { %v5017_v6 = vsel %vm5016_vm15, %v4975_v54, %v4977_v26  ;;  %4984 = vrot.lane.b32.xlu1 %v11726_v3, %s9254_s26  ;;  %4551 = vmatprep.subr.bf16.mxu1 %v3356_v57  ;;  %v4874_v42 = vmax.bf16 %v13362_v49, %v4850_v59 }
 0x2b0   :  { %4982 = vrot.lane.b32.xlu0 %v11731_v10, %s9254_s26  ;;  %6147 = vmatpush1.bf16.msra.mxu0 %v5017_v6  ;;  %v11777_v23 = vcombine.high %v4873_v39, %v4877_v52  ;;  %v11781_v50 = vcombine.low %v4873_v39, %v4877_v52  ;;  %v4886_v6 = vmax.bf16 %v13362_v49, %v4862_v58  ;;  %v9231_v52 = vld [vmem:[%s13293_s1 + $0x70] ss:$8 sps:$4 sm:$0xff]  }
 0x2b1   :  { %4552 = vmatpush1.bf16.msra.mxu1 %v3355_v8  ;;  %v11765_v33 = vpop.permute.xlu1 %4992  ;;  %v8584_v31 = vcombine.low %v4874_v42, %v4878_v46 }
 0x2b2   :  { %v4991_v30 = vpop.permute.xlu0 %4990 }
 0x2b3   :  { %4994 = vrot.lane.b32.xlu1 %v11752_v28, %s9254_s26  ;;  %v5024_v47 = vsel %vm5016_vm15, %v4991_v30, %v11765_v33  ;;  %4665 = vmatmul.mubr.bf16.gmra.mrb[20].mxu0 %v11489_v37  ;;  %v9229_v37 = vld [vmem:[%s13293_s1 + $0x60] ss:$8 sps:$4 sm:$0xff]  }
 0x2b4   :  { %4986 = vrot.lane.b32.xlu0 %v8577_v43, %s9254_s26  ;;  %6148 = vmatprep.subr.bf16.mxu0 %v5024_v47 }
 0x2b5   :  { %v3339_v25 = vpop.permute.xlu1 %3338  ;;  %2932 = vmatmul.mubr.bf16.gmra.mrb[24].mxu1 %v9229_v37  ;;  %8569 = vmatprep.mubr.msk.bf16.mxu0 %vm1218_vm1, %v11496_v63  ;;  %v4881_v63 = vmax.bf16 %v13362_v49, %v4857_v41 }
 0x2b6   :  { %v4989_v26 = vpop.permute.xlu0 %4988  ;;  %v3362_v18 = vsel %vm3346_vm10, %v3339_v25, %v11507_v21  ;;  %v3361_v4 = vsel %vm3346_vm10, %v11156_v51, %v3339_v25  ;;  %8433 = vmatprep.mubr.msk.bf16.mxu1 %vm1218_vm1, %v9230_v40  ;;  %v4885_v51 = vmax.bf16 %v13362_v49, %v4861_v24  ;;  %v4858_v21 = vld [vmem:[%s13292_s0 + $0x88] sm:$0xf] }
 0x2b7   :  { %v5023_v17 = vsel %vm5016_vm15, %v4989_v26, %v4991_v30  ;;  %4998 = vrot.lane.b32.xlu1 %v11777_v23, %s9254_s26  ;;  %4553 = vmatprep.subr.bf16.mxu1 %v3362_v18  ;;  %v4882_v56 = vmax.bf16 %v13362_v49, %v4858_v21  ;;  %v11862_v30 = vld [vmem:[%s13293_s1 + $0xc4] ss:$8 sps:$4 sm:$0xff]  }
 0x2b8   :  { %4996 = vrot.lane.b32.xlu0 %v11781_v50, %s9254_s26  ;;  %6149 = vmatpush1.bf16.msra.mxu0 %v5023_v17  ;;  %v11827_v57 = vcombine.high %v4881_v63, %v4885_v51  ;;  %v11831_v8 = vcombine.low %v4881_v63, %v4885_v51 }
 0x2b9   :  { %4554 = vmatpush1.bf16.msra.mxu1 %v3361_v4  ;;  %v11815_v32 = vpop.permute.xlu1 %5006 }
 0x2ba   :  { %v5005_v44 = vpop.permute.xlu0 %5004 }
 0x2bb   :  { %5008 = vrot.lane.b32.xlu1 %v11802_v19, %s9254_s26  ;;  %v5030_v54 = vsel %vm5016_vm15, %v5005_v44, %v11815_v32  ;;  %4675 = vmatmul.mubr.bf16.gmra.mrb[24].mxu0 %v11519_v9 }
 0x2bc   :  { %5000 = vrot.lane.b32.xlu0 %v8584_v31, %s9254_s26  ;;  %6150 = vmatprep.subr.bf16.mxu0 %v5030_v54 }
 0x2bd   :  { %v3543_v39 = vpop.permute.xlu1 %3542  ;;  %2942 = vmatmul.mubr.bf16.gmra.mrb[28].mxu1 %v9231_v52  ;;  %8570 = vmatprep.mubr.msk.bf16.mxu0 %vm1218_vm1, %v11526_v61  ;;  %v8591_v61 = vcombine.low %v4882_v56, %v4886_v6 }
 0x2be   :  { %v5003_v43 = vpop.permute.xlu0 %5002  ;;  %v3582_v9 = vsel %vm3578_vm11, %v3543_v39, %v11536_v13  ;;  %v3581_v59 = vsel %vm3578_vm11, %v11188_v60, %v3543_v39  ;;  %8563 = vmatprep.mubr.msk.bf16.mxu1 %vm1218_vm1, %v11238_v22  ;;  %v5074_v60 = vld [vmem:[%s13292_s0 + $0x18] sm:$0xf]  ;;  %v5078_v22 = vld [vmem:[%s13292_s0 + $0x34] sm:$0xf] }
 0x2bf   :  { %v5029_v55 = vsel %vm5016_vm15, %v5003_v43, %v5005_v44  ;;  %5012 = vrot.lane.b32.xlu1 %v11827_v57, %s9254_s26  ;;  %4555 = vmatprep.subr.bf16.mxu1 %v3582_v9  ;;  %v5098_v46 = vmax.bf16 %v13362_v49, %v5074_v60  ;;  %v5102_v41 = vmax.bf16 %v13362_v49, %v5078_v22 }
 0x2c0   :  { %5010 = vrot.lane.b32.xlu0 %v11831_v8, %s9254_s26  ;;  %6151 = vmatpush1.bf16.msra.mxu0 %v5029_v55 }
 0x2c1   :  { %4556 = vmatpush1.bf16.msra.mxu1 %v3581_v59  ;;  %v11851_v13 = vpop.permute.xlu1 %5210  ;;  %v8598_v18 = vcombine.low %v5098_v46, %v5102_v41 }
 0x2c2   :  { %v5209_v47 = vpop.permute.xlu0 %5208 }
 0x2c3   :  { %5212 = vrot.lane.b32.xlu1 %v11700_v53, %s9255_s10  ;;  %v5250_v42 = vsel %vm5248_vm0, %v5209_v47, %v11851_v13  ;;  %4685 = vmatmul.mubr.bf16.gmra.mrb[28].mxu0 %v11545_v0 }
 0x2c4   :  { %5014 = vrot.lane.b32.xlu0 %v8591_v61, %s9254_s26  ;;  %6152 = vmatprep.subr.bf16.mxu0 %v5250_v42 }
 0x2c5   :  { %v3557_v24 = vpop.permute.xlu1 %3556  ;;  %8692 = vmatprep.mubr.msk.bf16.mxu0 %vm1218_vm1, %v11862_v30 }
 0x2c6   :  { %v5207_v25 = vpop.permute.xlu0 %5206  ;;  %v3588_v37 = vsel %vm3578_vm11, %v3557_v24, %v11549_v20  ;;  %v3587_v26 = vsel %vm3578_vm11, %v11198_v36, %v3557_v24  ;;  %v5082_v20 = vld [vmem:[%s13292_s0 + $0x50] sm:$0xf]  ;;  %v5086_v36 = vld [vmem:[%s13292_s0 + $0x6c] sm:$0xf] }
 0x2c7   :  { %v5249_v0 = vsel %vm5248_vm0, %v5207_v25, %v5209_v47  ;;  %5216 = vrot.lane.b32.xlu1 %v11726_v3, %s9255_s10  ;;  %4557 = vmatprep.subr.bf16.mxu1 %v3588_v37  ;;  %v5106_v63 = vmax.bf16 %v13362_v49, %v5082_v20  ;;  %v5110_v51 = vmax.bf16 %v13362_v49, %v5086_v36 }
 0x2c8   :  { %5214 = vrot.lane.b32.xlu0 %v11731_v10, %s9255_s10  ;;  %6153 = vmatpush1.bf16.msra.mxu0 %v5249_v0 }
 0x2c9   :  { %4558 = vmatpush1.bf16.msra.mxu1 %v3587_v26  ;;  %v11883_v4 = vpop.permute.xlu1 %5224  ;;  %v8605_v56 = vcombine.low %v5106_v63, %v5110_v51 }
 0x2ca   :  { %v5223_v40 = vpop.permute.xlu0 %5222 }
 0x2cb   :  { %5226 = vrot.lane.b32.xlu1 %v11752_v28, %s9255_s10  ;;  %v5256_v17 = vsel %vm5248_vm0, %v5223_v40, %v11883_v4 }
 0x2cc   :  { %5218 = vrot.lane.b32.xlu0 %v8598_v18, %s9255_s10  ;;  %6154 = vmatprep.subr.bf16.mxu0 %v5256_v17 }
 0x2cd   :  { %v3571_v31 = vpop.permute.xlu1 %3570 }
 0x2ce   :  { %v5221_v21 = vpop.permute.xlu0 %5220  ;;  %v3594_v58 = vsel %vm3578_vm11, %v3571_v31, %v11566_v1  ;;  %v3593_v44 = vsel %vm3578_vm11, %v11227_v15, %v3571_v31  ;;  %v5090_v1 = vld [vmem:[%s13292_s0 + $0x88] sm:$0xf]  ;;  %v5094_v15 = vld [vmem:[%s13292_s0 + $0xa4] sm:$0xf] }
 0x2cf   :  { %v5255_v54 = vsel %vm5248_vm0, %v5221_v21, %v5223_v40  ;;  %5230 = vrot.lane.b32.xlu1 %v11777_v23, %s9255_s10  ;;  %4559 = vmatprep.subr.bf16.mxu1 %v3594_v58  ;;  %v5114_v43 = vmax.bf16 %v13362_v49, %v5090_v1  ;;  %v5118_v9 = vmax.bf16 %v13362_v49, %v5094_v15 }
 0x2d0   :  { %5228 = vrot.lane.b32.xlu0 %v11781_v50, %s9255_s10  ;;  %6155 = vmatpush1.bf16.msra.mxu0 %v5255_v54 }
 0x2d1   :  { %4560 = vmatpush1.bf16.msra.mxu1 %v3593_v44  ;;  %v11907_v6 = vpop.permute.xlu1 %5238  ;;  %v8612_v47 = vcombine.low %v5114_v43, %v5118_v9 }
 0x2d2   :  { %v5237_v39 = vpop.permute.xlu0 %5236 }
 0x2d3   :  { %5240 = vrot.lane.b32.xlu1 %v11802_v19, %s9255_s10  ;;  %v5262_v52 = vsel %vm5248_vm0, %v5237_v39, %v11907_v6 }
 0x2d4   :  { %5232 = vrot.lane.b32.xlu0 %v8605_v56, %s9255_s10  ;;  %6156 = vmatprep.subr.bf16.mxu0 %v5262_v52 }
 0x2d5   :  { %v3775_v59 = vpop.permute.xlu1 %3774 }
 0x2d6   :  { %v5235_v55 = vpop.permute.xlu0 %5234  ;;  %v3814_v61 = vsel %vm3810_vm12, %v3775_v59, %v11574_v16  ;;  %v3813_v60 = vsel %vm3810_vm12, %v11242_v35, %v3775_v59  ;;  %v5306_v16 = vld [vmem:[%s13292_s0 + $0x18] sm:$0xf]  ;;  %v5310_v35 = vld [vmem:[%s13292_s0 + $0x34] sm:$0xf] }
 0x2d7   :  { %v5261_v22 = vsel %vm5248_vm0, %v5235_v55, %v5237_v39  ;;  %5244 = vrot.lane.b32.xlu1 %v11827_v57, %s9255_s10  ;;  %4561 = vmatprep.subr.bf16.mxu1 %v3814_v61  ;;  %v5330_v24 = vmax.bf16 %v13362_v49, %v5306_v16  ;;  %v5334_v25 = vmax.bf16 %v13362_v49, %v5310_v35 }
 0x2d8   :  { %5242 = vrot.lane.b32.xlu0 %v11831_v8, %s9255_s10  ;;  %6157 = vmatpush1.bf16.msra.mxu0 %v5261_v22 }
 0x2d9   :  { %4562 = vmatpush1.bf16.msra.mxu1 %v3813_v60  ;;  %v11931_v42 = vpop.permute.xlu1 %5442  ;;  %v8619_v36 = vcombine.low %v5330_v24, %v5334_v25 }
 0x2da   :  { %v5441_v46 = vpop.permute.xlu0 %5440 }
 0x2db   :  { %5444 = vrot.lane.b32.xlu1 %v11700_v53, %s9256_s24  ;;  %v5482_v41 = vsel %vm5480_vm2, %v5441_v46, %v11931_v42 }
 0x2dc   :  { %5246 = vrot.lane.b32.xlu0 %v8612_v47, %s9255_s10  ;;  %6158 = vmatprep.subr.bf16.mxu0 %v5482_v41 }
 0x2dd   :  { %v3789_v37 = vpop.permute.xlu1 %3788 }
 0x2de   :  { %v5439_v26 = vpop.permute.xlu0 %5438  ;;  %v3820_v0 = vsel %vm3810_vm12, %v3789_v37, %v11588_v38  ;;  %v3819_v18 = vsel %vm3810_vm12, %v11265_v27, %v3789_v37  ;;  %v5314_v38 = vld [vmem:[%s13292_s0 + $0x50] sm:$0xf]  ;;  %v5318_v27 = vld [vmem:[%s13292_s0 + $0x6c] sm:$0xf] }
 0x2df   :  { %v5481_v20 = vsel %vm5480_vm2, %v5439_v26, %v5441_v46  ;;  %5448 = vrot.lane.b32.xlu1 %v11726_v3, %s9256_s24  ;;  %4563 = vmatprep.subr.bf16.mxu1 %v3820_v0  ;;  %v5338_v51 = vmax.bf16 %v13362_v49, %v5314_v38  ;;  %v5342_v31 = vmax.bf16 %v13362_v49, %v5318_v27 }
 0x2e0   :  { %5446 = vrot.lane.b32.xlu0 %v11731_v10, %s9256_s24  ;;  %6159 = vmatpush1.bf16.msra.mxu0 %v5481_v20 }
 0x2e1   :  { %4564 = vmatpush1.bf16.msra.mxu1 %v3819_v18  ;;  %v11955_v40 = vpop.permute.xlu1 %5456  ;;  %v8626_v1 = vcombine.low %v5338_v51, %v5342_v31 }
 0x2e2   :  { %v5455_v17 = vpop.permute.xlu0 %5454 }
 0x2e3   :  { %5458 = vrot.lane.b32.xlu1 %v11752_v28, %s9256_s24  ;;  %v5488_v63 = vsel %vm5480_vm2, %v5455_v17, %v11955_v40 }
 0x2e4   :  { %5450 = vrot.lane.b32.xlu0 %v8619_v36, %s9256_s24  ;;  %6160 = vmatprep.subr.bf16.mxu0 %v5488_v63 }
 0x2e5   :  { %v3803_v21 = vpop.permute.xlu1 %3802 }
 0x2e6   :  { %v5453_v58 = vpop.permute.xlu0 %5452  ;;  %v3826_v44 = vsel %vm3810_vm12, %v3803_v21, %v11596_v34  ;;  %v3825_v54 = vsel %vm3810_vm12, %v11279_v12, %v3803_v21  ;;  %v5322_v34 = vld [vmem:[%s13292_s0 + $0x88] sm:$0xf]  ;;  %v5326_v12 = vld [vmem:[%s13292_s0 + $0xa4] sm:$0xf] }
 0x2e7   :  { %v5487_v56 = vsel %vm5480_vm2, %v5453_v58, %v5455_v17  ;;  %5462 = vrot.lane.b32.xlu1 %v11777_v23, %s9256_s24  ;;  %4565 = vmatprep.subr.bf16.mxu1 %v3826_v44  ;;  %v5346_v43 = vmax.bf16 %v13362_v49, %v5322_v34  ;;  %v5350_v9 = vmax.bf16 %v13362_v49, %v5326_v12  ;;  %v13436_v58 = vld [vmem:[#allocation14_spill] sm:$0xff]  ;;  %v5558_v34 = vld [vmem:[%s13292_s0 + $0xa4] sm:$0xf] }
 0x2e8   :  { %5460 = vrot.lane.b32.xlu0 %v11781_v50, %s9256_s24  ;;  %6161 = vmatpush1.bf16.msra.mxu0 %v5487_v56 }
 0x2e9   :  { %4566 = vmatpush1.bf16.msra.mxu1 %v3825_v54  ;;  %v11979_v15 = vpop.permute.xlu1 %5470  ;;  %v8633_v47 = vcombine.low %v5346_v43, %v5350_v9  ;;  %v5582_v43 = vmax.bf16 %v13362_v49, %v5558_v34 }
 0x2ea   :  { %v5469_v39 = vpop.permute.xlu0 %5468 }
 0x2eb   :  { %5472 = vrot.lane.b32.xlu1 %v11802_v19, %s9256_s24  ;;  %v5494_v52 = vsel %vm5480_vm2, %v5469_v39, %v11979_v15 }
 0x2ec   :  { %5464 = vrot.lane.b32.xlu0 %v8626_v1, %s9256_s24  ;;  %6162 = vmatprep.subr.bf16.mxu0 %v5494_v52 }
 0x2ed   :  { %v4007_v59 = vpop.permute.xlu1 %4006 }
 0x2ee   :  { %v5467_v55 = vpop.permute.xlu0 %5466  ;;  %v4046_v61 = vsel %vm4042_vm13, %v4007_v59, %v11610_v62  ;;  %v4045_v60 = vsel %vm4042_vm13, %v11300_v14, %v4007_v59  ;;  %v5538_v62 = vld [vmem:[%s13292_s0 + $0x18] sm:$0xf]  ;;  %v5542_v14 = vld [vmem:[%s13292_s0 + $0x34] sm:$0xf] }
 0x2ef   :  { %v5493_v22 = vsel %vm5480_vm2, %v5467_v55, %v5469_v39  ;;  %5476 = vrot.lane.b32.xlu1 %v11827_v57, %s9256_s24  ;;  %4567 = vmatprep.subr.bf16.mxu1 %v4046_v61  ;;  %v5562_v41 = vmax.bf16 %v13362_v49, %v5538_v62  ;;  %v5566_v24 = vmax.bf16 %v13362_v49, %v5542_v14  ;;  %v13437_v61 = vld [vmem:[#allocation15_spill] sm:$0xff]  ;;  %v5774_v14 = vld [vmem:[%s13292_s0 + $0x34] sm:$0xf] }
 0x2f0   :  { %5474 = vrot.lane.b32.xlu0 %v11831_v8, %s9256_s24  ;;  %6163 = vmatpush1.bf16.msra.mxu0 %v5493_v22 }
 0x2f1   :  { %4568 = vmatpush1.bf16.msra.mxu1 %v4045_v60  ;;  %v12003_v16 = vpop.permute.xlu1 %5674  ;;  %v8640_v20 = vcombine.low %v5562_v41, %v5566_v24  ;;  %v5798_v24 = vmax.bf16 %v13362_v49, %v5774_v14 }
 0x2f2   :  { %v5673_v35 = vpop.permute.xlu0 %5672 }
 0x2f3   :  { %5676 = vrot.lane.b32.xlu1 %v11700_v53, %s9257_s4  ;;  %v5714_v46 = vsel %vm5712_vm3, %v5673_v35, %v12003_v16 }
 0x2f4   :  { %5478 = vrot.lane.b32.xlu0 %v8633_v47, %s9256_s24  ;;  %6164 = vmatprep.subr.bf16.mxu0 %v5714_v46 }
 0x2f5   :  { %v4021_v25 = vpop.permute.xlu1 %4020 }
 0x2f6   :  { %v5671_v37 = vpop.permute.xlu0 %5670  ;;  %v4052_v26 = vsel %vm4042_vm13, %v4021_v25, %v11618_v2  ;;  %v4051_v0 = vsel %vm4042_vm13, %v11309_v5, %v4021_v25  ;;  %v5546_v2 = vld [vmem:[%s13292_s0 + $0x50] sm:$0xf]  ;;  %v5550_v5 = vld [vmem:[%s13292_s0 + $0x6c] sm:$0xf] }
 0x2f7   :  { %v5713_v18 = vsel %vm5712_vm3, %v5671_v37, %v5673_v35  ;;  %5680 = vrot.lane.b32.xlu1 %v11726_v3, %s9257_s4  ;;  %4569 = vmatprep.subr.bf16.mxu1 %v4052_v26  ;;  %v5570_v17 = vmax.bf16 %v13362_v49, %v5546_v2  ;;  %v5574_v63 = vmax.bf16 %v13362_v49, %v5550_v5  ;;  %v5782_v5 = vld [vmem:[%s13292_s0 + $0x6c] sm:$0xf] }
 0x2f8   :  { %5678 = vrot.lane.b32.xlu0 %v11731_v10, %s9257_s4  ;;  %6165 = vmatpush1.bf16.msra.mxu0 %v5713_v18 }
 0x2f9   :  { %4570 = vmatpush1.bf16.msra.mxu1 %v4051_v0  ;;  %v12027_v36 = vpop.permute.xlu1 %5688  ;;  %v8647_v56 = vcombine.low %v5570_v17, %v5574_v63  ;;  %v13438_v0 = vld [vmem:[#allocation17_spill] sm:$0xff]  ;;  %v5806_v63 = vmax.bf16 %v13362_v49, %v5782_v5 }
 0x2fa   :  { %v5687_v38 = vpop.permute.xlu0 %5686 }
 0x2fb   :  { %5690 = vrot.lane.b32.xlu1 %v11752_v28, %s9257_s4  ;;  %v5720_v27 = vsel %vm5712_vm3, %v5687_v38, %v12027_v36 }
 0x2fc   :  { %5682 = vrot.lane.b32.xlu0 %v8640_v20, %s9257_s4  ;;  %6166 = vmatprep.subr.bf16.mxu0 %v5720_v27 }
 0x2fd   :  { %v4035_v51 = vpop.permute.xlu1 %4034 }
 0x2fe   :  { %v5685_v31 = vpop.permute.xlu0 %5684  ;;  %v4058_v21 = vsel %vm4042_vm13, %v4035_v51, %v11632_v48  ;;  %v4057_v44 = vsel %vm4042_vm13, %v13436_v58, %v4035_v51  ;;  %v5554_v48 = vld [vmem:[%s13292_s0 + $0x88] sm:$0xf] }
 0x2ff   :  { %v5719_v54 = vsel %vm5712_vm3, %v5685_v31, %v5687_v38  ;;  %5694 = vrot.lane.b32.xlu1 %v11777_v23, %s9257_s4  ;;  %4571 = vmatprep.subr.bf16.mxu1 %v4058_v21  ;;  %v5578_v52 = vmax.bf16 %v13362_v49, %v5554_v48  ;;  %v13439_v58 = vld [vmem:[#allocation16_spill] sm:$0xff]  ;;  %v1265_v48 = vpop.f32.mrb[0].mxu1 }
 0x300   :  { %5692 = vrot.lane.b32.xlu0 %v11781_v50, %s9257_s4  ;;  %6167 = vmatpush1.bf16.msra.mxu0 %v5719_v54  ;;  %8867 = vst [vmem:[%s13294_s2] sm:$0xff] %v1265_v48  ;;  %v12228_v48 = vld [vmem:[%s13293_s1 + $0xd0] ss:$8 sps:$4 sm:$0xff]  }
 0x301   :  { %4572 = vmatpush1.bf16.msra.mxu1 %v4057_v44  ;;  %v12051_v1 = vpop.permute.xlu1 %5702  ;;  %v8654_v47 = vcombine.low %v5578_v52, %v5582_v43  ;;  %v1267_v43 = vpop.f32.mrb[1].mxu1 }
 0x302   :  { %v5701_v12 = vpop.permute.xlu0 %5700  ;;  %8870 = vst [vmem:[%s13294_s2 + $0x8] sm:$0xff] %v1267_v43 }
 0x303   :  { %5704 = vrot.lane.b32.xlu1 %v11802_v19, %s9257_s4  ;;  %v5726_v39 = vsel %vm5712_vm3, %v5701_v12, %v12051_v1 }
 0x304   :  { %5696 = vrot.lane.b32.xlu0 %v8647_v56, %s9257_s4  ;;  %6168 = vmatprep.subr.bf16.mxu0 %v5726_v39  ;;  %v6509_v56 = vld [vmem:[%s13292_s0] sm:$0xff] }
 0x305   :  { %v4239_v9 = vpop.permute.xlu1 %4238  ;;  %v5790_v39 = vld [vmem:[%s13292_s0 + $0xa4] sm:$0xf] }
 0x306   :  { %v5699_v59 = vpop.permute.xlu0 %5698  ;;  %v4278_v55 = vsel %vm4274_vm14, %v4239_v9, %v11649_v7  ;;  %v4277_v60 = vsel %vm4274_vm14, %v13437_v61, %v4239_v9  ;;  %v5770_v7 = vld [vmem:[%s13292_s0 + $0x18] sm:$0xf]  ;;  %v1269_v61 = vpop.f32.mrb[2].mxu1 }
 0x307   :  { %v5725_v22 = vsel %vm5712_vm3, %v5699_v59, %v5701_v12  ;;  %5708 = vrot.lane.b32.xlu1 %v11827_v57, %s9257_s4  ;;  %4573 = vmatprep.subr.bf16.mxu1 %v4278_v55  ;;  %v5794_v41 = vmax.bf16 %v13362_v49, %v5770_v7  ;;  %v5786_v12 = vld [vmem:[%s13292_s0 + $0x88] sm:$0xf]  ;;  %v6533_v59 = vmax.bf16 %v13362_v49, %v6509_v56  ;;  %v1271_v7 = vpop.f32.mrb[3].mxu1 }
 0x308   :  { %5706 = vrot.lane.b32.xlu0 %v11831_v8, %s9257_s4  ;;  %6169 = vmatpush1.bf16.msra.mxu0 %v5725_v22  ;;  %v5814_v22 = vmax.bf16 %v13362_v49, %v5790_v39  ;;  %8873 = vst [vmem:[%s13294_s2 + $0x30] sm:$0xff] %v1269_v61  ;;  %8876 = vst [vmem:[%s13294_s2 + $0x38] sm:$0xff] %v1271_v7 }
 0x309   :  { %4574 = vmatpush1.bf16.msra.mxu1 %v4277_v60  ;;  %v12075_v62 = vpop.permute.xlu1 %5906  ;;  %v8661_v20 = vcombine.low %v5794_v41, %v5798_v24  ;;  %v5810_v60 = vmax.bf16 %v13362_v49, %v5786_v12  ;;  %v9233_v41 = vld [vmem:[%s13293_s1 + $0x94] ss:$8 sps:$4 sm:$0xff]   ;;  %v9235_v12 = vld [vmem:[%s13293_s1 + $0xa4] ss:$8 sps:$4 sm:$0xff]  }
 0x30a   :  { %v5905_v35 = vpop.permute.xlu0 %5904 }
 0x30b   :  { %5908 = vrot.lane.b32.xlu1 %v11700_v53, %s9258_s5  ;;  %v5946_v46 = vsel %vm5944_vm4, %v5905_v35, %v12075_v62 }
 0x30c   :  { %5710 = vrot.lane.b32.xlu0 %v8654_v47, %s9257_s4  ;;  %6170 = vmatprep.subr.bf16.mxu0 %v5946_v46  ;;  %v6514_v47 = vld [vmem:[%s13292_s0 + $0x24] sm:$0xff]  ;;  %s9263_s4 = smov 8  }
 0x30d   :  { %v4253_v25 = vpop.permute.xlu1 %4252 }
 0x30e   :  { %v5903_v37 = vpop.permute.xlu0 %5902  ;;  %v4284_v26 = vsel %vm4274_vm14, %v4253_v25, %v11666_v29  ;;  %v4283_v18 = vsel %vm4274_vm14, %v13438_v0, %v4253_v25  ;;  %v5778_v29 = vld [vmem:[%s13292_s0 + $0x50] sm:$0xf]  ;;  %v12181_v0 = vld [vmem:[%s13293_s1 + $0xc0] ss:$8 sps:$4 sm:$0xff]  }
 0x30f   :  { %v5945_v53 = vsel %vm5944_vm4, %v5903_v37, %v5905_v35  ;;  %5912 = vrot.lane.b32.xlu1 %v11726_v3, %s9258_s5  ;;  %4575 = vmatprep.subr.bf16.mxu1 %v4284_v26  ;;  %v5802_v17 = vmax.bf16 %v13362_v49, %v5778_v29  ;;  %v9232_v35 = vld [vmem:[%s13293_s1 + $0x80] ss:$8 sps:$4 sm:$0xff]   ;;  %v6538_v26 = vmax.bf16 %v13362_v49, %v6514_v47 }
 0x310   :  { %5910 = vrot.lane.b32.xlu0 %v11731_v10, %s9258_s5  ;;  %6171 = vmatpush1.bf16.msra.mxu0 %v5945_v53 }
 0x311   :  { %4576 = vmatpush1.bf16.msra.mxu1 %v4283_v18  ;;  %v12099_v2 = vpop.permute.xlu1 %5920  ;;  %v8668_v54 = vcombine.low %v5802_v17, %v5806_v63  ;;  %v8675_v18 = vcombine.low %v5810_v60, %v5814_v22  ;;  %v6518_v63 = vld [vmem:[%s13292_s0 + $0x40] sm:$0xff]  ;;  %v6525_v22 = vld [vmem:[%s13292_s0 + $0x70] sm:$0xff] }
 0x312   :  { %v5919_v38 = vpop.permute.xlu0 %5918  ;;  %v6542_v56 = vmax.bf16 %v13362_v49, %v6518_v63 }
 0x313   :  { %5922 = vrot.lane.b32.xlu1 %v11752_v28, %s9258_s5  ;;  %v5952_v27 = vsel %vm5944_vm4, %v5919_v38, %v12099_v2 }
 0x314   :  { %5914 = vrot.lane.b32.xlu0 %v8661_v20, %s9258_s5  ;;  %6172 = vmatprep.subr.bf16.mxu0 %v5952_v27  ;;  %v12188_v20 = vld [vmem:[%s13293_s1 + $0xd4] ss:$8 sps:$4 sm:$0xff]  }
 0x315   :  { %v4267_v51 = vpop.permute.xlu1 %4266 }
 0x316   :  { %v5917_v31 = vpop.permute.xlu0 %5916  ;;  %v4290_v21 = vsel %vm4274_vm14, %v4267_v51, %v11692_v11  ;;  %v4289_v44 = vsel %vm4274_vm14, %v13439_v58, %v4267_v51  ;;  %v6513_v11 = vld [vmem:[%s13292_s0 + $0x1c] sm:$0xff] }
 0x317   :  { %v5951_v28 = vsel %vm5944_vm4, %v5917_v31, %v5919_v38  ;;  %5926 = vrot.lane.b32.xlu1 %v11777_v23, %s9258_s5  ;;  %4577 = vmatprep.subr.bf16.mxu1 %v4290_v21  ;;  %v6537_v55 = vmax.bf16 %v13362_v49, %v6513_v11  ;;  %v6522_v51 = vld [vmem:[%s13292_s0 + $0x5c] sm:$0xff] }
 0x318   :  { %5924 = vrot.lane.b32.xlu0 %v11781_v50, %s9258_s5  ;;  %6173 = vmatpush1.bf16.msra.mxu0 %v5951_v28  ;;  %v6517_v21 = vld [vmem:[%s13292_s0 + $0x38] sm:$0xff]  ;;  %v6546_v11 = vmax.bf16 %v13362_v49, %v6522_v51 }
 0x319   :  { %4578 = vmatpush1.bf16.msra.mxu1 %v4289_v44  ;;  %v12129_v34 = vpop.permute.xlu1 %5934  ;;  %v12174_v25 = vcombine.high %v6533_v59, %v6537_v55  ;;  %v12215_v44 = vcombine.low %v6533_v59, %v6537_v55  ;;  %v9234_v28 = vld [vmem:[%s13293_s1 + $0x90] ss:$8 sps:$4 sm:$0xff]   ;;  %v12242_v59 = vld [vmem:[%s13293_s1 + $0xe4] ss:$8 sps:$4 sm:$0xff]  }
 0x31a   :  { %v5933_v52 = vpop.permute.xlu0 %5932  ;;  %v12247_v60 = vcombine.low %v6542_v56, %v6546_v11 }
 0x31b   :  { %5936 = vrot.lane.b32.xlu1 %v11802_v19, %s9258_s5  ;;  %v5958_v9 = vsel %vm5944_vm4, %v5933_v52, %v12129_v34  ;;  %v6510_v19 = vld [vmem:[%s13292_s0 + $0x8] sm:$0xff] }
 0x31c   :  { %5928 = vrot.lane.b32.xlu0 %v8668_v54, %s9258_s5  ;;  %6174 = vmatprep.subr.bf16.mxu0 %v5958_v9  ;;  %v6534_v37 = vmax.bf16 %v13362_v49, %v6510_v19  ;;  %v6529_v19 = vld [vmem:[%s13292_s0 + $0x8c] sm:$0xff] }
 0x31d   :  { %v4981_v14 = vpop.permute.xlu1 %4980  ;;  %4582 = vmatmul.mubr.bf16.vlgmr.msra.gmra.mrb[16].mxu1 %v9232_v35 }
 0x31e   :  { %v5931_v46 = vpop.permute.xlu0 %5930  ;;  %8564 = vmatprep.mubr.msk.bf16.mxu1 %vm1218_vm1, %v9233_v41  ;;  %v12193_v38 = vcombine.high %v6534_v37, %v6538_v26  ;;  %v5019_v27 = vsel %vm5016_vm15, %v11714_v45, %v4981_v14  ;;  %v12199_v17 = vcombine.low %v6534_v37, %v6538_v26  ;;  %v6521_v45 = vld [vmem:[%s13292_s0 + $0x54] sm:$0xff]  ;;  %v6553_v41 = vmax.bf16 %v13362_v49, %v6529_v19 }
 0x31f   :  { %v5957_v24 = vsel %vm5944_vm4, %v5931_v46, %v5933_v52  ;;  %5940 = vrot.lane.b32.xlu1 %v11827_v57, %s9258_s5  ;;  %v6541_v52 = vmax.bf16 %v13362_v49, %v6517_v21  ;;  %v6545_v43 = vmax.bf16 %v13362_v49, %v6521_v45  ;;  %v6549_v46 = vmax.bf16 %v13362_v49, %v6525_v22  ;;  %v9237_v37 = vld [vmem:[%s13293_s1 + $0xb4] ss:$8 sps:$4 sm:$0xff]  }
 0x320   :  { %5938 = vrot.lane.b32.xlu0 %v11831_v8, %s9258_s5  ;;  %6175 = vmatpush1.bf16.msra.mxu0 %v5957_v24  ;;  %v12275_v24 = vld [vmem:[%s13293_s1 + $0xe0] ss:$8 sps:$4 sm:$0xff]   ;;  %v6743_v19 = vld [vmem:[%s13292_s0 + $0x10] sm:$0xff] }
 0x321   :  { %v4985_v53 = vpop.permute.xlu1 %4984  ;;  %v12260_v7 = vcombine.high %v6541_v52, %v6545_v43  ;;  %v12297_v51 = vcombine.high %v6549_v46, %v6553_v41 }
 0x322   :  { %v4983_v29 = vpop.permute.xlu0 %4982 }
 0x323   :  { %6646 = vrot.lane.b32.xlu1 %v12174_v25, %s9259_s25  ;;  %v5020_v5 = vsel %vm5016_vm15, %v4981_v14, %v4983_v29  ;;  %6179 = vmatmul.mubr.bf16.vlgmr.msra.gmra.mrb[0].mxu0 %v12181_v0  ;;  %v5021_v39 = vsel %vm5016_vm15, %v4983_v29, %v4985_v53  ;;  %v6530_v29 = vld [vmem:[%s13292_s0 + $0x94] sm:$0xff] }
 0x324   :  { %5942 = vrot.lane.b32.xlu0 %v8675_v18, %s9258_s5  ;;  %6219 = vmatprep.subr.bf16.mxu1 %v5020_v5  ;;  %v12284_v18 = vcombine.high %v6542_v56, %v6546_v11  ;;  %v6554_v45 = vmax.bf16 %v13362_v49, %v6530_v29  ;;  %v9238_v56 = vld [vmem:[%s13293_s1 + $0xb0] ss:$8 sps:$4 sm:$0xff]  }
 0x325   :  { %6220 = vmatpush1.bf16.msra.mxu1 %v5019_v27  ;;  %v4995_v31 = vpop.permute.xlu1 %4994  ;;  %8693 = vmatprep.mubr.msk.bf16.mxu0 %vm1218_vm1, %v12188_v20  ;;  %v12295_v27 = vld [vmem:[%s13293_s1 + $0xf4] ss:$8 sps:$4 sm:$0xff]  }
 0x326   :  { %v4987_v58 = vpop.permute.xlu0 %4986  ;;  %4592 = vmatmul.mubr.bf16.gmra.mrb[20].mxu1 %v9234_v28  ;;  %v5025_v47 = vsel %vm5016_vm15, %v11765_v33, %v4995_v31  ;;  %v12309_v28 = vcombine.low %v6541_v52, %v6545_v43 }
 0x327   :  { %6650 = vrot.lane.b32.xlu1 %v12193_v38, %s9259_s25  ;;  %v5022_v54 = vsel %vm5016_vm15, %v4985_v53, %v4987_v58  ;;  %8565 = vmatprep.mubr.msk.bf16.mxu1 %vm1218_vm1, %v9235_v12  ;;  %v6526_v53 = vld [vmem:[%s13292_s0 + $0x78] sm:$0xff] }
 0x328   :  { %6648 = vrot.lane.b32.xlu0 %v12199_v17, %s9259_s25  ;;  %6292 = vmatprep.subr.bf16.mxu0 %v5022_v54  ;;  %v6550_v21 = vmax.bf16 %v13362_v49, %v6526_v53 }
 0x329   :  { %6293 = vmatpush1.bf16.msra.mxu0 %v5021_v39  ;;  %v4999_v9 = vpop.permute.xlu1 %4998 }
 0x32a   :  { %v4997_v55 = vpop.permute.xlu0 %4996  ;;  %v12319_v12 = vcombine.high %v6550_v21, %v6554_v45  ;;  %v12331_v52 = vcombine.low %v6550_v21, %v6554_v45 }
 0x32b   :  { %6644 = vrot.lane.b32.xlu1 %v12215_v44, %s9259_s25  ;;  %v5026_v61 = vsel %vm5016_vm15, %v4995_v31, %v4997_v55  ;;  %6189 = vmatmul.mubr.bf16.gmra.mrb[4].mxu0 %v12228_v48  ;;  %v5027_v26 = vsel %vm5016_vm15, %v4997_v55, %v4999_v9 }
 0x32c   :  { %6652 = vrot.lane.b32.xlu0 %v11731_v10, %s9259_s25  ;;  %6221 = vmatprep.subr.bf16.mxu1 %v5026_v61  ;;  %v9236_v10 = vld [vmem:[%s13293_s1 + $0xa0] ss:$8 sps:$4 sm:$0xff]   ;;  %v12336_v61 = vcombine.low %v6549_v46, %v6553_v41  ;;  %v12358_v41 = vmax.bf16 %v13362_v49, %v6743_v19 }
 0x32d   :  { %6222 = vmatpush1.bf16.msra.mxu1 %v5025_v47  ;;  %v5009_v14 = vpop.permute.xlu1 %5008  ;;  %8694 = vmatprep.mubr.msk.bf16.mxu0 %vm1218_vm1, %v12242_v59  ;;  %v6747_v47 = vld [vmem:[%s13292_s0 + $0x2c] sm:$0xff] }
 0x32e   :  { %v5001_v35 = vpop.permute.xlu0 %5000  ;;  %4602 = vmatmul.mubr.bf16.gmra.mrb[24].mxu1 %v9236_v10  ;;  %v5031_v58 = vsel %vm5016_vm15, %v11815_v32, %v5009_v14  ;;  %v12324_v32 = vld [vmem:[%s13293_s1 + $0xf0] ss:$8 sps:$4 sm:$0xff]   ;;  %v12361_v10 = vmax.bf16 %v13362_v49, %v6747_v47 }
 0x32f   :  { %6662 = vrot.lane.b32.xlu1 %v12247_v60, %s9259_s25  ;;  %v5028_v33 = vsel %vm5016_vm15, %v4999_v9, %v5001_v35  ;;  %8566 = vmatprep.mubr.msk.bf16.mxu1 %vm1218_vm1, %v9237_v37 }
 0x330   :  { %6660 = vrot.lane.b32.xlu0 %v12260_v7, %s9259_s25  ;;  %6294 = vmatprep.subr.bf16.mxu0 %v5028_v33 }
 0x331   :  { %6295 = vmatpush1.bf16.msra.mxu0 %v5027_v26  ;;  %v5013_v5 = vpop.permute.xlu1 %5012 }
 0x332   :  { %v5011_v63 = vpop.permute.xlu0 %5010 }
 0x333   :  { %6666 = vrot.lane.b32.xlu1 %v11781_v50, %s9259_s25  ;;  %v5032_v31 = vsel %vm5016_vm15, %v5009_v14, %v5011_v63  ;;  %6199 = vmatmul.mubr.bf16.gmra.mrb[8].mxu0 %v12275_v24  ;;  %v5033_v39 = vsel %vm5016_vm15, %v5011_v63, %v5013_v5  ;;  %v1275_v14 = vpop.f32.mrb[4].mxu1 }
 0x334   :  { %6664 = vrot.lane.b32.xlu0 %v12284_v18, %s9259_s25  ;;  %6223 = vmatprep.subr.bf16.mxu1 %v5032_v31  ;;  %8879 = vst [vmem:[%s13294_s2 + $0x60] sm:$0xff] %v1275_v14  ;;  %v1277_v33 = vpop.f32.mrb[5].mxu1 }
 0x335   :  { %6224 = vmatpush1.bf16.msra.mxu1 %v5031_v58  ;;  %v5213_v54 = vpop.permute.xlu1 %5212  ;;  %8695 = vmatprep.mubr.msk.bf16.mxu0 %vm1218_vm1, %v12295_v27  ;;  %8882 = vst [vmem:[%s13294_s2 + $0x68] sm:$0xff] %v1277_v33  ;;  %v1279_v37 = vpop.f32.mrb[6].mxu1 }
 0x336   :  { %v5015_v50 = vpop.permute.xlu0 %5014  ;;  %4612 = vmatmul.mubr.bf16.gmra.mrb[28].mxu1 %v9238_v56  ;;  %v5251_v22 = vsel %vm5248_vm0, %v11851_v13, %v5213_v54  ;;  %8885 = vst [vmem:[%s13294_s2 + $0x90] sm:$0xff] %v1279_v37  ;;  %v1281_v53 = vpop.f32.mrb[7].mxu1  ;;  %v6759_v37 = vld [vmem:[%s13292_s0 + $0x80] sm:$0xff] }
 0x337   :  { %6674 = vrot.lane.b32.xlu1 %v12297_v51, %s9259_s25  ;;  %v5034_v11 = vsel %vm5016_vm15, %v5013_v5, %v5015_v50  ;;  %8696 = vmatprep.mubr.msk.bf16.mxu1 %vm1218_vm1, %v11862_v30  ;;  %8888 = vst [vmem:[%s13294_s2 + $0x98] sm:$0xff] %v1281_v53  ;;  %v12380_v5 = vcombine.low %v12358_v41, %v12361_v10  ;;  %v1285_v31 = vpop.f32.mrb[8].mxu1 }
 0x338   :  { %6658 = vrot.lane.b32.xlu0 %v12309_v28, %s9259_s25  ;;  %6296 = vmatprep.subr.bf16.mxu0 %v5034_v11  ;;  %8891 = vst [vmem:[%s13294_s2 + $0xc0] sm:$0xff] %v1285_v31  ;;  %v1287_v58 = vpop.f32.mrb[9].mxu1 }
 0x339   :  { %6297 = vmatpush1.bf16.msra.mxu0 %v5033_v39  ;;  %v5217_v43 = vpop.permute.xlu1 %5216  ;;  %8894 = vst [vmem:[%s13294_s2 + $0xc8] sm:$0xff] %v1287_v58  ;;  %v1289_v50 = vpop.f32.mrb[10].mxu1  ;;  %v6751_v39 = vld [vmem:[%s13292_s0 + $0x48] sm:$0xff] }
 0x33a   :  { %v5215_v9 = vpop.permute.xlu0 %5214  ;;  %8897 = vst [vmem:[%s13294_s2 + $0xf0] sm:$0xff] %v1289_v50  ;;  %v1291_v56 = vpop.f32.mrb[11].mxu1  ;;  %v12418_v19 = vmax.bf16 %v13362_v49, %v6751_v39 }
 0x33b   :  { %6678 = vrot.lane.b32.xlu1 %v12319_v12, %s9259_s25  ;;  %v5252_v55 = vsel %vm5248_vm0, %v5213_v54, %v5215_v9  ;;  %6209 = vmatmul.mubr.bf16.gmra.mrb[12].mxu0 %v12324_v32  ;;  %8900 = vst [vmem:[%s13294_s2 + $0xf8] sm:$0xff] %v1291_v56  ;;  %v1295_v14 = vpop.f32.mrb[12].mxu1 }
 0x33c   :  { %6676 = vrot.lane.b32.xlu0 %v12331_v52, %s9259_s25  ;;  %6225 = vmatprep.subr.bf16.mxu1 %v5252_v55  ;;  %8903 = vst [vmem:[%s13294_s2 + $0x120] sm:$0xff] %v1295_v14 }
 0x33d   :  { %6226 = vmatpush1.bf16.msra.mxu1 %v5251_v22  ;;  %v5227_v35 = vpop.permute.xlu1 %5226  ;;  %8700 = vmatprep.mubr.msk.bf16.mxu0 %vm1218_vm1, %v11862_v30  ;;  %v5253_v30 = vsel %vm5248_vm0, %v5215_v9, %v5217_v43 }
 0x33e   :  { %v5219_v46 = vpop.permute.xlu0 %5218  ;;  %v5257_v63 = vsel %vm5248_vm0, %v11883_v4, %v5227_v35 }
 0x33f   :  { %6672 = vrot.lane.b32.xlu1 %v12336_v61, %s9259_s25  ;;  %v5254_v13 = vsel %vm5248_vm0, %v5217_v43, %v5219_v46  ;;  %v6755_v43 = vld [vmem:[%s13292_s0 + $0x64] sm:$0xff] }
 0x340   :  { %6680 = vrot.lane.b32.xlu0 %v11831_v8, %s9259_s25  ;;  %6298 = vmatprep.subr.bf16.mxu0 %v5254_v13  ;;  %v12421_v47 = vmax.bf16 %v13362_v49, %v6755_v43 }
 0x341   :  { %6299 = vmatpush1.bf16.msra.mxu0 %v5253_v30  ;;  %v5231_v26 = vpop.permute.xlu1 %5230 }
 0x342   :  { %v5229_v29 = vpop.permute.xlu0 %5228  ;;  %v12434_v30 = vcombine.low %v12418_v19, %v12421_v47 }
 0x343   :  { %6880 = vrot.lane.b32.xlu1 %v12199_v17, %s9260_s16  ;;  %v5258_v8 = vsel %vm5248_vm0, %v5227_v35, %v5229_v29  ;;  %v5259_v4 = vsel %vm5248_vm0, %v5229_v29, %v5231_v26 }
 0x344   :  { %6878 = vrot.lane.b32.xlu0 %v12174_v25, %s9260_s16  ;;  %6227 = vmatprep.subr.bf16.mxu1 %v5258_v8 }
 0x345   :  { %6228 = vmatpush1.bf16.msra.mxu1 %v5257_v63  ;;  %v5241_v21 = vpop.permute.xlu1 %5240 }
 0x346   :  { %v5233_v45 = vpop.permute.xlu0 %5232  ;;  %v5263_v22 = vsel %vm5248_vm0, %v11907_v6, %v5241_v21  ;;  %v1297_v6 = vpop.f32.mrb[13].mxu1 }
 0x347   :  { %6884 = vrot.lane.b32.xlu1 %v12380_v5, %s9260_s16  ;;  %v5260_v54 = vsel %vm5248_vm0, %v5231_v26, %v5233_v45  ;;  %v6763_v26 = vld [vmem:[%s13292_s0 + $0x9c] sm:$0xff]  ;;  %8906 = vst [vmem:[%s13294_s2 + $0x128] sm:$0xff] %v1297_v6  ;;  %v1299_v53 = vpop.f32.mrb[14].mxu1 }
 0x348   :  { %6882 = vrot.lane.b32.xlu0 %v12193_v38, %s9260_s16  ;;  %6300 = vmatprep.subr.bf16.mxu0 %v5260_v54  ;;  %8909 = vst [vmem:[%s13294_s2 + $0x150] sm:$0xff] %v1299_v53  ;;  %v1301_v8 = vpop.f32.mrb[15].mxu1  ;;  %v12458_v45 = vmax.bf16 %v13362_v49, %v6763_v26 }
 0x349   :  { %6301 = vmatpush1.bf16.msra.mxu0 %v5259_v4  ;;  %v5245_v11 = vpop.permute.xlu1 %5244  ;;  %8912 = vst [vmem:[%s13294_s2 + $0x158] sm:$0xff] %v1301_v8 }
 0x34a   :  { %v5243_v9 = vpop.permute.xlu0 %5242 }
 0x34b   :  { %6892 = vrot.lane.b32.xlu1 %v12260_v7, %s9260_s16  ;;  %v5264_v55 = vsel %vm5248_vm0, %v5241_v21, %v5243_v9  ;;  %v5265_v33 = vsel %vm5248_vm0, %v5243_v9, %v5245_v11  ;;  %v12455_v21 = vmax.bf16 %v13362_v49, %v6759_v37 }
 0x34c   :  { %6876 = vrot.lane.b32.xlu0 %v12215_v44, %s9260_s16  ;;  %6229 = vmatprep.subr.bf16.mxu1 %v5264_v55 }
 0x34d   :  { %6230 = vmatpush1.bf16.msra.mxu1 %v5263_v22  ;;  %v5445_v35 = vpop.permute.xlu1 %5444  ;;  %v12469_v56 = vcombine.low %v12455_v21, %v12458_v45 }
 0x34e   :  { %v5247_v46 = vpop.permute.xlu0 %5246  ;;  %v5483_v58 = vsel %vm5480_vm2, %v11931_v42, %v5445_v35 }
 0x34f   :  { %6896 = vrot.lane.b32.xlu1 %v12284_v18, %s9260_s16  ;;  %v5266_v13 = vsel %vm5248_vm0, %v5245_v11, %v5247_v46 }
 0x350   :  { %6894 = vrot.lane.b32.xlu0 %v12247_v60, %s9260_s16  ;;  %6302 = vmatprep.subr.bf16.mxu0 %v5266_v13 }
 0x351   :  { %6303 = vmatpush1.bf16.msra.mxu0 %v5265_v33  ;;  %v5449_v29 = vpop.permute.xlu1 %5448 }
 0x352   :  { %v5447_v63 = vpop.permute.xlu0 %5446 }
 0x353   :  { %6890 = vrot.lane.b32.xlu1 %v12309_v28, %s9260_s16  ;;  %v5484_v31 = vsel %vm5480_vm2, %v5445_v35, %v5447_v63  ;;  %v5485_v11 = vsel %vm5480_vm2, %v5447_v63, %v5449_v29 }
 0x354   :  { %6898 = vrot.lane.b32.xlu0 %v12434_v30, %s9260_s16  ;;  %6231 = vmatprep.subr.bf16.mxu1 %v5484_v31 }
 0x355   :  { %6232 = vmatpush1.bf16.msra.mxu1 %v5483_v58  ;;  %v5459_v54 = vpop.permute.xlu1 %5458 }
 0x356   :  { %v5451_v50 = vpop.permute.xlu0 %5450  ;;  %v5489_v9 = vsel %vm5480_vm2, %v11955_v40, %v5459_v54 }
 0x357   :  { %6908 = vrot.lane.b32.xlu1 %v12331_v52, %s9260_s16  ;;  %v5486_v4 = vsel %vm5480_vm2, %v5449_v29, %v5451_v50 }
 0x358   :  { %6906 = vrot.lane.b32.xlu0 %v12297_v51, %s9260_s16  ;;  %6304 = vmatprep.subr.bf16.mxu0 %v5486_v4 }
 0x359   :  { %6305 = vmatpush1.bf16.msra.mxu0 %v5485_v11  ;;  %v5463_v42 = vpop.permute.xlu1 %5462 }
 0x35a   :  { %v5461_v39 = vpop.permute.xlu0 %5460 }
 0x35b   :  { %6912 = vrot.lane.b32.xlu1 %v12469_v56, %s9260_s16  ;;  %v5490_v43 = vsel %vm5480_vm2, %v5459_v54, %v5461_v39  ;;  %v5491_v35 = vsel %vm5480_vm2, %v5461_v39, %v5463_v42 }
 0x35c   :  { %6910 = vrot.lane.b32.xlu0 %v12319_v12, %s9260_s16  ;;  %6233 = vmatprep.subr.bf16.mxu1 %v5490_v43 }
 0x35d   :  { %6234 = vmatpush1.bf16.msra.mxu1 %v5489_v9  ;;  %v5473_v55 = vpop.permute.xlu1 %5472 }
 0x35e   :  { %v5465_v22 = vpop.permute.xlu0 %5464  ;;  %v5495_v6 = vsel %vm5480_vm2, %v11979_v15, %v5473_v55 }
 0x35f   :  { %7110 = vrot.lane.b32.xlu1 %v12174_v25, %s9261_s29  ;;  %v5492_v14 = vsel %vm5480_vm2, %v5463_v42, %v5465_v22 }
 0x360   :  { %6904 = vrot.lane.b32.xlu0 %v12336_v61, %s9260_s16  ;;  %6306 = vmatprep.subr.bf16.mxu0 %v5492_v14 }
 0x361   :  { %6307 = vmatpush1.bf16.msra.mxu0 %v5491_v35  ;;  %v5477_v46 = vpop.permute.xlu1 %5476 }
 0x362   :  { %v5475_v13 = vpop.permute.xlu0 %5474 }
 0x363   :  { %7114 = vrot.lane.b32.xlu1 %v12193_v38, %s9261_s29  ;;  %v5496_v40 = vsel %vm5480_vm2, %v5473_v55, %v5475_v13  ;;  %v5497_v53 = vsel %vm5480_vm2, %v5475_v13, %v5477_v46 }
 0x364   :  { %7112 = vrot.lane.b32.xlu0 %v12199_v17, %s9261_s29  ;;  %6235 = vmatprep.subr.bf16.mxu1 %v5496_v40 }
 0x365   :  { %6236 = vmatpush1.bf16.msra.mxu1 %v5495_v6  ;;  %v5677_v33 = vpop.permute.xlu1 %5676 }
 0x366   :  { %v5479_v37 = vpop.permute.xlu0 %5478  ;;  %v5715_v63 = vsel %vm5712_vm3, %v12003_v16, %v5677_v33 }
 0x367   :  { %7108 = vrot.lane.b32.xlu1 %v12215_v44, %s9261_s29  ;;  %v5498_v26 = vsel %vm5480_vm2, %v5477_v46, %v5479_v37 }
 0x368   :  { %7116 = vrot.lane.b32.xlu0 %v12380_v5, %s9261_s29  ;;  %6308 = vmatprep.subr.bf16.mxu0 %v5498_v26 }
 0x369   :  { %6309 = vmatpush1.bf16.msra.mxu0 %v5497_v53  ;;  %v5681_v29 = vpop.permute.xlu1 %5680 }
 0x36a   :  { %v5679_v8 = vpop.permute.xlu0 %5678 }
 0x36b   :  { %7126 = vrot.lane.b32.xlu1 %v12247_v60, %s9261_s29  ;;  %v5716_v15 = vsel %vm5712_vm3, %v5677_v33, %v5679_v8  ;;  %v5717_v50 = vsel %vm5712_vm3, %v5679_v8, %v5681_v29 }
 0x36c   :  { %7124 = vrot.lane.b32.xlu0 %v12260_v7, %s9261_s29  ;;  %6237 = vmatprep.subr.bf16.mxu1 %v5716_v15 }
 0x36d   :  { %6238 = vmatpush1.bf16.msra.mxu1 %v5715_v63  ;;  %v5691_v31 = vpop.permute.xlu1 %5690 }
 0x36e   :  { %v5683_v58 = vpop.permute.xlu0 %5682  ;;  %v5721_v42 = vsel %vm5712_vm3, %v12027_v36, %v5691_v31 }
 0x36f   :  { %7130 = vrot.lane.b32.xlu1 %v12434_v30, %s9261_s29  ;;  %v5718_v54 = vsel %vm5712_vm3, %v5681_v29, %v5683_v58 }
 0x370   :  { %7128 = vrot.lane.b32.xlu0 %v12284_v18, %s9261_s29  ;;  %6310 = vmatprep.subr.bf16.mxu0 %v5718_v54 }
 0x371   :  { %6311 = vmatpush1.bf16.msra.mxu0 %v5717_v50  ;;  %v5695_v4 = vpop.permute.xlu1 %5694 }
 0x372   :  { %v5693_v11 = vpop.permute.xlu0 %5692 }
 0x373   :  { %7138 = vrot.lane.b32.xlu1 %v12297_v51, %s9261_s29  ;;  %v5722_v16 = vsel %vm5712_vm3, %v5691_v31, %v5693_v11  ;;  %v5723_v55 = vsel %vm5712_vm3, %v5693_v11, %v5695_v4 }
 0x374   :  { %7122 = vrot.lane.b32.xlu0 %v12309_v28, %s9261_s29  ;;  %6239 = vmatprep.subr.bf16.mxu1 %v5722_v16  ;;  %v12565_v16 = vpop.f32.mrb[32].mxu1 }
 0x375   :  { %6240 = vmatpush1.bf16.msra.mxu1 %v5721_v42  ;;  %v5705_v39 = vpop.permute.xlu1 %5704 }
 0x376   :  { %v5697_v43 = vpop.permute.xlu0 %5696  ;;  %v5727_v35 = vsel %vm5712_vm3, %v12051_v1, %v5705_v39 }
 0x377   :  { %7142 = vrot.lane.b32.xlu1 %v12319_v12, %s9261_s29  ;;  %v5724_v9 = vsel %vm5712_vm3, %v5695_v4, %v5697_v43  ;;  %v12570_v43 = vpop.f32.mrb[33].mxu1 }
 0x378   :  { %7140 = vrot.lane.b32.xlu0 %v12331_v52, %s9261_s29  ;;  %6312 = vmatprep.subr.bf16.mxu0 %v5724_v9 }
 0x379   :  { %6313 = vmatpush1.bf16.msra.mxu0 %v5723_v55  ;;  %v5709_v22 = vpop.permute.xlu1 %5708  ;;  %v12576_v55 = vpop.f32.mrb[34].mxu1 }
 0x37a   :  { %v5707_v14 = vpop.permute.xlu0 %5706 }
 0x37b   :  { %7136 = vrot.lane.b32.xlu1 %v12336_v61, %s9261_s29  ;;  %v5728_v36 = vsel %vm5712_vm3, %v5705_v39, %v5707_v14  ;;  %v5729_v6 = vsel %vm5712_vm3, %v5707_v14, %v5709_v22  ;;  %v12578_v14 = vpop.f32.mrb[35].mxu1 }
 0x37c   :  { %7144 = vrot.lane.b32.xlu0 %v12469_v56, %s9261_s29  ;;  %6241 = vmatprep.subr.bf16.mxu1 %v5728_v36 }
 0x37d   :  { %6242 = vmatpush1.bf16.msra.mxu1 %v5727_v35  ;;  %v5909_v46 = vpop.permute.xlu1 %5908 }
 0x37e   :  { %v5711_v13 = vpop.permute.xlu0 %5710  ;;  %v5947_v26 = vsel %vm5944_vm4, %v12075_v62, %v5909_v46 }
 0x37f   :  { %7344 = vrot.lane.b32.xlu1 %v12199_v17, %s9262_s22  ;;  %v5730_v40 = vsel %vm5712_vm3, %v5709_v22, %v5711_v13 }
 0x380   :  { %7342 = vrot.lane.b32.xlu0 %v12174_v25, %s9262_s22  ;;  %6314 = vmatprep.subr.bf16.mxu0 %v5730_v40 }
 0x381   :  { %6315 = vmatpush1.bf16.msra.mxu0 %v5729_v6  ;;  %v5913_v33 = vpop.permute.xlu1 %5912 }
 0x382   :  { %v5911_v37 = vpop.permute.xlu0 %5910 }
 0x383   :  { %7348 = vrot.lane.b32.xlu1 %v12380_v5, %s9262_s22  ;;  %v5948_v1 = vsel %vm5944_vm4, %v5909_v46, %v5911_v37  ;;  %v5949_v15 = vsel %vm5944_vm4, %v5911_v37, %v5913_v33 }
 0x384   :  { %7346 = vrot.lane.b32.xlu0 %v12193_v38, %s9262_s22  ;;  %6243 = vmatprep.subr.bf16.mxu1 %v5948_v1 }
 0x385   :  { %6244 = vmatpush1.bf16.msra.mxu1 %v5947_v26  ;;  %v5923_v53 = vpop.permute.xlu1 %5922 }
 0x386   :  { %v5915_v29 = vpop.permute.xlu0 %5914  ;;  %v5953_v58 = vsel %vm5944_vm4, %v12099_v2, %v5923_v53 }
 0x387   :  { %7356 = vrot.lane.b32.xlu1 %v12260_v7, %s9262_s22  ;;  %v5950_v8 = vsel %vm5944_vm4, %v5913_v33, %v5915_v29 }
 0x388   :  { %7340 = vrot.lane.b32.xlu0 %v12215_v44, %s9262_s22  ;;  %6316 = vmatprep.subr.bf16.mxu0 %v5950_v8 }
 0x389   :  { %6317 = vmatpush1.bf16.msra.mxu0 %v5949_v15  ;;  %v5927_v63 = vpop.permute.xlu1 %5926 }
 0x38a   :  { %v5925_v31 = vpop.permute.xlu0 %5924 }
 0x38b   :  { %7360 = vrot.lane.b32.xlu1 %v12284_v18, %s9262_s22  ;;  %v5954_v62 = vsel %vm5944_vm4, %v5923_v53, %v5925_v31  ;;  %v5955_v11 = vsel %vm5944_vm4, %v5925_v31, %v5927_v63  ;;  %v6520_v31 = vld [vmem:[%s13292_s0 + $0x50] sm:$0xf] }
 0x38c   :  { %7358 = vrot.lane.b32.xlu0 %v12247_v60, %s9262_s22  ;;  %6245 = vmatprep.subr.bf16.mxu1 %v5954_v62  ;;  %v6524_v62 = vld [vmem:[%s13292_s0 + $0x6c] sm:$0xf] }
 0x38d   :  { %6246 = vmatpush1.bf16.msra.mxu1 %v5953_v58  ;;  %v5937_v54 = vpop.permute.xlu1 %5936 }
 0x38e   :  { %v5929_v50 = vpop.permute.xlu0 %5928  ;;  %v5959_v9 = vsel %vm5944_vm4, %v12129_v34, %v5937_v54 }
 0x38f   :  { %7354 = vrot.lane.b32.xlu1 %v12309_v28, %s9262_s22  ;;  %v5956_v4 = vsel %vm5944_vm4, %v5927_v63, %v5929_v50 }
 0x390   :  { %7362 = vrot.lane.b32.xlu0 %v12434_v30, %s9262_s22  ;;  %6318 = vmatprep.subr.bf16.mxu0 %v5956_v4  ;;  %v6544_v4 = vmax.bf16 %v13362_v49, %v6520_v31 }
 0x391   :  { %6319 = vmatpush1.bf16.msra.mxu0 %v5955_v11  ;;  %v5941_v42 = vpop.permute.xlu1 %5940  ;;  %v6548_v11 = vmax.bf16 %v13362_v49, %v6524_v62 }
 0x392   :  { %v5939_v39 = vpop.permute.xlu0 %5938 }
 0x393   :  { %7372 = vrot.lane.b32.xlu1 %v12331_v52, %s9262_s22  ;;  %v5960_v2 = vsel %vm5944_vm4, %v5937_v54, %v5939_v39  ;;  %v5961_v46 = vsel %vm5944_vm4, %v5939_v39, %v5941_v42  ;;  %v6528_v39 = vld [vmem:[%s13292_s0 + $0x88] sm:$0xf] }
 0x394   :  { %7370 = vrot.lane.b32.xlu0 %v12297_v51, %s9262_s22  ;;  %6247 = vmatprep.subr.bf16.mxu1 %v5960_v2  ;;  %v6532_v2 = vld [vmem:[%s13292_s0 + $0xa4] sm:$0xf] }
 0x395   :  { %6248 = vmatpush1.bf16.msra.mxu1 %v5959_v9  ;;  %v6647_v22 = vpop.permute.xlu1 %6646 }
 0x396   :  { %v5943_v36 = vpop.permute.xlu0 %5942 }
 0x397   :  { %7376 = vrot.lane.b32.xlu1 %v12469_v56, %s9262_s22  ;;  %v5962_v35 = vsel %vm5944_vm4, %v5941_v42, %v5943_v36 }
 0x398   :  { %7374 = vrot.lane.b32.xlu0 %v12319_v12, %s9262_s22  ;;  %6320 = vmatprep.subr.bf16.mxu0 %v5962_v35  ;;  %v8717_v35 = vcombine.low %v6544_v4, %v6548_v11  ;;  %v12774_v11 = vcombine.high %v12418_v19, %v12421_v47  ;;  %v12788_v19 = vcombine.high %v12455_v21, %v12458_v45  ;;  %v6984_v47 = vld [vmem:[%s13292_s0 + $0x50] sm:$0xf] }
 0x399   :  { %6321 = vmatpush1.bf16.msra.mxu0 %v5961_v46  ;;  %v6651_v34 = vpop.permute.xlu1 %6650  ;;  %6252 = vmatmul.mubr.bf16.vlgmr.msra.gmra.mrb[16].mxu1 %v12181_v0  ;;  %v7008_v45 = vmax.bf16 %v13362_v49, %v6984_v47 }
 0x39a   :  { %v6649_v13 = vpop.permute.xlu0 %6648  ;;  %8697 = vmatprep.mubr.msk.bf16.mxu1 %vm1218_vm1, %v12188_v20 }
 0x39b   :  { %7574 = vrot.lane.b32.xlu1 %v12174_v25, %s9263_s4  ;;  %v6688_v40 = vsel %vm6686_vm5, %v6647_v22, %v6649_v13 }
 0x39c   :  { %7368 = vrot.lane.b32.xlu0 %v12336_v61, %s9262_s22  ;;  %6325 = vmatmul.mubr.bf16.vlgmr.msra.gmra.mrb[16].mxu0 %v12181_v0  ;;  %v6689_v0 = vsel %vm6686_vm5, %v6649_v13, %v6651_v34  ;;  %v6556_v13 = vmax.bf16 %v13362_v49, %v6532_v2 }
 0x39d   :  { %7816 = vmatprep.subr.bf16.mxu0 %v6688_v40  ;;  %v6645_v6 = vpop.permute.xlu1 %6644  ;;  %8701 = vmatprep.mubr.msk.bf16.mxu0 %vm1218_vm1, %v12188_v20  ;;  %v6744_v40 = vld [vmem:[%s13292_s0 + $0x18] sm:$0xf] }
 0x39e   :  { %v6687_v33 = vsel %vm6686_vm5, %v6645_v6, %v6647_v22  ;;  %v12598_v37 = vpop.permute.xlu0 %6652  ;;  %v6748_v6 = vld [vmem:[%s13292_s0 + $0x34] sm:$0xf] }
 0x39f   :  { %7578 = vrot.lane.b32.xlu1 %v12193_v38, %s9263_s4  ;;  %7817 = vmatpush1.bf16.msra.mxu0 %v6687_v33  ;;  %v6690_v25 = vsel %vm6686_vm5, %v6651_v34, %v12598_v37  ;;  %v6552_v34 = vmax.bf16 %v13362_v49, %v6528_v39 }
 0x3a0   :  { %7576 = vrot.lane.b32.xlu0 %v12199_v17, %s9263_s4  ;;  %7889 = vmatprep.subr.bf16.mxu1 %v6690_v25 }
 0x3a1   :  { %7890 = vmatpush1.bf16.msra.mxu1 %v6689_v0  ;;  %v6663_v1 = vpop.permute.xlu1 %6662 }
 0x3a2   :  { %v6661_v20 = vpop.permute.xlu0 %6660  ;;  %6262 = vmatmul.mubr.bf16.gmra.mrb[20].mxu1 %v12228_v48 }
 0x3a3   :  { %7572 = vrot.lane.b32.xlu1 %v12215_v44, %s9263_s4  ;;  %v6694_v38 = vsel %vm6686_vm5, %v6661_v20, %v6663_v1  ;;  %8698 = vmatprep.mubr.msk.bf16.mxu1 %vm1218_vm1, %v12242_v59 }
 0x3a4   :  { %7580 = vrot.lane.b32.xlu0 %v12380_v5, %s9263_s4  ;;  %6335 = vmatmul.mubr.bf16.gmra.mrb[20].mxu0 %v12228_v48 }
 0x3a5   :  { %7818 = vmatprep.subr.bf16.mxu0 %v6694_v38  ;;  %v12616_v17 = vpop.permute.xlu1 %6666  ;;  %8702 = vmatprep.mubr.msk.bf16.mxu0 %vm1218_vm1, %v12242_v59  ;;  %v6772_v38 = vmax.bf16 %v13362_v49, %v6748_v6 }
 0x3a6   :  { %v6665_v26 = vpop.permute.xlu0 %6664 }
 0x3a7   :  { %v6695_v53 = vsel %vm6686_vm5, %v6663_v1, %v6665_v26  ;;  %7590 = vrot.lane.b32.xlu1 %v12247_v60, %s9263_s4  ;;  %v6696_v44 = vsel %vm6686_vm5, %v6665_v26, %v12616_v17  ;;  %v6752_v26 = vld [vmem:[%s13292_s0 + $0x50] sm:$0xf] }
 0x3a8   :  { %7588 = vrot.lane.b32.xlu0 %v12260_v7, %s9263_s4  ;;  %7891 = vmatprep.subr.bf16.mxu1 %v6696_v44 }
 0x3a9   :  { %7892 = vmatpush1.bf16.msra.mxu1 %v6695_v53  ;;  %v6675_v48 = vpop.permute.xlu1 %6674  ;;  %v6756_v53 = vld [vmem:[%s13292_s0 + $0x6c] sm:$0xf] }
 0x3aa   :  { %v6659_v5 = vpop.permute.xlu0 %6658  ;;  %6272 = vmatmul.mubr.bf16.gmra.mrb[24].mxu1 %v12275_v24 }
 0x3ab   :  { %v6693_v59 = vsel %vm6686_vm5, %v6659_v5, %v6661_v20  ;;  %7594 = vrot.lane.b32.xlu1 %v12434_v30, %s9263_s4  ;;  %8699 = vmatprep.mubr.msk.bf16.mxu1 %vm1218_vm1, %v12295_v27  ;;  %v8724_v20 = vcombine.low %v6552_v34, %v6556_v13  ;;  %v6988_v34 = vld [vmem:[%s13292_s0 + $0x6c] sm:$0xf] }
 0x3ac   :  { %7592 = vrot.lane.b32.xlu0 %v12284_v18, %s9263_s4  ;;  %6345 = vmatmul.mubr.bf16.gmra.mrb[24].mxu0 %v12275_v24  ;;  %v6512_v18 = vld [vmem:[%s13292_s0 + $0x18] sm:$0xf]  ;;  %v6516_v24 = vld [vmem:[%s13292_s0 + $0x34] sm:$0xf] }
 0x3ad   :  { %7819 = vmatpush1.bf16.msra.mxu0 %v6693_v59  ;;  %v6679_v60 = vpop.permute.xlu1 %6678  ;;  %8703 = vmatprep.mubr.msk.bf16.mxu0 %vm1218_vm1, %v12295_v27  ;;  %v12652_v27 = vld [vmem:[%s13293_s1 + $0x104] ss:$8 sps:$4 sm:$0xff]   ;;  %v6536_v15 = vmax.bf16 %v13362_v49, %v6512_v18  ;;  %v6540_v63 = vmax.bf16 %v13362_v49, %v6516_v24 }
 0x3ae   :  { %v6677_v7 = vpop.permute.xlu0 %6676 }
 0x3af   :  { %7602 = vrot.lane.b32.xlu1 %v12297_v51, %s9263_s4  ;;  %v6700_v29 = vsel %vm6686_vm5, %v6675_v48, %v6677_v7  ;;  %v6701_v58 = vsel %vm6686_vm5, %v6677_v7, %v6679_v60  ;;  %v6776_v7 = vmax.bf16 %v13362_v49, %v6752_v26 }
 0x3b0   :  { %7586 = vrot.lane.b32.xlu0 %v12309_v28, %s9263_s4  ;;  %7820 = vmatprep.subr.bf16.mxu0 %v6700_v29  ;;  %v6780_v29 = vmax.bf16 %v13362_v49, %v6756_v53 }
 0x3b1   :  { %v6673_v30 = vpop.permute.xlu1 %6672 }
 0x3b2   :  { %v6699_v51 = vsel %vm6686_vm5, %v6673_v30, %v6675_v48  ;;  %v12655_v8 = vpop.permute.xlu0 %6680  ;;  %6282 = vmatmul.mubr.bf16.gmra.mrb[28].mxu1 %v12324_v32  ;;  %v6760_v30 = vld [vmem:[%s13292_s0 + $0x88] sm:$0xf] }
 0x3b3   :  { %7606 = vrot.lane.b32.xlu1 %v12319_v12, %s9263_s4  ;;  %7821 = vmatpush1.bf16.msra.mxu0 %v6699_v51  ;;  %v6702_v28 = vsel %vm6686_vm5, %v6679_v60, %v12655_v8  ;;  %v12673_v12 = vpop.f32.mrb[36].mxu1  ;;  %v6764_v51 = vld [vmem:[%s13292_s0 + $0xa4] sm:$0xf] }
 0x3b4   :  { %7604 = vrot.lane.b32.xlu0 %v12331_v52, %s9263_s4  ;;  %6355 = vmatmul.mubr.bf16.gmra.mrb[28].mxu0 %v12324_v32  ;;  %v8710_v52 = vcombine.low %v6536_v15, %v6540_v63  ;;  %v12685_v42 = vpop.f32.mrb[37].mxu1  ;;  %v6788_v62 = vmax.bf16 %v13362_v49, %v6764_v51 }
 0x3b5   :  { %7893 = vmatprep.subr.bf16.mxu1 %v6702_v28  ;;  %v6881_v54 = vpop.permute.xlu1 %6880  ;;  %8825 = vmatprep.mubr.msk.bf16.mxu0 %vm1218_vm1, %v12652_v27  ;;  %v12695_v9 = vpop.f32.mrb[38].mxu1 }
 0x3b6   :  { %7894 = vmatpush1.bf16.msra.mxu1 %v6701_v58  ;;  %v6879_v50 = vpop.permute.xlu0 %6878  ;;  %8829 = vmatprep.mubr.msk.bf16.mxu1 %vm1218_vm1, %v12652_v27  ;;  %v12699_v22 = vpop.f32.mrb[39].mxu1  ;;  %v6976_v58 = vld [vmem:[%s13292_s0 + $0x18] sm:$0xf] }
 0x3b7   :  { %7600 = vrot.lane.b32.xlu1 %v12336_v61, %s9263_s4  ;;  %v6920_v32 = vsel %vm6918_vm6, %v6879_v50, %v6881_v54  ;;  %v12715_v33 = vpop.f32.mrb[40].mxu1 }
 0x3b8   :  { %7608 = vrot.lane.b32.xlu0 %v12469_v56, %s9263_s4  ;;  %7822 = vmatprep.subr.bf16.mxu0 %v6920_v32  ;;  %v12727_v44 = vpop.f32.mrb[41].mxu1 }
 0x3b9   :  { %v12697_v61 = vpop.permute.xlu1 %6884  ;;  %v12731_v48 = vpop.f32.mrb[42].mxu1 }
 0x3ba   :  { %v6883_v36 = vpop.permute.xlu0 %6882  ;;  %v12733_v59 = vpop.f32.mrb[43].mxu1 }
 0x3bb   :  { %v6921_v46 = vsel %vm6918_vm6, %v6881_v54, %v6883_v36  ;;  %6656 = vrot.lane.b32.xlu1 %v8710_v52, %s9259_s25  ;;  %v6922_v56 = vsel %vm6918_vm6, %v6883_v36, %v12697_v61  ;;  %v12751_v28 = vpop.f32.mrb[44].mxu1  ;;  %v6980_v54 = vld [vmem:[%s13292_s0 + $0x34] sm:$0xf]  ;;  %v7000_v36 = vmax.bf16 %v13362_v49, %v6976_v58 }
 0x3bc   :  { %6654 = vrot.lane.b32.xlu0 %v11726_v3, %s9259_s25  ;;  %7895 = vmatprep.subr.bf16.mxu1 %v6922_v56  ;;  %v6768_v3 = vmax.bf16 %v13362_v49, %v6744_v40 }
 0x3bd   :  { %7896 = vmatpush1.bf16.msra.mxu1 %v6921_v46  ;;  %v6893_v25 = vpop.permute.xlu1 %6892 }
 0x3be   :  { %v6877_v0 = vpop.permute.xlu0 %6876  ;;  %v8731_v24 = vcombine.low %v6768_v3, %v6772_v38 }
 0x3bf   :  { %v6919_v1 = vsel %vm6918_vm6, %v6877_v0, %v6879_v50  ;;  %6670 = vrot.lane.b32.xlu1 %v8717_v35, %s9259_s25  ;;  %v12767_v50 = vpop.f32.mrb[45].mxu1  ;;  %v7004_v35 = vmax.bf16 %v13362_v49, %v6980_v54  ;;  %v7012_v0 = vmax.bf16 %v13362_v49, %v6988_v34 }
 0x3c0   :  { %6668 = vrot.lane.b32.xlu0 %v11777_v23, %s9259_s25  ;;  %7823 = vmatpush1.bf16.msra.mxu0 %v6919_v1  ;;  %v12743_v23 = vcombine.high %v12358_v41, %v12361_v10  ;;  %v6784_v10 = vmax.bf16 %v13362_v49, %v6760_v30  ;;  %v12776_v32 = vpop.f32.mrb[46].mxu1  ;;  %v6992_v1 = vld [vmem:[%s13292_s0 + $0x88] sm:$0xf] }
 0x3c1   :  { %v6897_v5 = vpop.permute.xlu1 %6896  ;;  %v12778_v39 = vpop.f32.mrb[47].mxu1  ;;  %v8752_v6 = vcombine.low %v7000_v36, %v7004_v35  ;;  %v8759_v53 = vcombine.low %v7008_v45, %v7012_v0  ;;  %v7224_v36 = vld [vmem:[%s13292_s0 + $0x88] sm:$0xf]  ;;  %v7228_v35 = vld [vmem:[%s13292_s0 + $0xa4] sm:$0xf] }
 0x3c2   :  { %v6895_v60 = vpop.permute.xlu0 %6894  ;;  %v8745_v56 = vcombine.low %v6784_v10, %v6788_v62  ;;  %v7248_v34 = vmax.bf16 %v13362_v49, %v7224_v36  ;;  %v7444_v45 = vld [vmem:[%s13292_s0 + $0x34] sm:$0xf] }
 0x3c3   :  { %6684 = vrot.lane.b32.xlu1 %v8724_v20, %s9259_s25  ;;  %v6926_v18 = vsel %vm6918_vm6, %v6893_v25, %v6895_v60  ;;  %v6927_v4 = vsel %vm6918_vm6, %v6895_v60, %v6897_v5  ;;  %v6996_v20 = vld [vmem:[%s13292_s0 + $0xa4] sm:$0xf] }
 0x3c4   :  { %6682 = vrot.lane.b32.xlu0 %v11827_v57, %s9259_s25  ;;  %7824 = vmatprep.subr.bf16.mxu0 %v6926_v18  ;;  %v8738_v57 = vcombine.low %v6776_v7, %v6780_v29  ;;  %v7020_v60 = vmax.bf16 %v13362_v49, %v6996_v20  ;;  %v7208_v7 = vld [vmem:[%s13292_s0 + $0x18] sm:$0xf]  ;;  %v7212_v29 = vld [vmem:[%s13292_s0 + $0x34] sm:$0xf] }
 0x3c5   :  { %v6891_v15 = vpop.permute.xlu1 %6890  ;;  %v7232_v30 = vmax.bf16 %v13362_v49, %v7208_v7  ;;  %v7236_v51 = vmax.bf16 %v13362_v49, %v7212_v29 }
 0x3c6   :  { %v6925_v63 = vsel %vm6918_vm6, %v6891_v15, %v6893_v25  ;;  %v12754_v31 = vpop.permute.xlu0 %6898 }
 0x3c7   :  { %6888 = vrot.lane.b32.xlu1 %v8731_v24, %s9260_s16  ;;  %7825 = vmatpush1.bf16.msra.mxu0 %v6925_v63  ;;  %v6928_v41 = vsel %vm6918_vm6, %v6897_v5, %v12754_v31  ;;  %v7016_v5 = vmax.bf16 %v13362_v49, %v6992_v1  ;;  %v8773_v54 = vcombine.low %v7232_v30, %v7236_v51 }
 0x3c8   :  { %6886 = vrot.lane.b32.xlu0 %v12743_v23, %s9260_s16  ;;  %7897 = vmatprep.subr.bf16.mxu1 %v6928_v41  ;;  %v7220_v41 = vld [vmem:[%s13292_s0 + $0x6c] sm:$0xf] }
 0x3c9   :  { %7898 = vmatpush1.bf16.msra.mxu1 %v6927_v4  ;;  %v6909_v52 = vpop.permute.xlu1 %6908  ;;  %v8766_v63 = vcombine.low %v7016_v5, %v7020_v60  ;;  %v7448_v5 = vld [vmem:[%s13292_s0 + $0x50] sm:$0xf]  ;;  %v7452_v60 = vld [vmem:[%s13292_s0 + $0x6c] sm:$0xf] }
 0x3ca   :  { %v6907_v2 = vpop.permute.xlu0 %6906  ;;  %v7472_v30 = vmax.bf16 %v13362_v49, %v7448_v5  ;;  %v7476_v51 = vmax.bf16 %v13362_v49, %v7452_v60 }
 0x3cb   :  { %6902 = vrot.lane.b32.xlu1 %v8738_v57, %s9260_s16  ;;  %v6932_v46 = vsel %vm6918_vm6, %v6907_v2, %v6909_v52  ;;  %v7216_v57 = vld [vmem:[%s13292_s0 + $0x50] sm:$0xf] }
 0x3cc   :  { %6900 = vrot.lane.b32.xlu0 %v12774_v11, %s9260_s16  ;;  %7826 = vmatprep.subr.bf16.mxu0 %v6932_v46 }
 0x3cd   :  { %v12796_v13 = vpop.permute.xlu1 %6912 }
 0x3ce   :  { %v6911_v40 = vpop.permute.xlu0 %6910 }
 0x3cf   :  { %v6933_v25 = vsel %vm6918_vm6, %v6909_v52, %v6911_v40  ;;  %6916 = vrot.lane.b32.xlu1 %v8745_v56, %s9260_s16  ;;  %v6934_v21 = vsel %vm6918_vm6, %v6911_v40, %v12796_v13  ;;  %v7240_v52 = vmax.bf16 %v13362_v49, %v7216_v57  ;;  %v7252_v40 = vmax.bf16 %v13362_v49, %v7228_v35 }
 0x3d0   :  { %6914 = vrot.lane.b32.xlu0 %v12788_v19, %s9260_s16  ;;  %7899 = vmatprep.subr.bf16.mxu1 %v6934_v21  ;;  %v7440_v21 = vld [vmem:[%s13292_s0 + $0x18] sm:$0xf] }
 0x3d1   :  { %7900 = vmatpush1.bf16.msra.mxu1 %v6933_v25  ;;  %v7111_v3 = vpop.permute.xlu1 %7110  ;;  %v8787_v20 = vcombine.low %v7248_v34, %v7252_v40 }
 0x3d2   :  { %v6905_v38 = vpop.permute.xlu0 %6904 }
 0x3d3   :  { %v6931_v26 = vsel %vm6918_vm6, %v6905_v38, %v6907_v2  ;;  %7120 = vrot.lane.b32.xlu1 %v8752_v6, %s9261_s29  ;;  %v7244_v2 = vmax.bf16 %v13362_v49, %v7220_v41 }
 0x3d4   :  { %7118 = vrot.lane.b32.xlu0 %v12743_v23, %s9261_s29  ;;  %7827 = vmatpush1.bf16.msra.mxu0 %v6931_v26  ;;  %v7464_v26 = vmax.bf16 %v13362_v49, %v7440_v21 }
 0x3d5   :  { %v7115_v18 = vpop.permute.xlu1 %7114  ;;  %v8780_v25 = vcombine.low %v7240_v52, %v7244_v2 }
 0x3d6   :  { %v7113_v24 = vpop.permute.xlu0 %7112 }
 0x3d7   :  { %7134 = vrot.lane.b32.xlu1 %v8759_v53, %s9261_s29  ;;  %v7152_v15 = vsel %vm7150_vm7, %v7111_v3, %v7113_v24  ;;  %v7153_v46 = vsel %vm7150_vm7, %v7113_v24, %v7115_v18  ;;  %v7468_v53 = vmax.bf16 %v13362_v49, %v7444_v45 }
 0x3d8   :  { %7132 = vrot.lane.b32.xlu0 %v12774_v11, %s9261_s29  ;;  %7828 = vmatprep.subr.bf16.mxu0 %v7152_v15  ;;  %v7456_v15 = vld [vmem:[%s13292_s0 + $0x88] sm:$0xf] }
 0x3d9   :  { %v7109_v10 = vpop.permute.xlu1 %7108  ;;  %v8794_v24 = vcombine.low %v7464_v26, %v7468_v53 }
 0x3da   :  { %v7151_v62 = vsel %vm7150_vm7, %v7109_v10, %v7111_v3  ;;  %v12837_v58 = vpop.permute.xlu0 %7116 }
 0x3db   :  { %7148 = vrot.lane.b32.xlu1 %v8766_v63, %s9261_s29  ;;  %7829 = vmatpush1.bf16.msra.mxu0 %v7151_v62  ;;  %v7154_v4 = vsel %vm7150_vm7, %v7115_v18, %v12837_v58  ;;  %v7460_v63 = vld [vmem:[%s13292_s0 + $0xa4] sm:$0xf]  ;;  %v8801_v62 = vcombine.low %v7472_v30, %v7476_v51 }
 0x3dc   :  { %7146 = vrot.lane.b32.xlu0 %v12788_v19, %s9261_s29  ;;  %7901 = vmatprep.subr.bf16.mxu1 %v7154_v4  ;;  %v7484_v4 = vmax.bf16 %v13362_v49, %v7460_v63 }
 0x3dd   :  { %7902 = vmatpush1.bf16.msra.mxu1 %v7153_v46  ;;  %v7127_v56 = vpop.permute.xlu1 %7126 }
 0x3de   :  { %v7125_v47 = vpop.permute.xlu0 %7124 }
 0x3df   :  { %7352 = vrot.lane.b32.xlu1 %v8773_v54, %s9262_s22  ;;  %v7158_v6 = vsel %vm7150_vm7, %v7125_v47, %v7127_v56  ;;  %v7480_v54 = vmax.bf16 %v13362_v49, %v7456_v15 }
 0x3e0   :  { %7350 = vrot.lane.b32.xlu0 %v12743_v23, %s9262_s22  ;;  %7830 = vmatprep.subr.bf16.mxu0 %v7158_v6 }
 0x3e1   :  { %v12865_v0 = vpop.permute.xlu1 %7130  ;;  %v8808_v46 = vcombine.low %v7480_v54, %v7484_v4 }
 0x3e2   :  { %v7129_v1 = vpop.permute.xlu0 %7128 }
 0x3e3   :  { %v7159_v3 = vsel %vm7150_vm7, %v7127_v56, %v7129_v1  ;;  %7366 = vrot.lane.b32.xlu1 %v8780_v25, %s9262_s22  ;;  %v7160_v38 = vsel %vm7150_vm7, %v7129_v1, %v12865_v0 }
 0x3e4   :  { %7364 = vrot.lane.b32.xlu0 %v12774_v11, %s9262_s22  ;;  %7903 = vmatprep.subr.bf16.mxu1 %v7160_v38 }
 0x3e5   :  { %7904 = vmatpush1.bf16.msra.mxu1 %v7159_v3  ;;  %v7139_v7 = vpop.permute.xlu1 %7138 }
 0x3e6   :  { %v7123_v29 = vpop.permute.xlu0 %7122 }
 0x3e7   :  { %v7157_v18 = vsel %vm7150_vm7, %v7123_v29, %v7125_v47  ;;  %7380 = vrot.lane.b32.xlu1 %v8787_v20, %s9262_s22 }
 0x3e8   :  { %7378 = vrot.lane.b32.xlu0 %v12788_v19, %s9262_s22  ;;  %7831 = vmatpush1.bf16.msra.mxu0 %v7157_v18 }
 0x3e9   :  { %v7143_v57 = vpop.permute.xlu1 %7142 }
 0x3ea   :  { %v7141_v41 = vpop.permute.xlu0 %7140 }
 0x3eb   :  { %7584 = vrot.lane.b32.xlu1 %v8794_v24, %s9263_s4  ;;  %v7164_v10 = vsel %vm7150_vm7, %v7139_v7, %v7141_v41  ;;  %v7165_v56 = vsel %vm7150_vm7, %v7141_v41, %v7143_v57 }
 0x3ec   :  { %7582 = vrot.lane.b32.xlu0 %v12743_v23, %s9263_s4  ;;  %7832 = vmatprep.subr.bf16.mxu0 %v7164_v10 }
 0x3ed   :  { %v7137_v52 = vpop.permute.xlu1 %7136 }
 0x3ee   :  { %v7163_v2 = vsel %vm7150_vm7, %v7137_v52, %v7139_v7  ;;  %v12900_v36 = vpop.permute.xlu0 %7144 }
 0x3ef   :  { %7598 = vrot.lane.b32.xlu1 %v8801_v62, %s9263_s4  ;;  %7833 = vmatpush1.bf16.msra.mxu0 %v7163_v2  ;;  %v7166_v35 = vsel %vm7150_vm7, %v7143_v57, %v12900_v36 }
 0x3f0   :  { %7596 = vrot.lane.b32.xlu0 %v12774_v11, %s9263_s4  ;;  %7905 = vmatprep.subr.bf16.mxu1 %v7166_v35 }
 0x3f1   :  { %7906 = vmatpush1.bf16.msra.mxu1 %v7165_v56  ;;  %v7345_v49 = vpop.permute.xlu1 %7344 }
 0x3f2   :  { %v7343_v23 = vpop.permute.xlu0 %7342 }
 0x3f3   :  { %7612 = vrot.lane.b32.xlu1 %v8808_v46, %s9263_s4  ;;  %v7384_v47 = vsel %vm7382_vm8, %v7343_v23, %v7345_v49 }
 0x3f4   :  { %7610 = vrot.lane.b32.xlu0 %v12788_v19, %s9263_s4  ;;  %7834 = vmatprep.subr.bf16.mxu0 %v7384_v47 }
 0x3f5   :  { %v12912_v34 = vpop.permute.xlu1 %7348 }
 0x3f6   :  { %v7347_v40 = vpop.permute.xlu0 %7346 }
 0x3f7   :  { %v7385_v6 = vsel %vm7382_vm8, %v7345_v49, %v7347_v40  ;;  %v7386_v11 = vsel %vm7382_vm8, %v7347_v40, %v12912_v34 }
 0x3f8   :  { %7907 = vmatprep.subr.bf16.mxu1 %v7386_v11 }
 0x3f9   :  { %7908 = vmatpush1.bf16.msra.mxu1 %v7385_v6  ;;  %v7357_v25 = vpop.permute.xlu1 %7356 }
 0x3fa   :  { %v7341_v21 = vpop.permute.xlu0 %7340 }
 0x3fb   :  { %v7383_v45 = vsel %vm7382_vm8, %v7341_v21, %v7343_v23 }
 0x3fc   :  { %7835 = vmatpush1.bf16.msra.mxu0 %v7383_v45 }
 0x3fd   :  { %v7361_v1 = vpop.permute.xlu1 %7360 }
 0x3fe   :  { %v7359_v20 = vpop.permute.xlu0 %7358 }
 0x3ff   :  { %v7390_v19 = vsel %vm7382_vm8, %v7357_v25, %v7359_v20  ;;  %v7391_v5 = vsel %vm7382_vm8, %v7359_v20, %v7361_v1 }
 0x400   :  { %7836 = vmatprep.subr.bf16.mxu0 %v7390_v19 }
 0x401   :  { %v7355_v3 = vpop.permute.xlu1 %7354 }
 0x402   :  { %v7389_v38 = vsel %vm7382_vm8, %v7355_v3, %v7357_v25  ;;  %v12920_v26 = vpop.permute.xlu0 %7362 }
 0x403   :  { %7837 = vmatpush1.bf16.msra.mxu0 %v7389_v38  ;;  %v7392_v53 = vsel %vm7382_vm8, %v7361_v1, %v12920_v26 }
 0x404   :  { %7909 = vmatprep.subr.bf16.mxu1 %v7392_v53  ;;  %v12953_v53 = vld [vmem:[%s13293_s1 + $0x100] ss:$8 sps:$4 sm:$0xff]  }
 0x405   :  { %7910 = vmatpush1.bf16.msra.mxu1 %v7391_v5  ;;  %v7373_v60 = vpop.permute.xlu1 %7372 }
 0x406   :  { %v7371_v7 = vpop.permute.xlu0 %7370 }
 0x407   :  { %v7396_v29 = vsel %vm7382_vm8, %v7371_v7, %v7373_v60 }
 0x408   :  { %7838 = vmatprep.subr.bf16.mxu0 %v7396_v29 }
 0x409   :  { %v12926_v18 = vpop.permute.xlu1 %7376 }
 0x40a   :  { %v7375_v24 = vpop.permute.xlu0 %7374 }
 0x40b   :  { %v7397_v30 = vsel %vm7382_vm8, %v7373_v60, %v7375_v24  ;;  %v7398_v51 = vsel %vm7382_vm8, %v7375_v24, %v12926_v18  ;;  %v12960_v60 = vld [vmem:[%s13293_s1 + $0x114] ss:$8 sps:$4 sm:$0xff]  }
 0x40c   :  { %7911 = vmatprep.subr.bf16.mxu1 %v7398_v51 }
 0x40d   :  { %7912 = vmatpush1.bf16.msra.mxu1 %v7397_v30  ;;  %v7575_v15 = vpop.permute.xlu1 %7574 }
 0x40e   :  { %v7369_v63 = vpop.permute.xlu0 %7368 }
 0x40f   :  { %v7395_v57 = vsel %vm7382_vm8, %v7369_v63, %v7371_v7 }
 0x410   :  { %7839 = vmatpush1.bf16.msra.mxu0 %v7395_v57  ;;  %v12973_v57 = vld [vmem:[%s13293_s1 + $0x110] ss:$8 sps:$4 sm:$0xff]  }
 0x411   :  { %v7579_v41 = vpop.permute.xlu1 %7578 }
 0x412   :  { %v7577_v10 = vpop.permute.xlu0 %7576 }
 0x413   :  { %v7616_v62 = vsel %vm7614_vm9, %v7575_v15, %v7577_v10  ;;  %v7617_v35 = vsel %vm7614_vm9, %v7577_v10, %v7579_v41  ;;  %v9218_v10 = vld [vmem:[%s13293_s1 + $0x124] ss:$8 sps:$4 sm:$0xff]  }
 0x414   :  { %7840 = vmatprep.subr.bf16.mxu0 %v7616_v62 }
 0x415   :  { %v7573_v54 = vpop.permute.xlu1 %7572 }
 0x416   :  { %v7615_v4 = vsel %vm7614_vm9, %v7573_v54, %v7575_v15  ;;  %v12934_v52 = vpop.permute.xlu0 %7580 }
 0x417   :  { %7841 = vmatpush1.bf16.msra.mxu0 %v7615_v4  ;;  %v7618_v2 = vsel %vm7614_vm9, %v7579_v41, %v12934_v52 }
 0x418   :  { %7913 = vmatprep.subr.bf16.mxu1 %v7618_v2 }
 0x419   :  { %7914 = vmatpush1.bf16.msra.mxu1 %v7617_v35  ;;  %v7591_v46 = vpop.permute.xlu1 %7590 }
 0x41a   :  { %v7589_v56 = vpop.permute.xlu0 %7588 }
 0x41b   :  { %v7622_v49 = vsel %vm7614_vm9, %v7589_v56, %v7591_v46 }
 0x41c   :  { %7842 = vmatprep.subr.bf16.mxu0 %v7622_v49  ;;  %v13001_v49 = vld [vmem:[%s13293_s1 + $0x134] ss:$8 sps:$4 sm:$0xff]  }
 0x41d   :  { %v12940_v23 = vpop.permute.xlu1 %7594 }
 0x41e   :  { %v7593_v47 = vpop.permute.xlu0 %7592 }
 0x41f   :  { %v7623_v40 = vsel %vm7614_vm9, %v7591_v46, %v7593_v47  ;;  %v7624_v6 = vsel %vm7614_vm9, %v7593_v47, %v12940_v23  ;;  %v12992_v46 = vld [vmem:[%s13293_s1 + $0x120] ss:$8 sps:$4 sm:$0xff]  }
 0x420   :  { %7915 = vmatprep.subr.bf16.mxu1 %v7624_v6 }
 0x421   :  { %7916 = vmatpush1.bf16.msra.mxu1 %v7623_v40  ;;  %v7603_v11 = vpop.permute.xlu1 %7602 }
 0x422   :  { %v7587_v25 = vpop.permute.xlu0 %7586 }
 0x423   :  { %v7621_v21 = vsel %vm7614_vm9, %v7587_v25, %v7589_v56 }
 0x424   :  { %7843 = vmatpush1.bf16.msra.mxu0 %v7621_v21  ;;  %v13013_v21 = vld [vmem:[%s13293_s1 + $0x130] ss:$8 sps:$4 sm:$0xff]  }
 0x425   :  { %v7607_v45 = vpop.permute.xlu1 %7606 }
 0x426   :  { %v7605_v1 = vpop.permute.xlu0 %7604 }
 0x427   :  { %v7628_v20 = vsel %vm7614_vm9, %v7603_v11, %v7605_v1  ;;  %v7629_v7 = vsel %vm7614_vm9, %v7605_v1, %v7607_v45 }
 0x428   :  { %7844 = vmatprep.subr.bf16.mxu0 %v7628_v20 }
 0x429   :  { %v7601_v19 = vpop.permute.xlu1 %7600 }
 0x42a   :  { %v7627_v3 = vsel %vm7614_vm9, %v7601_v19, %v7603_v11  ;;  %v12948_v38 = vpop.permute.xlu0 %7608 }
 0x42b   :  { %7845 = vmatpush1.bf16.msra.mxu0 %v7627_v3  ;;  %v7630_v5 = vsel %vm7614_vm9, %v7607_v45, %v12948_v38 }
 0x42c   :  { %7917 = vmatprep.subr.bf16.mxu1 %v7630_v5 }
 0x42d   :  { %7918 = vmatpush1.bf16.msra.mxu1 %v7629_v7  ;;  %v6657_v29 = vpop.permute.xlu1 %6656 }
 0x42e   :  { %v6655_v24 = vpop.permute.xlu0 %6654  ;;  %7849 = vmatmul.mubr.bf16.vlgmr.msra.gmra.mrb[0].mxu0 %v12953_v53 }
 0x42f   :  { %v6691_v30 = vsel %vm6686_vm5, %v12598_v37, %v6655_v24  ;;  %v6692_v51 = vsel %vm6686_vm5, %v6655_v24, %v6657_v29  ;;  %8826 = vmatprep.mubr.msk.bf16.mxu0 %vm1218_vm1, %v12960_v60 }
 0x430   :  { %7922 = vmatmul.mubr.bf16.vlgmr.msra.gmra.mrb[16].mxu1 %v12953_v53  ;;  %7962 = vmatprep.subr.bf16.mxu0 %v6692_v51 }
 0x431   :  { %8837 = vmatprep.subr.bf16.mxu1 %v6692_v51  ;;  %7963 = vmatpush1.bf16.msra.mxu0 %v6691_v30  ;;  %v6671_v15 = vpop.permute.xlu1 %6670 }
 0x432   :  { %8852 = vmatpush1.bf16.msra.mxu1 %v6691_v30  ;;  %v6669_v63 = vpop.permute.xlu0 %6668  ;;  %8830 = vmatprep.mubr.msk.bf16.mxu1 %vm1218_vm1, %v12960_v60 }
 0x433   :  { %v6697_v37 = vsel %vm6686_vm5, %v12616_v17, %v6669_v63  ;;  %v6698_v41 = vsel %vm6686_vm5, %v6669_v63, %v6671_v15 }
 0x434   :  { %7964 = vmatprep.subr.bf16.mxu0 %v6698_v41  ;;  %8838 = vmatprep.subr.bf16.mxu1 %v6698_v41 }
 0x435   :  { %7965 = vmatpush1.bf16.msra.mxu0 %v6697_v37  ;;  %v6685_v62 = vpop.permute.xlu1 %6684 }
 0x436   :  { %8853 = vmatpush1.bf16.msra.mxu1 %v6697_v37  ;;  %v6683_v54 = vpop.permute.xlu0 %6682  ;;  %7859 = vmatmul.mubr.bf16.gmra.mrb[4].mxu0 %v12973_v57 }
 0x437   :  { %v6703_v4 = vsel %vm6686_vm5, %v12655_v8, %v6683_v54  ;;  %v6704_v2 = vsel %vm6686_vm5, %v6683_v54, %v6685_v62  ;;  %8827 = vmatprep.mubr.msk.bf16.mxu0 %vm1218_vm1, %v9218_v10 }
 0x438   :  { %7932 = vmatmul.mubr.bf16.gmra.mrb[20].mxu1 %v12973_v57  ;;  %7966 = vmatprep.subr.bf16.mxu0 %v6704_v2 }
 0x439   :  { %8839 = vmatprep.subr.bf16.mxu1 %v6704_v2  ;;  %7967 = vmatpush1.bf16.msra.mxu0 %v6703_v4  ;;  %v6889_v17 = vpop.permute.xlu1 %6888 }
 0x43a   :  { %8854 = vmatpush1.bf16.msra.mxu1 %v6703_v4  ;;  %v6887_v35 = vpop.permute.xlu0 %6886  ;;  %8831 = vmatprep.mubr.msk.bf16.mxu1 %vm1218_vm1, %v9218_v10 }
 0x43b   :  { %v6923_v8 = vsel %vm6918_vm6, %v12697_v61, %v6887_v35  ;;  %v6924_v56 = vsel %vm6918_vm6, %v6887_v35, %v6889_v17 }
 0x43c   :  { %7968 = vmatprep.subr.bf16.mxu0 %v6924_v56  ;;  %8840 = vmatprep.subr.bf16.mxu1 %v6924_v56 }
 0x43d   :  { %7969 = vmatpush1.bf16.msra.mxu0 %v6923_v8  ;;  %v6903_v47 = vpop.permute.xlu1 %6902 }
 0x43e   :  { %8855 = vmatpush1.bf16.msra.mxu1 %v6923_v8  ;;  %v6901_v40 = vpop.permute.xlu0 %6900  ;;  %7869 = vmatmul.mubr.bf16.gmra.mrb[8].mxu0 %v12992_v46 }
 0x43f   :  { %v6929_v6 = vsel %vm6918_vm6, %v12754_v31, %v6901_v40  ;;  %v6930_v61 = vsel %vm6918_vm6, %v6901_v40, %v6903_v47  ;;  %8828 = vmatprep.mubr.msk.bf16.mxu0 %vm1218_vm1, %v13001_v49 }
 0x440   :  { %7942 = vmatmul.mubr.bf16.gmra.mrb[24].mxu1 %v12992_v46  ;;  %7970 = vmatprep.subr.bf16.mxu0 %v6930_v61 }
 0x441   :  { %8841 = vmatprep.subr.bf16.mxu1 %v6930_v61  ;;  %7971 = vmatpush1.bf16.msra.mxu0 %v6929_v6  ;;  %v6917_v11 = vpop.permute.xlu1 %6916 }
 0x442   :  { %8856 = vmatpush1.bf16.msra.mxu1 %v6929_v6  ;;  %v6915_v25 = vpop.permute.xlu0 %6914  ;;  %8832 = vmatprep.mubr.msk.bf16.mxu1 %vm1218_vm1, %v13001_v49 }
 0x443   :  { %v6935_v31 = vsel %vm6918_vm6, %v12796_v13, %v6915_v25  ;;  %v6936_v45 = vsel %vm6918_vm6, %v6915_v25, %v6917_v11 }
 0x444   :  { %7972 = vmatprep.subr.bf16.mxu0 %v6936_v45  ;;  %8842 = vmatprep.subr.bf16.mxu1 %v6936_v45 }
 0x445   :  { %7973 = vmatpush1.bf16.msra.mxu0 %v6935_v31  ;;  %v7121_v1 = vpop.permute.xlu1 %7120 }
 0x446   :  { %8857 = vmatpush1.bf16.msra.mxu1 %v6935_v31  ;;  %v7119_v20 = vpop.permute.xlu0 %7118  ;;  %7879 = vmatmul.mubr.bf16.gmra.mrb[12].mxu0 %v13013_v21 }
 0x447   :  { %v7155_v19 = vsel %vm7150_vm7, %v12837_v58, %v7119_v20  ;;  %v7156_v3 = vsel %vm7150_vm7, %v7119_v20, %v7121_v1  ;;  %8833 = vmatprep.mubr.msk.bf16.mxu0 %vm1218_vm1, %v12652_v27 }
 0x448   :  { %7952 = vmatmul.mubr.bf16.gmra.mrb[28].mxu1 %v13013_v21  ;;  %7974 = vmatprep.subr.bf16.mxu0 %v7156_v3 }
 0x449   :  { %8843 = vmatprep.subr.bf16.mxu1 %v7156_v3  ;;  %7975 = vmatpush1.bf16.msra.mxu0 %v7155_v19  ;;  %v7135_v13 = vpop.permute.xlu1 %7134 }
 0x44a   :  { %8858 = vmatpush1.bf16.msra.mxu1 %v7155_v19  ;;  %v7133_v5 = vpop.permute.xlu0 %7132  ;;  %8835 = vmatprep.mubr.msk.bf16.mxu1 %vm1218_vm1, %v9218_v10 }
 0x44b   :  { %v7161_v7 = vsel %vm7150_vm7, %v12865_v0, %v7133_v5  ;;  %v7162_v58 = vsel %vm7150_vm7, %v7133_v5, %v7135_v13 }
 0x44c   :  { %7976 = vmatprep.subr.bf16.mxu0 %v7162_v58  ;;  %8844 = vmatprep.subr.bf16.mxu1 %v7162_v58 }
 0x44d   :  { %7977 = vmatpush1.bf16.msra.mxu0 %v7161_v7  ;;  %v7149_v29 = vpop.permute.xlu1 %7148 }
 0x44e   :  { %8859 = vmatpush1.bf16.msra.mxu1 %v7161_v7  ;;  %v7147_v27 = vpop.permute.xlu0 %7146 }
 0x44f   :  { %v7167_v24 = vsel %vm7150_vm7, %v12900_v36, %v7147_v27  ;;  %v7168_v30 = vsel %vm7150_vm7, %v7147_v27, %v7149_v29  ;;  %v8877_v29 = vld [vmem:[%s13294_s2 + $0x38] sm:$0xff] }
 0x450   :  { %7978 = vmatprep.subr.bf16.mxu0 %v7168_v30  ;;  %8845 = vmatprep.subr.bf16.mxu1 %v7168_v30 }
 0x451   :  { %7979 = vmatpush1.bf16.msra.mxu0 %v7167_v24  ;;  %v7353_v51 = vpop.permute.xlu1 %7352 }
 0x452   :  { %8860 = vmatpush1.bf16.msra.mxu1 %v7167_v24  ;;  %v7351_v15 = vpop.permute.xlu0 %7350 }
 0x453   :  { %v7387_v0 = vsel %vm7382_vm8, %v12912_v34, %v7351_v15  ;;  %v7388_v63 = vsel %vm7382_vm8, %v7351_v15, %v7353_v51  ;;  %v8880_v15 = vld [vmem:[%s13294_s2 + $0x60] sm:$0xff] }
 0x454   :  { %7980 = vmatprep.subr.bf16.mxu0 %v7388_v63  ;;  %8846 = vmatprep.subr.bf16.mxu1 %v7388_v63 }
 0x455   :  { %7981 = vmatpush1.bf16.msra.mxu0 %v7387_v0  ;;  %v7367_v37 = vpop.permute.xlu1 %7366 }
 0x456   :  { %8861 = vmatpush1.bf16.msra.mxu1 %v7387_v0  ;;  %v7365_v41 = vpop.permute.xlu0 %7364 }
 0x457   :  { %v7393_v36 = vsel %vm7382_vm8, %v12920_v26, %v7365_v41  ;;  %v7394_v10 = vsel %vm7382_vm8, %v7365_v41, %v7367_v37  ;;  %v8883_v37 = vld [vmem:[%s13294_s2 + $0x68] sm:$0xff] }
 0x458   :  { %7982 = vmatprep.subr.bf16.mxu0 %v7394_v10  ;;  %8847 = vmatprep.subr.bf16.mxu1 %v7394_v10 }
 0x459   :  { %7983 = vmatpush1.bf16.msra.mxu0 %v7393_v36  ;;  %v7381_v62 = vpop.permute.xlu1 %7380 }
 0x45a   :  { %8862 = vmatpush1.bf16.msra.mxu1 %v7393_v36  ;;  %v7379_v54 = vpop.permute.xlu0 %7378 }
 0x45b   :  { %v7399_v34 = vsel %vm7382_vm8, %v12926_v18, %v7379_v54  ;;  %v7400_v4 = vsel %vm7382_vm8, %v7379_v54, %v7381_v62  ;;  %v8886_v62 = vld [vmem:[%s13294_s2 + $0x90] sm:$0xff] }
 0x45c   :  { %7984 = vmatprep.subr.bf16.mxu0 %v7400_v4  ;;  %8848 = vmatprep.subr.bf16.mxu1 %v7400_v4 }
 0x45d   :  { %7985 = vmatpush1.bf16.msra.mxu0 %v7399_v34  ;;  %v7585_v2 = vpop.permute.xlu1 %7584 }
 0x45e   :  { %8863 = vmatpush1.bf16.msra.mxu1 %v7399_v34  ;;  %v7583_v17 = vpop.permute.xlu0 %7582 }
 0x45f   :  { %v7619_v26 = vsel %vm7614_vm9, %v12934_v52, %v7583_v17  ;;  %v7620_v35 = vsel %vm7614_vm9, %v7583_v17, %v7585_v2  ;;  %v8889_v2 = vld [vmem:[%s13294_s2 + $0x98] sm:$0xff] }
 0x460   :  { %7986 = vmatprep.subr.bf16.mxu0 %v7620_v35  ;;  %8849 = vmatprep.subr.bf16.mxu1 %v7620_v35 }
 0x461   :  { %7987 = vmatpush1.bf16.msra.mxu0 %v7619_v26  ;;  %v7599_v8 = vpop.permute.xlu1 %7598 }
 0x462   :  { %8864 = vmatpush1.bf16.msra.mxu1 %v7619_v26  ;;  %v7597_v56 = vpop.permute.xlu0 %7596 }
 0x463   :  { %v7625_v18 = vsel %vm7614_vm9, %v12940_v23, %v7597_v56  ;;  %v7626_v47 = vsel %vm7614_vm9, %v7597_v56, %v7599_v8  ;;  %v8892_v56 = vld [vmem:[%s13294_s2 + $0xc0] sm:$0xff] }
 0x464   :  { %7988 = vmatprep.subr.bf16.mxu0 %v7626_v47  ;;  %8850 = vmatprep.subr.bf16.mxu1 %v7626_v47 }
 0x465   :  { %7989 = vmatpush1.bf16.msra.mxu0 %v7625_v18  ;;  %v7613_v40 = vpop.permute.xlu1 %7612 }
 0x466   :  { %8865 = vmatpush1.bf16.msra.mxu1 %v7625_v18  ;;  %v7611_v6 = vpop.permute.xlu0 %7610 }
 0x467   :  { %v7631_v52 = vsel %vm7614_vm9, %v12948_v38, %v7611_v6  ;;  %v7632_v61 = vsel %vm7614_vm9, %v7611_v6, %v7613_v40  ;;  %v8895_v40 = vld [vmem:[%s13294_s2 + $0xc8] sm:$0xff] }
 0x468   :  { %7990 = vmatprep.subr.bf16.mxu0 %v7632_v61  ;;  %8851 = vmatprep.subr.bf16.mxu1 %v7632_v61 }
 0x469   :  { %7991 = vmatpush1.bf16.msra.mxu0 %v7631_v52 }
 0x46a   :  { %8866 = vmatpush1.bf16.msra.mxu1 %v7631_v52 }
 0x46c   :  { %7995 = vmatmul.mubr.bf16.vlgmr.msra.gmra.mrb[16].mxu0 %v12953_v53 }
 0x46d   :  { %8015 = vmatmul.mubr.bf16.vlgmr.msra.gmra.mrb[48].mxu1 %v12992_v46  ;;  %8834 = vmatprep.mubr.msk.bf16.mxu0 %vm1218_vm1, %v12960_v60 }
 0x46e   :  { %8836 = vmatprep.mubr.msk.bf16.mxu1 %vm1218_vm1, %v13001_v49 }
 0x474   :  { %8005 = vmatmul.mubr.bf16.gmra.mrb[20].mxu0 %v12973_v57 }
 0x475   :  { %8025 = vmatmul.mubr.bf16.gmra.mrb[52].mxu1 %v13013_v21 }
 0x47f   :  { %v6346_v23 = vpop.f32.mrb[24].mxu0 }
 0x480   :  { %v13061_v38 = vadd.f32 %v6346_v23, %v12715_v33  ;;  %v6348_v11 = vpop.f32.mrb[25].mxu0  ;;  %v8898_v23 = vld [vmem:[%s13294_s2 + $0xf0] sm:$0xff] }
 0x481   :  { %v13064_v25 = vadd.f32 %v6348_v11, %v12727_v44  ;;  %v6350_v53 = vpop.f32.mrb[26].mxu0 }
 0x482   :  { %v13067_v46 = vadd.f32 %v6350_v53, %v12731_v48  ;;  %v6352_v60 = vpop.f32.mrb[27].mxu0 }
 0x483   :  { %v13070_v31 = vadd.f32 %v6352_v60, %v12733_v59  ;;  %v8868_v59 = vld [vmem:[%s13294_s2] sm:$0xff] }
 0x487   :  { %v6356_v49 = vpop.f32.mrb[28].mxu0 }
 0x488   :  { %v13073_v57 = vadd.f32 %v6356_v49, %v12751_v28  ;;  %v6358_v21 = vpop.f32.mrb[29].mxu0  ;;  %v8901_v49 = vld [vmem:[%s13294_s2 + $0xf8] sm:$0xff] }
 0x489   :  { %v13076_v33 = vadd.f32 %v6358_v21, %v12767_v50  ;;  %v6360_v45 = vpop.f32.mrb[30].mxu0  ;;  %v8871_v50 = vld [vmem:[%s13294_s2 + $0x8] sm:$0xff] }
 0x48a   :  { %v13079_v44 = vadd.f32 %v6360_v45, %v12776_v32  ;;  %v6362_v1 = vpop.f32.mrb[31].mxu0  ;;  %v8874_v32 = vld [vmem:[%s13294_s2 + $0x30] sm:$0xff] }
 0x48b   :  { %v13082_v48 = vadd.f32 %v6362_v1, %v12778_v39 }
 0x501   :  { %v7850_v20 = vpop.f32.mrb[0].mxu0 }
 0x502   :  { %v8869_v19 = vadd.f32 %v8868_v59, %v7850_v20  ;;  %v7852_v28 = vpop.f32.mrb[1].mxu0  ;;  %v8904_v59 = vld [vmem:[%s13294_s2 + $0x120] sm:$0xff] }
 0x503   :  { %v8872_v3 = vadd.f32 %v8871_v50, %v7852_v28  ;;  %v7923_v13 = vpop.f32.mrb[16].mxu1  ;;  %v7854_v5 = vpop.f32.mrb[2].mxu0  ;;  %v8907_v50 = vld [vmem:[%s13294_s2 + $0x128] sm:$0xff] }
 0x504   :  { %8131 = vst [vmem:[%s13294_s2] sm:$0xff] %v8869_v19  ;;  %8133 = vst [vmem:[%s13294_s2 + $0x10] sm:$0xff] %v7923_v13  ;;  %v8875_v39 = vadd.f32 %v8874_v32, %v7854_v5  ;;  %v7925_v7 = vpop.f32.mrb[17].mxu1  ;;  %v7856_v58 = vpop.f32.mrb[3].mxu0  ;;  %v8910_v32 = vld [vmem:[%s13294_s2 + $0x150] sm:$0xff] }
 0x505   :  { %8132 = vst [vmem:[%s13294_s2 + $0x8] sm:$0xff] %v8872_v3  ;;  %8134 = vst [vmem:[%s13294_s2 + $0x18] sm:$0xff] %v7925_v7  ;;  %v8878_v27 = vadd.f32 %v8877_v29, %v7856_v58  ;;  %v7927_v24 = vpop.f32.mrb[18].mxu1  ;;  %v8913_v29 = vld [vmem:[%s13294_s2 + $0x158] sm:$0xff] }
 0x506   :  { %8137 = vst [vmem:[%s13294_s2 + $0x30] sm:$0xff] %v8875_v39  ;;  %8139 = vst [vmem:[%s13294_s2 + $0x40] sm:$0xff] %v7927_v24  ;;  %v7929_v30 = vpop.f32.mrb[19].mxu1 }
 0x507   :  { %8138 = vst [vmem:[%s13294_s2 + $0x38] sm:$0xff] %v8878_v27  ;;  %8140 = vst [vmem:[%s13294_s2 + $0x48] sm:$0xff] %v7929_v30 }
 0x509   :  { %v7860_v51 = vpop.f32.mrb[4].mxu0 }
 0x50a   :  { %v8881_v0 = vadd.f32 %v8880_v15, %v7860_v51  ;;  %v7862_v63 = vpop.f32.mrb[5].mxu0 }
 0x50b   :  { %v8884_v41 = vadd.f32 %v8883_v37, %v7862_v63  ;;  %v7933_v36 = vpop.f32.mrb[20].mxu1  ;;  %v7864_v10 = vpop.f32.mrb[6].mxu0 }
 0x50c   :  { %8143 = vst [vmem:[%s13294_s2 + $0x60] sm:$0xff] %v8881_v0  ;;  %8145 = vst [vmem:[%s13294_s2 + $0x70] sm:$0xff] %v7933_v36  ;;  %v8887_v54 = vadd.f32 %v8886_v62, %v7864_v10  ;;  %v7935_v34 = vpop.f32.mrb[21].mxu1  ;;  %v7866_v4 = vpop.f32.mrb[7].mxu0 }
 0x50d   :  { %8144 = vst [vmem:[%s13294_s2 + $0x68] sm:$0xff] %v8884_v41  ;;  %8146 = vst [vmem:[%s13294_s2 + $0x78] sm:$0xff] %v7935_v34  ;;  %v8890_v17 = vadd.f32 %v8889_v2, %v7866_v4  ;;  %v7937_v26 = vpop.f32.mrb[22].mxu1 }
 0x50e   :  { %8149 = vst [vmem:[%s13294_s2 + $0x90] sm:$0xff] %v8887_v54  ;;  %8151 = vst [vmem:[%s13294_s2 + $0xa0] sm:$0xff] %v7937_v26  ;;  %v7939_v35 = vpop.f32.mrb[23].mxu1 }
 0x50f   :  { %8150 = vst [vmem:[%s13294_s2 + $0x98] sm:$0xff] %v8890_v17  ;;  %8152 = vst [vmem:[%s13294_s2 + $0xa8] sm:$0xff] %v7939_v35 }
 0x511   :  { %v7870_v8 = vpop.f32.mrb[8].mxu0 }
 0x512   :  { %v8893_v18 = vadd.f32 %v8892_v56, %v7870_v8  ;;  %v7872_v47 = vpop.f32.mrb[9].mxu0 }
 0x513   :  { %v8896_v6 = vadd.f32 %v8895_v40, %v7872_v47  ;;  %v7943_v52 = vpop.f32.mrb[24].mxu1  ;;  %v7874_v61 = vpop.f32.mrb[10].mxu0 }
 0x514   :  { %8155 = vst [vmem:[%s13294_s2 + $0xc0] sm:$0xff] %v8893_v18  ;;  %8157 = vst [vmem:[%s13294_s2 + $0xd0] sm:$0xff] %v7943_v52  ;;  %v8899_v11 = vadd.f32 %v8898_v23, %v7874_v61  ;;  %v7945_v53 = vpop.f32.mrb[25].mxu1  ;;  %v7876_v60 = vpop.f32.mrb[11].mxu0 }
 0x515   :  { %8156 = vst [vmem:[%s13294_s2 + $0xc8] sm:$0xff] %v8896_v6  ;;  %8158 = vst [vmem:[%s13294_s2 + $0xd8] sm:$0xff] %v7945_v53  ;;  %v8902_v21 = vadd.f32 %v8901_v49, %v7876_v60  ;;  %v7947_v45 = vpop.f32.mrb[26].mxu1 }
 0x516   :  { %8161 = vst [vmem:[%s13294_s2 + $0xf0] sm:$0xff] %v8899_v11  ;;  %8163 = vst [vmem:[%s13294_s2 + $0x100] sm:$0xff] %v7947_v45  ;;  %v7949_v1 = vpop.f32.mrb[27].mxu1 }
 0x517   :  { %8162 = vst [vmem:[%s13294_s2 + $0xf8] sm:$0xff] %v8902_v21  ;;  %8164 = vst [vmem:[%s13294_s2 + $0x108] sm:$0xff] %v7949_v1 }
 0x519   :  { %v7880_v20 = vpop.f32.mrb[12].mxu0 }
 0x51a   :  { %v8905_v19 = vadd.f32 %v8904_v59, %v7880_v20  ;;  %v7882_v28 = vpop.f32.mrb[13].mxu0 }
 0x51b   :  { %v8908_v3 = vadd.f32 %v8907_v50, %v7882_v28  ;;  %v7953_v13 = vpop.f32.mrb[28].mxu1  ;;  %v7884_v5 = vpop.f32.mrb[14].mxu0 }
 0x51c   :  { %8167 = vst [vmem:[%s13294_s2 + $0x120] sm:$0xff] %v8905_v19  ;;  %8169 = vst [vmem:[%s13294_s2 + $0x130] sm:$0xff] %v7953_v13  ;;  %v8911_v39 = vadd.f32 %v8910_v32, %v7884_v5  ;;  %v7955_v7 = vpop.f32.mrb[29].mxu1  ;;  %v7886_v58 = vpop.f32.mrb[15].mxu0 }
 0x51d   :  { %8168 = vst [vmem:[%s13294_s2 + $0x128] sm:$0xff] %v8908_v3  ;;  %8170 = vst [vmem:[%s13294_s2 + $0x138] sm:$0xff] %v7955_v7  ;;  %v8914_v27 = vadd.f32 %v8913_v29, %v7886_v58  ;;  %v7957_v24 = vpop.f32.mrb[30].mxu1 }
 0x51e   :  { %8173 = vst [vmem:[%s13294_s2 + $0x150] sm:$0xff] %v8911_v39  ;;  %8175 = vst [vmem:[%s13294_s2 + $0x160] sm:$0xff] %v7957_v24  ;;  %v7959_v30 = vpop.f32.mrb[31].mxu1 }
 0x51f   :  { %8174 = vst [vmem:[%s13294_s2 + $0x158] sm:$0xff] %v8914_v27  ;;  %8176 = vst [vmem:[%s13294_s2 + $0x168] sm:$0xff] %v7959_v30 }
 0x53f   :  { %v7996_v51 = vpop.f32.mrb[16].mxu0 }
 0x540   :  { %v8917_v15 = vadd.f32 %v7996_v51, %v12565_v16  ;;  %v8016_v0 = vpop.f32.mrb[48].mxu1  ;;  %v7998_v63 = vpop.f32.mrb[17].mxu0 }
 0x541   :  { %v8944_v37 = vadd.f32 %v13061_v38, %v8016_v0  ;;  %v8920_v41 = vadd.f32 %v7998_v63, %v12570_v43  ;;  %v8018_v36 = vpop.f32.mrb[49].mxu1  ;;  %v8000_v10 = vpop.f32.mrb[18].mxu0 }
 0x542   :  { %8135 = vst [vmem:[%s13294_s2 + $0x20] sm:$0xff] %v8917_v15  ;;  %v8950_v62 = vadd.f32 %v13064_v25, %v8018_v36  ;;  %v8923_v54 = vadd.f32 %v8000_v10, %v12576_v55  ;;  %v8020_v34 = vpop.f32.mrb[50].mxu1  ;;  %v8002_v4 = vpop.f32.mrb[19].mxu0 }
 0x543   :  { %8159 = vst [vmem:[%s13294_s2 + $0xe0] sm:$0xff] %v8944_v37  ;;  %8136 = vst [vmem:[%s13294_s2 + $0x28] sm:$0xff] %v8920_v41  ;;  %v8956_v16 = vadd.f32 %v13067_v46, %v8020_v34  ;;  %v8926_v43 = vadd.f32 %v8002_v4, %v12578_v14  ;;  %v8022_v38 = vpop.f32.mrb[51].mxu1 }
 0x544   :  { %8160 = vst [vmem:[%s13294_s2 + $0xe8] sm:$0xff] %v8950_v62  ;;  %8141 = vst [vmem:[%s13294_s2 + $0x50] sm:$0xff] %v8923_v54  ;;  %v8962_v55 = vadd.f32 %v13070_v31, %v8022_v38 }
 0x545   :  { %8165 = vst [vmem:[%s13294_s2 + $0x110] sm:$0xff] %v8956_v16  ;;  %8142 = vst [vmem:[%s13294_s2 + $0x58] sm:$0xff] %v8926_v43 }
 0x546   :  { %8166 = vst [vmem:[%s13294_s2 + $0x118] sm:$0xff] %v8962_v55 }
 0x547   :  { %v8006_v14 = vpop.f32.mrb[20].mxu0 }
 0x548   :  { %v8929_v25 = vadd.f32 %v8006_v14, %v12673_v12  ;;  %v8026_v46 = vpop.f32.mrb[52].mxu1  ;;  %v8008_v2 = vpop.f32.mrb[21].mxu0 }
 0x549   :  { %v8968_v17 = vadd.f32 %v13073_v57, %v8026_v46  ;;  %v8932_v31 = vadd.f32 %v8008_v2, %v12685_v42  ;;  %v8028_v26 = vpop.f32.mrb[53].mxu1  ;;  %v8010_v35 = vpop.f32.mrb[22].mxu0 }
 0x54a   :  { %8147 = vst [vmem:[%s13294_s2 + $0x80] sm:$0xff] %v8929_v25  ;;  %v8974_v8 = vadd.f32 %v13076_v33, %v8028_v26  ;;  %v8935_v56 = vadd.f32 %v8010_v35, %v12695_v9  ;;  %v8030_v18 = vpop.f32.mrb[54].mxu1  ;;  %v8012_v47 = vpop.f32.mrb[23].mxu0 }
 0x54b   :  { %8171 = vst [vmem:[%s13294_s2 + $0x140] sm:$0xff] %v8968_v17  ;;  %8148 = vst [vmem:[%s13294_s2 + $0x88] sm:$0xff] %v8932_v31  ;;  %v8980_v12 = vadd.f32 %v13079_v44, %v8030_v18  ;;  %v8938_v42 = vadd.f32 %v8012_v47, %v12699_v22  ;;  %v8032_v57 = vpop.f32.mrb[55].mxu1 }
 0x54c   :  { %8172 = vst [vmem:[%s13294_s2 + $0x148] sm:$0xff] %v8974_v8  ;;  %8153 = vst [vmem:[%s13294_s2 + $0xb0] sm:$0xff] %v8935_v56  ;;  %v8986_v9 = vadd.f32 %v13082_v48, %v8032_v57 }
 0x54d   :  { %8177 = vst [vmem:[%s13294_s2 + $0x170] sm:$0xff] %v8980_v12  ;;  %8154 = vst [vmem:[%s13294_s2 + $0xb8] sm:$0xff] %v8938_v42 }
 0x54e   :  { %8178 = vst [vmem:[%s13294_s2 + $0x178] sm:$0xff] %v8986_v9 }

</bundles_post_ra>
